<compile_context>
chip_gen: v6e
topology: v6e:2x2x1
jax: 0.10.0
libtpu: 0.0.40
codegen_flags: <defaults>
</compile_context>

<pallas_src>
import functools
import math

import jax
import jax.numpy as jnp
from jax import lax
from jax.experimental import pallas as pl
from jax.experimental.pallas import tpu as pltpu

_NEG = -1e30  # finite stand-in for -inf (keeps 0 * pad finite in selection matmuls)


# ---------------------------------------------------------------------------
# In-kernel helpers (fused (H, W*C) layout)
# ---------------------------------------------------------------------------
def _shift_rows(a, dy, fill=0.0):
    """b[i, :] = a[i + dy, :]; rows shifted past the edge become `fill`."""
    if dy == 0:
        return a
    n = a.shape[0]
    pad = jnp.full((abs(dy),) + a.shape[1:], fill, a.dtype)
    if dy > 0:
        return jnp.concatenate([a[dy:], pad], axis=0)
    return jnp.concatenate([pad, a[: n + dy]], axis=0)


def _shift_lanes(a, off, fill=0.0):
    """b[:, j] = a[:, j + off]; lanes shifted past the edge become `fill`.

    XLU lane rotate + iota mask instead of a padded VMEM scratch (removes the
    unaligned vst/vld round trips flagged in the perf review).
    """
    if off == 0:
        return a
    n = a.shape[-1]
    rolled = pltpu.roll(a, (-off) % n, axis=1)
    j = lax.broadcasted_iota(jnp.int32, a.shape, 1)
    mask = (j < n - off) if off > 0 else (j >= -off)
    return jnp.where(mask, rolled, fill)


def _depthwise3x3(y, dw, c):
    """Depthwise 3x3 conv, stride 1, zero padding 1, fused (H, W*C) layout.

    dw: (3, 3, W*C) tap weights pre-tiled over w. acc starts from the first
    tap (no redundant zeros-init).
    """
    acc = None
    for ky in range(3):
        ys = _shift_rows(y, ky - 1)
        for kx in range(3):
            tap = _shift_lanes(ys, (kx - 1) * c) * dw[ky, kx]
            acc = tap if acc is None else acc + tap
    return acc


def _frn(y, m, gamma, beta, tau, eps, inv_hw):
    """FilterResponseNormalization in fused (H, W*C) layout.

    Per-channel mean(x^2, HW): sublane sum over H, then a tiny
    (1, WC) @ (WC, WC) 0/1 "sum-over-w + broadcast" matmul `m`.
    Everything stays lane-dense (no relayout to (H*W, C)).
    """
    ss = jnp.sum(y * y, axis=0, keepdims=True)                     # (1, WC)
    nu2 = jnp.dot(ss, m, preferred_element_type=jnp.float32) * inv_hw
    yn = y * lax.rsqrt(nu2 + jnp.abs(eps))
    return jnp.maximum(gamma * yn + beta, tau)


# ---------------------------------------------------------------------------
# Kernel: one batch element per grid step
# ---------------------------------------------------------------------------
def downblock_kernel(x_ref, dw1_ref, dw2_ref, pw1_ref, pw2_ref, m1_ref, m2_ref,
                     frn_in_ref, frn_out_ref, srow_ref, scol_ref, kskip_ref,
                     bskip_ref, eps_ref, o_ref, *, cin, cout, inv_hw):
    # ----- SepConvBlock 1: cin -> cout -------------------------------------
    y = jnp.maximum(x_ref[0], 0.0)                                  # ReLU (H, W*cin)
    y = _depthwise3x3(y, dw1_ref[...], cin)
    y = _frn(y, m1_ref[...], frn_in_ref[0], frn_in_ref[1], frn_in_ref[2],
             eps_ref[0], inv_hw)
    # pointwise 1x1 conv: bf16 MXU matmul against block-diagonal weights
    y = jnp.dot(y.astype(jnp.bfloat16), pw1_ref[...],
                preferred_element_type=jnp.float32)                 # (H, W*cout)
    y = _frn(y, m2_ref[...], frn_out_ref[0, 0], frn_out_ref[0, 1],
             frn_out_ref[0, 2], eps_ref[1], inv_hw)

    # ----- SepConvBlock 2: cout -> cout ------------------------------------
    y = jnp.maximum(y, 0.0)
    y = _depthwise3x3(y, dw2_ref[...], cout)
    y = _frn(y, m2_ref[...], frn_out_ref[1, 0], frn_out_ref[1, 1],
             frn_out_ref[1, 2], eps_ref[2], inv_hw)
    y = jnp.dot(y.astype(jnp.bfloat16), pw2_ref[...],
                preferred_element_type=jnp.float32)
    y = _frn(y, m2_ref[...], frn_out_ref[2, 0], frn_out_ref[2, 1],
             frn_out_ref[2, 2], eps_ref[3], inv_hw)

    # ----- MaxPool 3x3, stride 2, padding 1 (separable max + selections) ---
    cmax = jnp.maximum(jnp.maximum(_shift_lanes(y, -cout, _NEG), y),
                       _shift_lanes(y, cout, _NEG))                 # 3-tap col max
    cw = jnp.dot(cmax, scol_ref[...],
                 preferred_element_type=jnp.float32)                # keep even w
    rmax = jnp.maximum(jnp.maximum(_shift_rows(cw, -1, _NEG), cw),
                       _shift_rows(cw, 1, _NEG))                    # 3-tap row max
    pooled = jnp.dot(srow_ref[...], rmax,
                     preferred_element_type=jnp.float32)            # keep even h

    # ----- Skip branch: 1x1 conv, stride 2, with bias -----------------------
    # Re-read x_ref here (input block is still resident) instead of keeping
    # the input value live across the whole body.
    xs = jnp.dot(srow_ref[...], x_ref[0],
                 preferred_element_type=jnp.float32)                # even rows
    ident = jnp.dot(xs.astype(jnp.bfloat16), kskip_ref[...],
                    preferred_element_type=jnp.float32) + bskip_ref[...]

    o_ref[0] = (pooled + ident).astype(o_ref.dtype)


# ---------------------------------------------------------------------------
# Wrapper: NCHW in / NCHW out
# ---------------------------------------------------------------------------
def downblock_forward(x_nchw, p):
    N, Cin, H, W = x_nchw.shape
    Cout = p["pw1"].shape[1]
    OH = (H + 2 - 3) // 2 + 1
    OW = (W + 2 - 3) // 2 + 1
    WCin, WCout, OWCout = W * Cin, W * Cout, OW * Cout
    f32 = jnp.float32

    # ---- lane-dense fused input: (N, H, W*Cin) ----
    x_f = jnp.transpose(x_nchw, (0, 2, 3, 1)).reshape(N, H, WCin)

    # ---- fused / tiled parameter tensors (built once, outside the kernel) --
    dw1_f = jnp.tile(p["dw1"], (1, 1, W))                              # (3,3,WCin)
    dw2_f = jnp.tile(p["dw2"], (1, 1, W))                              # (3,3,WCout)

    eye_w = jnp.eye(W, dtype=f32)
    pw1_bd = jnp.kron(eye_w, p["pw1"]).astype(jnp.bfloat16)            # (WCin, WCout)
    pw2_bd = jnp.kron(eye_w, p["pw2"]).astype(jnp.bfloat16)            # (WCout, WCout)

    m1 = jnp.kron(jnp.ones((W, W), f32), jnp.eye(Cin, dtype=f32))      # (WCin, WCin)
    m2 = jnp.kron(jnp.ones((W, W), f32), jnp.eye(Cout, dtype=f32))     # (WCout, WCout)

    srow = (jnp.arange(H)[None, :] == 2 * jnp.arange(OH)[:, None]).astype(f32)
    sel_w = (jnp.arange(W)[:, None] == 2 * jnp.arange(OW)[None, :]).astype(f32)
    scol = jnp.kron(sel_w, jnp.eye(Cout, dtype=f32))                   # (WCout, OWCout)
    kskip = jnp.kron(sel_w, p["wskip"].T).astype(jnp.bfloat16)         # (WCin, OWCout)
    bskip_f = jnp.tile(p["bskip"], OW).reshape(1, OWCout)

    frn_in = jnp.stack([jnp.tile(p["g1a"], W), jnp.tile(p["b1a"], W),
                        jnp.tile(p["t1a"], W)])                        # (3, WCin)
    frn_out = jnp.stack([
        jnp.stack([jnp.tile(p["g" + k], W), jnp.tile(p["b" + k], W),
                   jnp.tile(p["t" + k], W)])
        for k in ("1b", "2a", "2b")])                                  # (3, 3, WCout)
    eps = p["eps"]                                                     # (4,) scalars

    def const_spec(shape):
        # constant-index weight block: single-buffered (no wasted 2x VMEM)
        zeros = (0,) * len(shape)
        return pl.BlockSpec(shape, lambda n: zeros,
                            pipeline_mode=pl.Buffered(buffer_count=1))

    kern = functools.partial(downblock_kernel, cin=Cin, cout=Cout,
                             inv_hw=1.0 / float(H * W))

    out = pl.pallas_call(
        kern,
        out_shape=jax.ShapeDtypeStruct((N, OH, OWCout), f32),
        grid=(N,),
        in_specs=[
            pl.BlockSpec((1, H, WCin), lambda n: (n, 0, 0)),
            const_spec(dw1_f.shape),
            const_spec(dw2_f.shape),
            const_spec(pw1_bd.shape),
            const_spec(pw2_bd.shape),
            const_spec(m1.shape),
            const_spec(m2.shape),
            const_spec(frn_in.shape),
            const_spec(frn_out.shape),
            const_spec(srow.shape),
            const_spec(scol.shape),
            const_spec(kskip.shape),
            const_spec(bskip_f.shape),
            pl.BlockSpec(memory_space=pltpu.MemorySpace.SMEM),   # eps scalars
        ],
        out_specs=pl.BlockSpec((1, OH, OWCout), lambda n: (n, 0, 0)),
        compiler_params=pltpu.CompilerParams(
            dimension_semantics=("parallel",),       # no cross-batch carry
            vmem_limit_bytes=32 * 1024 * 1024,
        ),
    )(x_f, dw1_f, dw2_f, pw1_bd, pw2_bd, m1, m2, frn_in, frn_out,
      srow, scol, kskip, bskip_f, eps)

    # (N, OH, OW*Cout) -> NCHW
    return jnp.transpose(out.reshape(N, OH, OW, Cout), (0, 3, 1, 2))


# ---------------------------------------------------------------------------
# Pure-JAX reference (NCHW, mirrors the PyTorch forward)
# ---------------------------------------------------------------------------
def ref_downblock(x, p):
    N, Cin, H, W = x.shape
    Cout = p["pw1"].shape[1]

    def frn(y, g, b, t, e):
        C = y.shape[1]
        nu2 = jnp.mean(y * y, axis=(2, 3), keepdims=True)
        y = y * lax.rsqrt(nu2 + jnp.abs(e))
        return jnp.maximum(g.reshape(1, C, 1, 1) * y + b.reshape(1, C, 1, 1),
                           t.reshape(1, C, 1, 1))

    def depthwise(y, dw):
        C = y.shape[1]
        w = jnp.transpose(dw, (2, 0, 1))[:, None, :, :]         # (C,1,3,3)
        return lax.conv_general_dilated(
            y, w, (1, 1), ((1, 1), (1, 1)),
            dimension_numbers=("NCHW", "OIHW", "NCHW"),
            feature_group_count=C, precision=lax.Precision.HIGHEST)

    def pointwise(y, pw):
        w = jnp.transpose(pw, (1, 0))[:, :, None, None]         # (Cout,Cin,1,1)
        return lax.conv_general_dilated(
            y, w, (1, 1), ((0, 0), (0, 0)),
            dimension_numbers=("NCHW", "OIHW", "NCHW"),
            precision=lax.Precision.HIGHEST)

    def sepconv_block(y, dw, frn_a, pw, frn_b):
        y = jnp.maximum(y, 0.0)
        y = depthwise(y, dw)
        y = frn(y, *frn_a)
        y = pointwise(y, pw)
        return frn(y, *frn_b)

    # skip: 1x1 conv, stride 2, bias
    wsk = p["wskip"][:, :, None, None]
    identity = lax.conv_general_dilated(
        x, wsk, (2, 2), ((0, 0), (0, 0)),
        dimension_numbers=("NCHW", "OIHW", "NCHW"),
        precision=lax.Precision.HIGHEST) + p["bskip"].reshape(1, Cout, 1, 1)

    y = sepconv_block(x, p["dw1"],
                      (p["g1a"], p["b1a"], p["t1a"], p["eps"][0]), p["pw1"],
                      (p["g1b"], p["b1b"], p["t1b"], p["eps"][1]))
    y = sepconv_block(y, p["dw2"],
                      (p["g2a"], p["b2a"], p["t2a"], p["eps"][2]), p["pw2"],
                      (p["g2b"], p["b2b"], p["t2b"], p["eps"][3]))
    y = lax.reduce_window(y, -jnp.inf, lax.max, (1, 1, 3, 3), (1, 1, 2, 2),
                          ((0, 0), (0, 0), (1, 1), (1, 1)))
    return y + identity


# ---------------------------------------------------------------------------
# Deterministic parameter construction + run
# ---------------------------------------------------------------------------
def make_params(key, cin, cout):
    ks = jax.random.split(key, 8)
    bd_d = 1.0 / 3.0                       # depthwise fan_in = 9
    bd_i = 1.0 / math.sqrt(cin)            # pointwise1 / skip fan_in = cin
    bd_o = 1.0 / math.sqrt(cout)           # pointwise2 fan_in = cout
    u = lambda k, s, b: jax.random.uniform(k, s, jnp.float32, -b, b)
    p = {
        "dw1": u(ks[0], (3, 3, cin), bd_d),        # tap-major (ky, kx, c)
        "dw2": u(ks[1], (3, 3, cout), bd_d),
        "pw1": u(ks[2], (cin, cout), bd_i),        # (c_in, c_out)
        "pw2": u(ks[3], (cout, cout), bd_o),
        "wskip": u(ks[4], (cout, cin), bd_i),      # (c_out, c_in)
        "bskip": u(ks[5], (cout,), bd_i),
        "eps": jnp.full((4,), 1e-6, jnp.float32),
    }
    # FRN reset() gives gamma=1, beta=0, tau=0; perturb slightly so the
    # kernel's handling of every parameter is actually exercised.
    fk = jax.random.split(ks[6], 12)
    chans = {"1a": cin, "1b": cout, "2a": cout, "2b": cout}
    for i, name in enumerate(("1a", "1b", "2a", "2b")):
        c = chans[name]
        p["g" + name] = 1.0 + 0.1 * jax.random.normal(fk[3 * i], (c,), jnp.float32)
        p["b" + name] = 0.1 * jax.random.normal(fk[3 * i + 1], (c,), jnp.float32)
        p["t" + name] = 0.1 * jax.random.normal(fk[3 * i + 2], (c,), jnp.float32)
    return p


if __name__ == "__main__":
    N, CIN, COUT, H, W = 2, 8, 16, 16, 16
    key = jax.random.PRNGKey(0)
    kx, kp = jax.random.split(key)
    x = jax.random.normal(kx, (N, CIN, H, W), jnp.float32)
    params = make_params(kp, CIN, COUT)

    out = jax.block_until_ready(downblock_forward(x, params))
    ref = ref_downblock(x, params)

    err = float(jnp.max(jnp.abs(out - ref) / (1.0 + jnp.abs(ref))))
    if out.shape != ref.shape or not (err < 5e-2):
        raise AssertionError(
            f"Pallas kernel mismatch vs reference: shapes {out.shape}/{ref.shape}, "
            f"scaled max err {err}")
    print("KERNEL_OK")
</pallas_src>

<mosaic_0001>
module attributes {stable_mosaic.version = 11 : i64} {
  func.func @downblock_kernel(%arg0: i32, %arg1: memref<1x16x128xf32, #tpu.memory_space<vmem>>, %arg2: memref<3x3x128xf32, #tpu.memory_space<vmem>>, %arg3: memref<3x3x256xf32, #tpu.memory_space<vmem>>, %arg4: memref<128x256xbf16, #tpu.memory_space<vmem>>, %arg5: memref<256x256xbf16, #tpu.memory_space<vmem>>, %arg6: memref<128x128xf32, #tpu.memory_space<vmem>>, %arg7: memref<256x256xf32, #tpu.memory_space<vmem>>, %arg8: memref<3x128xf32, #tpu.memory_space<vmem>>, %arg9: memref<3x3x256xf32, #tpu.memory_space<vmem>>, %arg10: memref<8x16xf32, #tpu.memory_space<vmem>>, %arg11: memref<256x128xf32, #tpu.memory_space<vmem>>, %arg12: memref<128x128xbf16, #tpu.memory_space<vmem>>, %arg13: memref<1x128xf32, #tpu.memory_space<vmem>>, %arg14: memref<4xf32, #tpu.memory_space<smem>>, %arg15: memref<1x8x128xf32, #tpu.memory_space<vmem>>) attributes {dimension_semantics = [#tpu.dimension_semantics<parallel>], iteration_bounds = array<i64: 2>, scalar_prefetch = 0 : i64, scratch_operands = 0 : i64, tpu.core_type = #tpu.core_type<tc>, window_params = [{transform_indices = @transform_0, window_bounds = array<i64: 1, 16, 128>}, {pipeline_mode = #tpu.pipeline_mode<synchronous>, transform_indices = @transform_1, window_bounds = array<i64: 3, 3, 128>}, {pipeline_mode = #tpu.pipeline_mode<synchronous>, transform_indices = @transform_2, window_bounds = array<i64: 3, 3, 256>}, {pipeline_mode = #tpu.pipeline_mode<synchronous>, transform_indices = @transform_3, window_bounds = array<i64: 128, 256>}, {pipeline_mode = #tpu.pipeline_mode<synchronous>, transform_indices = @transform_4, window_bounds = array<i64: 256, 256>}, {pipeline_mode = #tpu.pipeline_mode<synchronous>, transform_indices = @transform_5, window_bounds = array<i64: 128, 128>}, {pipeline_mode = #tpu.pipeline_mode<synchronous>, transform_indices = @transform_6, window_bounds = array<i64: 256, 256>}, {pipeline_mode = #tpu.pipeline_mode<synchronous>, transform_indices = @transform_7, window_bounds = array<i64: 3, 128>}, {pipeline_mode = #tpu.pipeline_mode<synchronous>, transform_indices = @transform_8, window_bounds = array<i64: 3, 3, 256>}, {pipeline_mode = #tpu.pipeline_mode<synchronous>, transform_indices = @transform_9, window_bounds = array<i64: 8, 16>}, {pipeline_mode = #tpu.pipeline_mode<synchronous>, transform_indices = @transform_10, window_bounds = array<i64: 256, 128>}, {pipeline_mode = #tpu.pipeline_mode<synchronous>, transform_indices = @transform_11, window_bounds = array<i64: 128, 128>}, {pipeline_mode = #tpu.pipeline_mode<synchronous>, transform_indices = @transform_12, window_bounds = array<i64: 1, 128>}, {transform_indices = @transform_13, window_bounds = array<i64: 4>}, {transform_indices = @transform_14, window_bounds = array<i64: 1, 8, 128>}]} {
    %c0 = arith.constant 0 : index
    %c0_0 = arith.constant 0 : index
    %c0_1 = arith.constant 0 : index
    %0 = vector.load %arg1[%c0, %c0_0, %c0_1] : memref<1x16x128xf32, #tpu.memory_space<vmem>>, vector<1x16x128xf32>
    %1 = vector.shape_cast %0 : vector<1x16x128xf32> to vector<16x128xf32>
    %cst = arith.constant 0.000000e+00 : f32
    %2 = vector.broadcast %cst : f32 to vector<16x128xf32>
    %3 = arith.maximumf %1, %2 : vector<16x128xf32>
    %c0_2 = arith.constant 0 : index
    %c0_3 = arith.constant 0 : index
    %c0_4 = arith.constant 0 : index
    %4 = vector.load %arg2[%c0_2, %c0_3, %c0_4] : memref<3x3x128xf32, #tpu.memory_space<vmem>>, vector<3x3x128xf32>
    %cst_5 = arith.constant 0.000000e+00 : f32
    %5 = vector.broadcast %cst_5 : f32 to vector<1x128xf32>
    %6 = vector.extract_strided_slice %3 {offsets = [0, 0], sizes = [15, 128], strides = [1, 1]} : vector<16x128xf32> to vector<15x128xf32>
    %7 = tpu.concatenate %5, %6 in 0 : vector<1x128xf32>, vector<15x128xf32> -> vector<16x128xf32>
    %c8_i32 = arith.constant 8 : i32
    %8 = tpu.dynamic_rotate %7 by %c8_i32 dim 1 : vector<16x128xf32>, i32 -> vector<16x128xf32>
    %9 = tpu.iota {dimensions = array<i32: 1>} : vector<16x128xi32>
    %c8_i32_6 = arith.constant 8 : i32
    %10 = vector.broadcast %c8_i32_6 : i32 to vector<16x128xi32>
    %11 = arith.cmpi sge, %9, %10 : vector<16x128xi32>
    %cst_7 = arith.constant 0.000000e+00 : f32
    %12 = vector.broadcast %cst_7 : f32 to vector<16x128xf32>
    %13 = arith.select %11, %8, %12 : vector<16x128xi1>, vector<16x128xf32>
    %14 = vector.extract_strided_slice %4 {offsets = [0, 0, 0], sizes = [1, 1, 128], strides = [1, 1, 1]} : vector<3x3x128xf32> to vector<1x1x128xf32>
    %15 = vector.shape_cast %14 : vector<1x1x128xf32> to vector<128xf32>
    %16 = vector.shape_cast %15 : vector<128xf32> to vector<1x128xf32>
    %17 = vector.broadcast %16 : vector<1x128xf32> to vector<16x128xf32>
    %18 = arith.mulf %13, %17 : vector<16x128xf32>
    %19 = vector.extract_strided_slice %4 {offsets = [0, 1, 0], sizes = [1, 1, 128], strides = [1, 1, 1]} : vector<3x3x128xf32> to vector<1x1x128xf32>
    %20 = vector.shape_cast %19 : vector<1x1x128xf32> to vector<128xf32>
    %21 = vector.shape_cast %20 : vector<128xf32> to vector<1x128xf32>
    %22 = vector.broadcast %21 : vector<1x128xf32> to vector<16x128xf32>
    %23 = arith.mulf %7, %22 : vector<16x128xf32>
    %24 = arith.addf %18, %23 : vector<16x128xf32>
    %c120_i32 = arith.constant 120 : i32
    %25 = tpu.dynamic_rotate %7 by %c120_i32 dim 1 : vector<16x128xf32>, i32 -> vector<16x128xf32>
    %26 = tpu.iota {dimensions = array<i32: 1>} : vector<16x128xi32>
    %c120_i32_8 = arith.constant 120 : i32
    %27 = vector.broadcast %c120_i32_8 : i32 to vector<16x128xi32>
    %28 = arith.cmpi slt, %26, %27 : vector<16x128xi32>
    %cst_9 = arith.constant 0.000000e+00 : f32
    %29 = vector.broadcast %cst_9 : f32 to vector<16x128xf32>
    %30 = arith.select %28, %25, %29 : vector<16x128xi1>, vector<16x128xf32>
    %31 = vector.extract_strided_slice %4 {offsets = [0, 2, 0], sizes = [1, 1, 128], strides = [1, 1, 1]} : vector<3x3x128xf32> to vector<1x1x128xf32>
    %32 = vector.shape_cast %31 : vector<1x1x128xf32> to vector<128xf32>
    %33 = vector.shape_cast %32 : vector<128xf32> to vector<1x128xf32>
    %34 = vector.broadcast %33 : vector<1x128xf32> to vector<16x128xf32>
    %35 = arith.mulf %30, %34 : vector<16x128xf32>
    %36 = arith.addf %24, %35 : vector<16x128xf32>
    %c8_i32_10 = arith.constant 8 : i32
    %37 = tpu.dynamic_rotate %3 by %c8_i32_10 dim 1 : vector<16x128xf32>, i32 -> vector<16x128xf32>
    %38 = tpu.iota {dimensions = array<i32: 1>} : vector<16x128xi32>
    %c8_i32_11 = arith.constant 8 : i32
    %39 = vector.broadcast %c8_i32_11 : i32 to vector<16x128xi32>
    %40 = arith.cmpi sge, %38, %39 : vector<16x128xi32>
    %cst_12 = arith.constant 0.000000e+00 : f32
    %41 = vector.broadcast %cst_12 : f32 to vector<16x128xf32>
    %42 = arith.select %40, %37, %41 : vector<16x128xi1>, vector<16x128xf32>
    %43 = vector.extract_strided_slice %4 {offsets = [1, 0, 0], sizes = [1, 1, 128], strides = [1, 1, 1]} : vector<3x3x128xf32> to vector<1x1x128xf32>
    %44 = vector.shape_cast %43 : vector<1x1x128xf32> to vector<128xf32>
    %45 = vector.shape_cast %44 : vector<128xf32> to vector<1x128xf32>
    %46 = vector.broadcast %45 : vector<1x128xf32> to vector<16x128xf32>
    %47 = arith.mulf %42, %46 : vector<16x128xf32>
    %48 = arith.addf %36, %47 : vector<16x128xf32>
    %49 = vector.extract_strided_slice %4 {offsets = [1, 1, 0], sizes = [1, 1, 128], strides = [1, 1, 1]} : vector<3x3x128xf32> to vector<1x1x128xf32>
    %50 = vector.shape_cast %49 : vector<1x1x128xf32> to vector<128xf32>
    %51 = vector.shape_cast %50 : vector<128xf32> to vector<1x128xf32>
    %52 = vector.broadcast %51 : vector<1x128xf32> to vector<16x128xf32>
    %53 = arith.mulf %3, %52 : vector<16x128xf32>
    %54 = arith.addf %48, %53 : vector<16x128xf32>
    %c120_i32_13 = arith.constant 120 : i32
    %55 = tpu.dynamic_rotate %3 by %c120_i32_13 dim 1 : vector<16x128xf32>, i32 -> vector<16x128xf32>
    %56 = tpu.iota {dimensions = array<i32: 1>} : vector<16x128xi32>
    %c120_i32_14 = arith.constant 120 : i32
    %57 = vector.broadcast %c120_i32_14 : i32 to vector<16x128xi32>
    %58 = arith.cmpi slt, %56, %57 : vector<16x128xi32>
    %cst_15 = arith.constant 0.000000e+00 : f32
    %59 = vector.broadcast %cst_15 : f32 to vector<16x128xf32>
    %60 = arith.select %58, %55, %59 : vector<16x128xi1>, vector<16x128xf32>
    %61 = vector.extract_strided_slice %4 {offsets = [1, 2, 0], sizes = [1, 1, 128], strides = [1, 1, 1]} : vector<3x3x128xf32> to vector<1x1x128xf32>
    %62 = vector.shape_cast %61 : vector<1x1x128xf32> to vector<128xf32>
    %63 = vector.shape_cast %62 : vector<128xf32> to vector<1x128xf32>
    %64 = vector.broadcast %63 : vector<1x128xf32> to vector<16x128xf32>
    %65 = arith.mulf %60, %64 : vector<16x128xf32>
    %66 = arith.addf %54, %65 : vector<16x128xf32>
    %cst_16 = arith.constant 0.000000e+00 : f32
    %67 = vector.broadcast %cst_16 : f32 to vector<1x128xf32>
    %68 = vector.extract_strided_slice %3 {offsets = [1, 0], sizes = [15, 128], strides = [1, 1]} : vector<16x128xf32> to vector<15x128xf32>
    %69 = tpu.concatenate %68, %67 in 0 : vector<15x128xf32>, vector<1x128xf32> -> vector<16x128xf32>
    %c8_i32_17 = arith.constant 8 : i32
    %70 = tpu.dynamic_rotate %69 by %c8_i32_17 dim 1 : vector<16x128xf32>, i32 -> vector<16x128xf32>
    %71 = tpu.iota {dimensions = array<i32: 1>} : vector<16x128xi32>
    %c8_i32_18 = arith.constant 8 : i32
    %72 = vector.broadcast %c8_i32_18 : i32 to vector<16x128xi32>
    %73 = arith.cmpi sge, %71, %72 : vector<16x128xi32>
    %cst_19 = arith.constant 0.000000e+00 : f32
    %74 = vector.broadcast %cst_19 : f32 to vector<16x128xf32>
    %75 = arith.select %73, %70, %74 : vector<16x128xi1>, vector<16x128xf32>
    %76 = vector.extract_strided_slice %4 {offsets = [2, 0, 0], sizes = [1, 1, 128], strides = [1, 1, 1]} : vector<3x3x128xf32> to vector<1x1x128xf32>
    %77 = vector.shape_cast %76 : vector<1x1x128xf32> to vector<128xf32>
    %78 = vector.shape_cast %77 : vector<128xf32> to vector<1x128xf32>
    %79 = vector.broadcast %78 : vector<1x128xf32> to vector<16x128xf32>
    %80 = arith.mulf %75, %79 : vector<16x128xf32>
    %81 = arith.addf %66, %80 : vector<16x128xf32>
    %82 = vector.extract_strided_slice %4 {offsets = [2, 1, 0], sizes = [1, 1, 128], strides = [1, 1, 1]} : vector<3x3x128xf32> to vector<1x1x128xf32>
    %83 = vector.shape_cast %82 : vector<1x1x128xf32> to vector<128xf32>
    %84 = vector.shape_cast %83 : vector<128xf32> to vector<1x128xf32>
    %85 = vector.broadcast %84 : vector<1x128xf32> to vector<16x128xf32>
    %86 = arith.mulf %69, %85 : vector<16x128xf32>
    %87 = arith.addf %81, %86 : vector<16x128xf32>
    %c120_i32_20 = arith.constant 120 : i32
    %88 = tpu.dynamic_rotate %69 by %c120_i32_20 dim 1 : vector<16x128xf32>, i32 -> vector<16x128xf32>
    %89 = tpu.iota {dimensions = array<i32: 1>} : vector<16x128xi32>
    %c120_i32_21 = arith.constant 120 : i32
    %90 = vector.broadcast %c120_i32_21 : i32 to vector<16x128xi32>
    %91 = arith.cmpi slt, %89, %90 : vector<16x128xi32>
    %cst_22 = arith.constant 0.000000e+00 : f32
    %92 = vector.broadcast %cst_22 : f32 to vector<16x128xf32>
    %93 = arith.select %91, %88, %92 : vector<16x128xi1>, vector<16x128xf32>
    %94 = vector.extract_strided_slice %4 {offsets = [2, 2, 0], sizes = [1, 1, 128], strides = [1, 1, 1]} : vector<3x3x128xf32> to vector<1x1x128xf32>
    %95 = vector.shape_cast %94 : vector<1x1x128xf32> to vector<128xf32>
    %96 = vector.shape_cast %95 : vector<128xf32> to vector<1x128xf32>
    %97 = vector.broadcast %96 : vector<1x128xf32> to vector<16x128xf32>
    %98 = arith.mulf %93, %97 : vector<16x128xf32>
    %99 = arith.addf %87, %98 : vector<16x128xf32>
    %c0_23 = arith.constant 0 : index
    %c0_24 = arith.constant 0 : index
    %100 = vector.load %arg6[%c0_23, %c0_24] : memref<128x128xf32, #tpu.memory_space<vmem>>, vector<128x128xf32>
    %c0_25 = arith.constant 0 : index
    %c0_26 = arith.constant 0 : index
    %101 = vector.load %arg8[%c0_25, %c0_26] : memref<3x128xf32, #tpu.memory_space<vmem>>, vector<1x128xf32>
    %102 = vector.shape_cast %101 : vector<1x128xf32> to vector<128xf32>
    %c1 = arith.constant 1 : index
    %c0_27 = arith.constant 0 : index
    %103 = vector.load %arg8[%c1, %c0_27] : memref<3x128xf32, #tpu.memory_space<vmem>>, vector<1x128xf32>
    %104 = vector.shape_cast %103 : vector<1x128xf32> to vector<128xf32>
    %c2 = arith.constant 2 : index
    %c0_28 = arith.constant 0 : index
    %105 = vector.load %arg8[%c2, %c0_28] : memref<3x128xf32, #tpu.memory_space<vmem>>, vector<1x128xf32>
    %106 = vector.shape_cast %105 : vector<1x128xf32> to vector<128xf32>
    %c0_29 = arith.constant 0 : index
    %107 = memref.load %arg14[%c0_29] : memref<4xf32, #tpu.memory_space<smem>>
    %108 = arith.mulf %99, %99 : vector<16x128xf32>
    %cst_30 = arith.constant dense<0.000000e+00> : vector<128xf32>
    %109 = vector.multi_reduction <add>, %108, %cst_30 [0] : vector<16x128xf32> to vector<128xf32>
    %110 = vector.shape_cast %109 : vector<128xf32> to vector<1x128xf32>
    %cst_31 = arith.constant dense<0.000000e+00> : vector<1x128xf32>
    %111 = tpu.matmul %110, %100, %cst_31 {dimension_numbers = #tpu.dot_dimension_numbers<[1], [0], [0], [1], [0, 0, 1, 1], [], []>} : vector<1x128xf32>, vector<128x128xf32>, vector<1x128xf32> -> vector<1x128xf32>
    %cst_32 = arith.constant 3.906250e-03 : f32
    %112 = vector.broadcast %cst_32 : f32 to vector<1x128xf32>
    %113 = arith.mulf %111, %112 : vector<1x128xf32>
    %114 = math.absf %107 : f32
    %115 = vector.broadcast %114 : f32 to vector<1x128xf32>
    %116 = arith.addf %113, %115 : vector<1x128xf32>
    %117 = math.rsqrt %116 : vector<1x128xf32>
    %118 = vector.broadcast %117 : vector<1x128xf32> to vector<16x128xf32>
    %119 = arith.mulf %99, %118 : vector<16x128xf32>
    %120 = vector.shape_cast %102 : vector<128xf32> to vector<1x128xf32>
    %121 = vector.broadcast %120 : vector<1x128xf32> to vector<16x128xf32>
    %122 = arith.mulf %121, %119 : vector<16x128xf32>
    %123 = vector.shape_cast %104 : vector<128xf32> to vector<1x128xf32>
    %124 = vector.broadcast %123 : vector<1x128xf32> to vector<16x128xf32>
    %125 = arith.addf %122, %124 : vector<16x128xf32>
    %126 = vector.shape_cast %106 : vector<128xf32> to vector<1x128xf32>
    %127 = vector.broadcast %126 : vector<1x128xf32> to vector<16x128xf32>
    %128 = arith.maximumf %125, %127 : vector<16x128xf32>
    %129 = arith.truncf %128 : vector<16x128xf32> to vector<16x128xbf16>
    %c0_33 = arith.constant 0 : index
    %c0_34 = arith.constant 0 : index
    %130 = vector.load %arg4[%c0_33, %c0_34] : memref<128x256xbf16, #tpu.memory_space<vmem>>, vector<128x256xbf16>
    %cst_35 = arith.constant dense<0.000000e+00> : vector<16x256xf32>
    %131 = tpu.matmul %129, %130, %cst_35 {dimension_numbers = #tpu.dot_dimension_numbers<[1], [0], [0], [1], [0, 0, 1, 1], [], []>} : vector<16x128xbf16>, vector<128x256xbf16>, vector<16x256xf32> -> vector<16x256xf32>
    %c0_36 = arith.constant 0 : index
    %c0_37 = arith.constant 0 : index
    %132 = vector.load %arg7[%c0_36, %c0_37] : memref<256x256xf32, #tpu.memory_space<vmem>>, vector<256x256xf32>
    %c0_38 = arith.constant 0 : index
    %c0_39 = arith.constant 0 : index
    %c0_40 = arith.constant 0 : index
    %133 = vector.load %arg9[%c0_38, %c0_39, %c0_40] : memref<3x3x256xf32, #tpu.memory_space<vmem>>, vector<1x1x256xf32>
    %134 = vector.shape_cast %133 : vector<1x1x256xf32> to vector<256xf32>
    %c0_41 = arith.constant 0 : index
    %c1_42 = arith.constant 1 : index
    %c0_43 = arith.constant 0 : index
    %135 = vector.load %arg9[%c0_41, %c1_42, %c0_43] : memref<3x3x256xf32, #tpu.memory_space<vmem>>, vector<1x1x256xf32>
    %136 = vector.shape_cast %135 : vector<1x1x256xf32> to vector<256xf32>
    %c0_44 = arith.constant 0 : index
    %c2_45 = arith.constant 2 : index
    %c0_46 = arith.constant 0 : index
    %137 = vector.load %arg9[%c0_44, %c2_45, %c0_46] : memref<3x3x256xf32, #tpu.memory_space<vmem>>, vector<1x1x256xf32>
    %138 = vector.shape_cast %137 : vector<1x1x256xf32> to vector<256xf32>
    %c1_47 = arith.constant 1 : index
    %139 = memref.load %arg14[%c1_47] : memref<4xf32, #tpu.memory_space<smem>>
    %140 = arith.mulf %131, %131 : vector<16x256xf32>
    %cst_48 = arith.constant dense<0.000000e+00> : vector<256xf32>
    %141 = vector.multi_reduction <add>, %140, %cst_48 [0] : vector<16x256xf32> to vector<256xf32>
    %142 = vector.shape_cast %141 : vector<256xf32> to vector<1x256xf32>
    %cst_49 = arith.constant dense<0.000000e+00> : vector<1x256xf32>
    %143 = tpu.matmul %142, %132, %cst_49 {dimension_numbers = #tpu.dot_dimension_numbers<[1], [0], [0], [1], [0, 0, 1, 1], [], []>} : vector<1x256xf32>, vector<256x256xf32>, vector<1x256xf32> -> vector<1x256xf32>
    %cst_50 = arith.constant 3.906250e-03 : f32
    %144 = vector.broadcast %cst_50 : f32 to vector<1x256xf32>
    %145 = arith.mulf %143, %144 : vector<1x256xf32>
    %146 = math.absf %139 : f32
    %147 = vector.broadcast %146 : f32 to vector<1x256xf32>
    %148 = arith.addf %145, %147 : vector<1x256xf32>
    %149 = math.rsqrt %148 : vector<1x256xf32>
    %150 = vector.broadcast %149 : vector<1x256xf32> to vector<16x256xf32>
    %151 = arith.mulf %131, %150 : vector<16x256xf32>
    %152 = vector.shape_cast %134 : vector<256xf32> to vector<1x256xf32>
    %153 = vector.broadcast %152 : vector<1x256xf32> to vector<16x256xf32>
    %154 = arith.mulf %153, %151 : vector<16x256xf32>
    %155 = vector.shape_cast %136 : vector<256xf32> to vector<1x256xf32>
    %156 = vector.broadcast %155 : vector<1x256xf32> to vector<16x256xf32>
    %157 = arith.addf %154, %156 : vector<16x256xf32>
    %158 = vector.shape_cast %138 : vector<256xf32> to vector<1x256xf32>
    %159 = vector.broadcast %158 : vector<1x256xf32> to vector<16x256xf32>
    %160 = arith.maximumf %157, %159 : vector<16x256xf32>
    %cst_51 = arith.constant 0.000000e+00 : f32
    %161 = vector.broadcast %cst_51 : f32 to vector<16x256xf32>
    %162 = arith.maximumf %160, %161 : vector<16x256xf32>
    %c0_52 = arith.constant 0 : index
    %c0_53 = arith.constant 0 : index
    %c0_54 = arith.constant 0 : index
    %163 = vector.load %arg3[%c0_52, %c0_53, %c0_54] : memref<3x3x256xf32, #tpu.memory_space<vmem>>, vector<3x3x256xf32>
    %cst_55 = arith.constant 0.000000e+00 : f32
    %164 = vector.broadcast %cst_55 : f32 to vector<1x256xf32>
    %165 = vector.extract_strided_slice %162 {offsets = [0, 0], sizes = [15, 256], strides = [1, 1]} : vector<16x256xf32> to vector<15x256xf32>
    %166 = tpu.concatenate %164, %165 in 0 : vector<1x256xf32>, vector<15x256xf32> -> vector<16x256xf32>
    %c16_i32 = arith.constant 16 : i32
    %167 = tpu.dynamic_rotate %166 by %c16_i32 dim 1 : vector<16x256xf32>, i32 -> vector<16x256xf32>
    %168 = tpu.iota {dimensions = array<i32: 1>} : vector<16x256xi32>
    %c16_i32_56 = arith.constant 16 : i32
    %169 = vector.broadcast %c16_i32_56 : i32 to vector<16x256xi32>
    %170 = arith.cmpi sge, %168, %169 : vector<16x256xi32>
    %cst_57 = arith.constant 0.000000e+00 : f32
    %171 = vector.broadcast %cst_57 : f32 to vector<16x256xf32>
    %172 = arith.select %170, %167, %171 : vector<16x256xi1>, vector<16x256xf32>
    %173 = vector.extract_strided_slice %163 {offsets = [0, 0, 0], sizes = [1, 1, 256], strides = [1, 1, 1]} : vector<3x3x256xf32> to vector<1x1x256xf32>
    %174 = vector.shape_cast %173 : vector<1x1x256xf32> to vector<256xf32>
    %175 = vector.shape_cast %174 : vector<256xf32> to vector<1x256xf32>
    %176 = vector.broadcast %175 : vector<1x256xf32> to vector<16x256xf32>
    %177 = arith.mulf %172, %176 : vector<16x256xf32>
    %178 = vector.extract_strided_slice %163 {offsets = [0, 1, 0], sizes = [1, 1, 256], strides = [1, 1, 1]} : vector<3x3x256xf32> to vector<1x1x256xf32>
    %179 = vector.shape_cast %178 : vector<1x1x256xf32> to vector<256xf32>
    %180 = vector.shape_cast %179 : vector<256xf32> to vector<1x256xf32>
    %181 = vector.broadcast %180 : vector<1x256xf32> to vector<16x256xf32>
    %182 = arith.mulf %166, %181 : vector<16x256xf32>
    %183 = arith.addf %177, %182 : vector<16x256xf32>
    %c240_i32 = arith.constant 240 : i32
    %184 = tpu.dynamic_rotate %166 by %c240_i32 dim 1 : vector<16x256xf32>, i32 -> vector<16x256xf32>
    %185 = tpu.iota {dimensions = array<i32: 1>} : vector<16x256xi32>
    %c240_i32_58 = arith.constant 240 : i32
    %186 = vector.broadcast %c240_i32_58 : i32 to vector<16x256xi32>
    %187 = arith.cmpi slt, %185, %186 : vector<16x256xi32>
    %cst_59 = arith.constant 0.000000e+00 : f32
    %188 = vector.broadcast %cst_59 : f32 to vector<16x256xf32>
    %189 = arith.select %187, %184, %188 : vector<16x256xi1>, vector<16x256xf32>
    %190 = vector.extract_strided_slice %163 {offsets = [0, 2, 0], sizes = [1, 1, 256], strides = [1, 1, 1]} : vector<3x3x256xf32> to vector<1x1x256xf32>
    %191 = vector.shape_cast %190 : vector<1x1x256xf32> to vector<256xf32>
    %192 = vector.shape_cast %191 : vector<256xf32> to vector<1x256xf32>
    %193 = vector.broadcast %192 : vector<1x256xf32> to vector<16x256xf32>
    %194 = arith.mulf %189, %193 : vector<16x256xf32>
    %195 = arith.addf %183, %194 : vector<16x256xf32>
    %c16_i32_60 = arith.constant 16 : i32
    %196 = tpu.dynamic_rotate %162 by %c16_i32_60 dim 1 : vector<16x256xf32>, i32 -> vector<16x256xf32>
    %197 = tpu.iota {dimensions = array<i32: 1>} : vector<16x256xi32>
    %c16_i32_61 = arith.constant 16 : i32
    %198 = vector.broadcast %c16_i32_61 : i32 to vector<16x256xi32>
    %199 = arith.cmpi sge, %197, %198 : vector<16x256xi32>
    %cst_62 = arith.constant 0.000000e+00 : f32
    %200 = vector.broadcast %cst_62 : f32 to vector<16x256xf32>
    %201 = arith.select %199, %196, %200 : vector<16x256xi1>, vector<16x256xf32>
    %202 = vector.extract_strided_slice %163 {offsets = [1, 0, 0], sizes = [1, 1, 256], strides = [1, 1, 1]} : vector<3x3x256xf32> to vector<1x1x256xf32>
    %203 = vector.shape_cast %202 : vector<1x1x256xf32> to vector<256xf32>
    %204 = vector.shape_cast %203 : vector<256xf32> to vector<1x256xf32>
    %205 = vector.broadcast %204 : vector<1x256xf32> to vector<16x256xf32>
    %206 = arith.mulf %201, %205 : vector<16x256xf32>
    %207 = arith.addf %195, %206 : vector<16x256xf32>
    %208 = vector.extract_strided_slice %163 {offsets = [1, 1, 0], sizes = [1, 1, 256], strides = [1, 1, 1]} : vector<3x3x256xf32> to vector<1x1x256xf32>
    %209 = vector.shape_cast %208 : vector<1x1x256xf32> to vector<256xf32>
    %210 = vector.shape_cast %209 : vector<256xf32> to vector<1x256xf32>
    %211 = vector.broadcast %210 : vector<1x256xf32> to vector<16x256xf32>
    %212 = arith.mulf %162, %211 : vector<16x256xf32>
    %213 = arith.addf %207, %212 : vector<16x256xf32>
    %c240_i32_63 = arith.constant 240 : i32
    %214 = tpu.dynamic_rotate %162 by %c240_i32_63 dim 1 : vector<16x256xf32>, i32 -> vector<16x256xf32>
    %215 = tpu.iota {dimensions = array<i32: 1>} : vector<16x256xi32>
    %c240_i32_64 = arith.constant 240 : i32
    %216 = vector.broadcast %c240_i32_64 : i32 to vector<16x256xi32>
    %217 = arith.cmpi slt, %215, %216 : vector<16x256xi32>
    %cst_65 = arith.constant 0.000000e+00 : f32
    %218 = vector.broadcast %cst_65 : f32 to vector<16x256xf32>
    %219 = arith.select %217, %214, %218 : vector<16x256xi1>, vector<16x256xf32>
    %220 = vector.extract_strided_slice %163 {offsets = [1, 2, 0], sizes = [1, 1, 256], strides = [1, 1, 1]} : vector<3x3x256xf32> to vector<1x1x256xf32>
    %221 = vector.shape_cast %220 : vector<1x1x256xf32> to vector<256xf32>
    %222 = vector.shape_cast %221 : vector<256xf32> to vector<1x256xf32>
    %223 = vector.broadcast %222 : vector<1x256xf32> to vector<16x256xf32>
    %224 = arith.mulf %219, %223 : vector<16x256xf32>
    %225 = arith.addf %213, %224 : vector<16x256xf32>
    %cst_66 = arith.constant 0.000000e+00 : f32
    %226 = vector.broadcast %cst_66 : f32 to vector<1x256xf32>
    %227 = vector.extract_strided_slice %162 {offsets = [1, 0], sizes = [15, 256], strides = [1, 1]} : vector<16x256xf32> to vector<15x256xf32>
    %228 = tpu.concatenate %227, %226 in 0 : vector<15x256xf32>, vector<1x256xf32> -> vector<16x256xf32>
    %c16_i32_67 = arith.constant 16 : i32
    %229 = tpu.dynamic_rotate %228 by %c16_i32_67 dim 1 : vector<16x256xf32>, i32 -> vector<16x256xf32>
    %230 = tpu.iota {dimensions = array<i32: 1>} : vector<16x256xi32>
    %c16_i32_68 = arith.constant 16 : i32
    %231 = vector.broadcast %c16_i32_68 : i32 to vector<16x256xi32>
    %232 = arith.cmpi sge, %230, %231 : vector<16x256xi32>
    %cst_69 = arith.constant 0.000000e+00 : f32
    %233 = vector.broadcast %cst_69 : f32 to vector<16x256xf32>
    %234 = arith.select %232, %229, %233 : vector<16x256xi1>, vector<16x256xf32>
    %235 = vector.extract_strided_slice %163 {offsets = [2, 0, 0], sizes = [1, 1, 256], strides = [1, 1, 1]} : vector<3x3x256xf32> to vector<1x1x256xf32>
    %236 = vector.shape_cast %235 : vector<1x1x256xf32> to vector<256xf32>
    %237 = vector.shape_cast %236 : vector<256xf32> to vector<1x256xf32>
    %238 = vector.broadcast %237 : vector<1x256xf32> to vector<16x256xf32>
    %239 = arith.mulf %234, %238 : vector<16x256xf32>
    %240 = arith.addf %225, %239 : vector<16x256xf32>
    %241 = vector.extract_strided_slice %163 {offsets = [2, 1, 0], sizes = [1, 1, 256], strides = [1, 1, 1]} : vector<3x3x256xf32> to vector<1x1x256xf32>
    %242 = vector.shape_cast %241 : vector<1x1x256xf32> to vector<256xf32>
    %243 = vector.shape_cast %242 : vector<256xf32> to vector<1x256xf32>
    %244 = vector.broadcast %243 : vector<1x256xf32> to vector<16x256xf32>
    %245 = arith.mulf %228, %244 : vector<16x256xf32>
    %246 = arith.addf %240, %245 : vector<16x256xf32>
    %c240_i32_70 = arith.constant 240 : i32
    %247 = tpu.dynamic_rotate %228 by %c240_i32_70 dim 1 : vector<16x256xf32>, i32 -> vector<16x256xf32>
    %248 = tpu.iota {dimensions = array<i32: 1>} : vector<16x256xi32>
    %c240_i32_71 = arith.constant 240 : i32
    %249 = vector.broadcast %c240_i32_71 : i32 to vector<16x256xi32>
    %250 = arith.cmpi slt, %248, %249 : vector<16x256xi32>
    %cst_72 = arith.constant 0.000000e+00 : f32
    %251 = vector.broadcast %cst_72 : f32 to vector<16x256xf32>
    %252 = arith.select %250, %247, %251 : vector<16x256xi1>, vector<16x256xf32>
    %253 = vector.extract_strided_slice %163 {offsets = [2, 2, 0], sizes = [1, 1, 256], strides = [1, 1, 1]} : vector<3x3x256xf32> to vector<1x1x256xf32>
    %254 = vector.shape_cast %253 : vector<1x1x256xf32> to vector<256xf32>
    %255 = vector.shape_cast %254 : vector<256xf32> to vector<1x256xf32>
    %256 = vector.broadcast %255 : vector<1x256xf32> to vector<16x256xf32>
    %257 = arith.mulf %252, %256 : vector<16x256xf32>
    %258 = arith.addf %246, %257 : vector<16x256xf32>
    %c0_73 = arith.constant 0 : index
    %c0_74 = arith.constant 0 : index
    %259 = vector.load %arg7[%c0_73, %c0_74] : memref<256x256xf32, #tpu.memory_space<vmem>>, vector<256x256xf32>
    %c1_75 = arith.constant 1 : index
    %c0_76 = arith.constant 0 : index
    %c0_77 = arith.constant 0 : index
    %260 = vector.load %arg9[%c1_75, %c0_76, %c0_77] : memref<3x3x256xf32, #tpu.memory_space<vmem>>, vector<1x1x256xf32>
    %261 = vector.shape_cast %260 : vector<1x1x256xf32> to vector<256xf32>
    %c1_78 = arith.constant 1 : index
    %c1_79 = arith.constant 1 : index
    %c0_80 = arith.constant 0 : index
    %262 = vector.load %arg9[%c1_78, %c1_79, %c0_80] : memref<3x3x256xf32, #tpu.memory_space<vmem>>, vector<1x1x256xf32>
    %263 = vector.shape_cast %262 : vector<1x1x256xf32> to vector<256xf32>
    %c1_81 = arith.constant 1 : index
    %c2_82 = arith.constant 2 : index
    %c0_83 = arith.constant 0 : index
    %264 = vector.load %arg9[%c1_81, %c2_82, %c0_83] : memref<3x3x256xf32, #tpu.memory_space<vmem>>, vector<1x1x256xf32>
    %265 = vector.shape_cast %264 : vector<1x1x256xf32> to vector<256xf32>
    %c2_84 = arith.constant 2 : index
    %266 = memref.load %arg14[%c2_84] : memref<4xf32, #tpu.memory_space<smem>>
    %267 = arith.mulf %258, %258 : vector<16x256xf32>
    %cst_85 = arith.constant dense<0.000000e+00> : vector<256xf32>
    %268 = vector.multi_reduction <add>, %267, %cst_85 [0] : vector<16x256xf32> to vector<256xf32>
    %269 = vector.shape_cast %268 : vector<256xf32> to vector<1x256xf32>
    %cst_86 = arith.constant dense<0.000000e+00> : vector<1x256xf32>
    %270 = tpu.matmul %269, %259, %cst_86 {dimension_numbers = #tpu.dot_dimension_numbers<[1], [0], [0], [1], [0, 0, 1, 1], [], []>} : vector<1x256xf32>, vector<256x256xf32>, vector<1x256xf32> -> vector<1x256xf32>
    %cst_87 = arith.constant 3.906250e-03 : f32
    %271 = vector.broadcast %cst_87 : f32 to vector<1x256xf32>
    %272 = arith.mulf %270, %271 : vector<1x256xf32>
    %273 = math.absf %266 : f32
    %274 = vector.broadcast %273 : f32 to vector<1x256xf32>
    %275 = arith.addf %272, %274 : vector<1x256xf32>
    %276 = math.rsqrt %275 : vector<1x256xf32>
    %277 = vector.broadcast %276 : vector<1x256xf32> to vector<16x256xf32>
    %278 = arith.mulf %258, %277 : vector<16x256xf32>
    %279 = vector.shape_cast %261 : vector<256xf32> to vector<1x256xf32>
    %280 = vector.broadcast %279 : vector<1x256xf32> to vector<16x256xf32>
    %281 = arith.mulf %280, %278 : vector<16x256xf32>
    %282 = vector.shape_cast %263 : vector<256xf32> to vector<1x256xf32>
    %283 = vector.broadcast %282 : vector<1x256xf32> to vector<16x256xf32>
    %284 = arith.addf %281, %283 : vector<16x256xf32>
    %285 = vector.shape_cast %265 : vector<256xf32> to vector<1x256xf32>
    %286 = vector.broadcast %285 : vector<1x256xf32> to vector<16x256xf32>
    %287 = arith.maximumf %284, %286 : vector<16x256xf32>
    %288 = arith.truncf %287 : vector<16x256xf32> to vector<16x256xbf16>
    %c0_88 = arith.constant 0 : index
    %c0_89 = arith.constant 0 : index
    %289 = vector.load %arg5[%c0_88, %c0_89] : memref<256x256xbf16, #tpu.memory_space<vmem>>, vector<256x256xbf16>
    %cst_90 = arith.constant dense<0.000000e+00> : vector<16x256xf32>
    %290 = tpu.matmul %288, %289, %cst_90 {dimension_numbers = #tpu.dot_dimension_numbers<[1], [0], [0], [1], [0, 0, 1, 1], [], []>} : vector<16x256xbf16>, vector<256x256xbf16>, vector<16x256xf32> -> vector<16x256xf32>
    %c0_91 = arith.constant 0 : index
    %c0_92 = arith.constant 0 : index
    %291 = vector.load %arg7[%c0_91, %c0_92] : memref<256x256xf32, #tpu.memory_space<vmem>>, vector<256x256xf32>
    %c2_93 = arith.constant 2 : index
    %c0_94 = arith.constant 0 : index
    %c0_95 = arith.constant 0 : index
    %292 = vector.load %arg9[%c2_93, %c0_94, %c0_95] : memref<3x3x256xf32, #tpu.memory_space<vmem>>, vector<1x1x256xf32>
    %293 = vector.shape_cast %292 : vector<1x1x256xf32> to vector<256xf32>
    %c2_96 = arith.constant 2 : index
    %c1_97 = arith.constant 1 : index
    %c0_98 = arith.constant 0 : index
    %294 = vector.load %arg9[%c2_96, %c1_97, %c0_98] : memref<3x3x256xf32, #tpu.memory_space<vmem>>, vector<1x1x256xf32>
    %295 = vector.shape_cast %294 : vector<1x1x256xf32> to vector<256xf32>
    %c2_99 = arith.constant 2 : index
    %c2_100 = arith.constant 2 : index
    %c0_101 = arith.constant 0 : index
    %296 = vector.load %arg9[%c2_99, %c2_100, %c0_101] : memref<3x3x256xf32, #tpu.memory_space<vmem>>, vector<1x1x256xf32>
    %297 = vector.shape_cast %296 : vector<1x1x256xf32> to vector<256xf32>
    %c3 = arith.constant 3 : index
    %298 = memref.load %arg14[%c3] : memref<4xf32, #tpu.memory_space<smem>>
    %299 = arith.mulf %290, %290 : vector<16x256xf32>
    %cst_102 = arith.constant dense<0.000000e+00> : vector<256xf32>
    %300 = vector.multi_reduction <add>, %299, %cst_102 [0] : vector<16x256xf32> to vector<256xf32>
    %301 = vector.shape_cast %300 : vector<256xf32> to vector<1x256xf32>
    %cst_103 = arith.constant dense<0.000000e+00> : vector<1x256xf32>
    %302 = tpu.matmul %301, %291, %cst_103 {dimension_numbers = #tpu.dot_dimension_numbers<[1], [0], [0], [1], [0, 0, 1, 1], [], []>} : vector<1x256xf32>, vector<256x256xf32>, vector<1x256xf32> -> vector<1x256xf32>
    %cst_104 = arith.constant 3.906250e-03 : f32
    %303 = vector.broadcast %cst_104 : f32 to vector<1x256xf32>
    %304 = arith.mulf %302, %303 : vector<1x256xf32>
    %305 = math.absf %298 : f32
    %306 = vector.broadcast %305 : f32 to vector<1x256xf32>
    %307 = arith.addf %304, %306 : vector<1x256xf32>
    %308 = math.rsqrt %307 : vector<1x256xf32>
    %309 = vector.broadcast %308 : vector<1x256xf32> to vector<16x256xf32>
    %310 = arith.mulf %290, %309 : vector<16x256xf32>
    %311 = vector.shape_cast %293 : vector<256xf32> to vector<1x256xf32>
    %312 = vector.broadcast %311 : vector<1x256xf32> to vector<16x256xf32>
    %313 = arith.mulf %312, %310 : vector<16x256xf32>
    %314 = vector.shape_cast %295 : vector<256xf32> to vector<1x256xf32>
    %315 = vector.broadcast %314 : vector<1x256xf32> to vector<16x256xf32>
    %316 = arith.addf %313, %315 : vector<16x256xf32>
    %317 = vector.shape_cast %297 : vector<256xf32> to vector<1x256xf32>
    %318 = vector.broadcast %317 : vector<1x256xf32> to vector<16x256xf32>
    %319 = arith.maximumf %316, %318 : vector<16x256xf32>
    %c16_i32_105 = arith.constant 16 : i32
    %320 = tpu.dynamic_rotate %319 by %c16_i32_105 dim 1 : vector<16x256xf32>, i32 -> vector<16x256xf32>
    %321 = tpu.iota {dimensions = array<i32: 1>} : vector<16x256xi32>
    %c16_i32_106 = arith.constant 16 : i32
    %322 = vector.broadcast %c16_i32_106 : i32 to vector<16x256xi32>
    %323 = arith.cmpi sge, %321, %322 : vector<16x256xi32>
    %cst_107 = arith.constant -1.000000e+30 : f32
    %324 = vector.broadcast %cst_107 : f32 to vector<16x256xf32>
    %325 = arith.select %323, %320, %324 : vector<16x256xi1>, vector<16x256xf32>
    %326 = arith.maximumf %325, %319 : vector<16x256xf32>
    %c240_i32_108 = arith.constant 240 : i32
    %327 = tpu.dynamic_rotate %319 by %c240_i32_108 dim 1 : vector<16x256xf32>, i32 -> vector<16x256xf32>
    %328 = tpu.iota {dimensions = array<i32: 1>} : vector<16x256xi32>
    %c240_i32_109 = arith.constant 240 : i32
    %329 = vector.broadcast %c240_i32_109 : i32 to vector<16x256xi32>
    %330 = arith.cmpi slt, %328, %329 : vector<16x256xi32>
    %cst_110 = arith.constant -1.000000e+30 : f32
    %331 = vector.broadcast %cst_110 : f32 to vector<16x256xf32>
    %332 = arith.select %330, %327, %331 : vector<16x256xi1>, vector<16x256xf32>
    %333 = arith.maximumf %326, %332 : vector<16x256xf32>
    %c0_111 = arith.constant 0 : index
    %c0_112 = arith.constant 0 : index
    %334 = vector.load %arg11[%c0_111, %c0_112] : memref<256x128xf32, #tpu.memory_space<vmem>>, vector<256x128xf32>
    %cst_113 = arith.constant dense<0.000000e+00> : vector<16x128xf32>
    %335 = tpu.matmul %333, %334, %cst_113 {dimension_numbers = #tpu.dot_dimension_numbers<[1], [0], [0], [1], [0, 0, 1, 1], [], []>} : vector<16x256xf32>, vector<256x128xf32>, vector<16x128xf32> -> vector<16x128xf32>
    %cst_114 = arith.constant -1.000000e+30 : f32
    %336 = vector.broadcast %cst_114 : f32 to vector<1x128xf32>
    %337 = vector.extract_strided_slice %335 {offsets = [0, 0], sizes = [15, 128], strides = [1, 1]} : vector<16x128xf32> to vector<15x128xf32>
    %338 = tpu.concatenate %336, %337 in 0 : vector<1x128xf32>, vector<15x128xf32> -> vector<16x128xf32>
    %339 = arith.maximumf %338, %335 : vector<16x128xf32>
    %cst_115 = arith.constant -1.000000e+30 : f32
    %340 = vector.broadcast %cst_115 : f32 to vector<1x128xf32>
    %341 = vector.extract_strided_slice %335 {offsets = [1, 0], sizes = [15, 128], strides = [1, 1]} : vector<16x128xf32> to vector<15x128xf32>
    %342 = tpu.concatenate %341, %340 in 0 : vector<15x128xf32>, vector<1x128xf32> -> vector<16x128xf32>
    %343 = arith.maximumf %339, %342 : vector<16x128xf32>
    %c0_116 = arith.constant 0 : index
    %c0_117 = arith.constant 0 : index
    %344 = vector.load %arg10[%c0_116, %c0_117] : memref<8x16xf32, #tpu.memory_space<vmem>>, vector<8x16xf32>
    %cst_118 = arith.constant dense<0.000000e+00> : vector<8x128xf32>
    %345 = tpu.matmul %344, %343, %cst_118 {dimension_numbers = #tpu.dot_dimension_numbers<[1], [0], [0], [1], [0, 0, 1, 1], [], []>} : vector<8x16xf32>, vector<16x128xf32>, vector<8x128xf32> -> vector<8x128xf32>
    %c0_119 = arith.constant 0 : index
    %c0_120 = arith.constant 0 : index
    %346 = vector.load %arg10[%c0_119, %c0_120] : memref<8x16xf32, #tpu.memory_space<vmem>>, vector<8x16xf32>
    %c0_121 = arith.constant 0 : index
    %c0_122 = arith.constant 0 : index
    %c0_123 = arith.constant 0 : index
    %347 = vector.load %arg1[%c0_121, %c0_122, %c0_123] : memref<1x16x128xf32, #tpu.memory_space<vmem>>, vector<1x16x128xf32>
    %348 = vector.shape_cast %347 : vector<1x16x128xf32> to vector<16x128xf32>
    %cst_124 = arith.constant dense<0.000000e+00> : vector<8x128xf32>
    %349 = tpu.matmul %346, %348, %cst_124 {dimension_numbers = #tpu.dot_dimension_numbers<[1], [0], [0], [1], [0, 0, 1, 1], [], []>} : vector<8x16xf32>, vector<16x128xf32>, vector<8x128xf32> -> vector<8x128xf32>
    %350 = arith.truncf %349 : vector<8x128xf32> to vector<8x128xbf16>
    %c0_125 = arith.constant 0 : index
    %c0_126 = arith.constant 0 : index
    %351 = vector.load %arg12[%c0_125, %c0_126] : memref<128x128xbf16, #tpu.memory_space<vmem>>, vector<128x128xbf16>
    %cst_127 = arith.constant dense<0.000000e+00> : vector<8x128xf32>
    %352 = tpu.matmul %350, %351, %cst_127 {dimension_numbers = #tpu.dot_dimension_numbers<[1], [0], [0], [1], [0, 0, 1, 1], [], []>} : vector<8x128xbf16>, vector<128x128xbf16>, vector<8x128xf32> -> vector<8x128xf32>
    %c0_128 = arith.constant 0 : index
    %c0_129 = arith.constant 0 : index
    %353 = vector.load %arg13[%c0_128, %c0_129] : memref<1x128xf32, #tpu.memory_space<vmem>>, vector<1x128xf32>
    %354 = vector.broadcast %353 : vector<1x128xf32> to vector<8x128xf32>
    %355 = arith.addf %352, %354 : vector<8x128xf32>
    %356 = arith.addf %345, %355 : vector<8x128xf32>
    %c0_130 = arith.constant 0 : index
    %c0_131 = arith.constant 0 : index
    %c0_132 = arith.constant 0 : index
    %357 = vector.load %arg15[%c0_130, %c0_131, %c0_132] : memref<1x8x128xf32, #tpu.memory_space<vmem>>, vector<1x8x128xf32>
    %358 = vector.shape_cast %357 : vector<1x8x128xf32> to vector<8x128xf32>
    %359 = vector.shape_cast %356 : vector<8x128xf32> to vector<1x8x128xf32>
    tpu.vector_store %arg15[%c0_130, %c0_131, %c0_132], %359 {strides = array<i32>} : memref<1x8x128xf32, #tpu.memory_space<vmem>>, vector<1x8x128xf32>,
    return
  }
  func.func @transform_0(%arg0: i32) -> (i32, i32, i32) {
    %c0_i32 = arith.constant 0 : i32
    %c0_i32_0 = arith.constant 0 : i32
    %c0_i32_1 = arith.constant 0 : i32
    return %arg0, %c0_i32, %c0_i32_0 : i32, i32, i32
  }
  func.func @transform_1(%arg0: i32) -> (i32, i32, i32) {
    %c0_i32 = arith.constant 0 : i32
    %c0_i32_0 = arith.constant 0 : i32
    %c0_i32_1 = arith.constant 0 : i32
    %c0_i32_2 = arith.constant 0 : i32
    return %c0_i32, %c0_i32_0, %c0_i32_1 : i32, i32, i32
  }
  func.func @transform_2(%arg0: i32) -> (i32, i32, i32) {
    %c0_i32 = arith.constant 0 : i32
    %c0_i32_0 = arith.constant 0 : i32
    %c0_i32_1 = arith.constant 0 : i32
    %c0_i32_2 = arith.constant 0 : i32
    return %c0_i32, %c0_i32_0, %c0_i32_1 : i32, i32, i32
  }
  func.func @transform_3(%arg0: i32) -> (i32, i32) {
    %c0_i32 = arith.constant 0 : i32
    %c0_i32_0 = arith.constant 0 : i32
    %c0_i32_1 = arith.constant 0 : i32
    return %c0_i32, %c0_i32_0 : i32, i32
  }
  func.func @transform_4(%arg0: i32) -> (i32, i32) {
    %c0_i32 = arith.constant 0 : i32
    %c0_i32_0 = arith.constant 0 : i32
    %c0_i32_1 = arith.constant 0 : i32
    return %c0_i32, %c0_i32_0 : i32, i32
  }
  func.func @transform_5(%arg0: i32) -> (i32, i32) {
    %c0_i32 = arith.constant 0 : i32
    %c0_i32_0 = arith.constant 0 : i32
    %c0_i32_1 = arith.constant 0 : i32
    return %c0_i32, %c0_i32_0 : i32, i32
  }
  func.func @transform_6(%arg0: i32) -> (i32, i32) {
    %c0_i32 = arith.constant 0 : i32
    %c0_i32_0 = arith.constant 0 : i32
    %c0_i32_1 = arith.constant 0 : i32
    return %c0_i32, %c0_i32_0 : i32, i32
  }
  func.func @transform_7(%arg0: i32) -> (i32, i32) {
    %c0_i32 = arith.constant 0 : i32
    %c0_i32_0 = arith.constant 0 : i32
    %c0_i32_1 = arith.constant 0 : i32
    return %c0_i32, %c0_i32_0 : i32, i32
  }
  func.func @transform_8(%arg0: i32) -> (i32, i32, i32) {
    %c0_i32 = arith.constant 0 : i32
    %c0_i32_0 = arith.constant 0 : i32
    %c0_i32_1 = arith.constant 0 : i32
    %c0_i32_2 = arith.constant 0 : i32
    return %c0_i32, %c0_i32_0, %c0_i32_1 : i32, i32, i32
  }
  func.func @transform_9(%arg0: i32) -> (i32, i32) {
    %c0_i32 = arith.constant 0 : i32
    %c0_i32_0 = arith.constant 0 : i32
    %c0_i32_1 = arith.constant 0 : i32
    return %c0_i32, %c0_i32_0 : i32, i32
  }
  func.func @transform_10(%arg0: i32) -> (i32, i32) {
    %c0_i32 = arith.constant 0 : i32
    %c0_i32_0 = arith.constant 0 : i32
    %c0_i32_1 = arith.constant 0 : i32
    return %c0_i32, %c0_i32_0 : i32, i32
  }
  func.func @transform_11(%arg0: i32) -> (i32, i32) {
    %c0_i32 = arith.constant 0 : i32
    %c0_i32_0 = arith.constant 0 : i32
    %c0_i32_1 = arith.constant 0 : i32
    return %c0_i32, %c0_i32_0 : i32, i32
  }
  func.func @transform_12(%arg0: i32) -> (i32, i32) {
    %c0_i32 = arith.constant 0 : i32
    %c0_i32_0 = arith.constant 0 : i32
    %c0_i32_1 = arith.constant 0 : i32
    return %c0_i32, %c0_i32_0 : i32, i32
  }
  func.func @transform_13(%arg0: i32) -> i32 {
    %c0_i32 = arith.constant 0 : i32
    %c0_i32_0 = arith.constant 0 : i32
    return %c0_i32 : i32
  }
  func.func @transform_14(%arg0: i32) -> (i32, i32, i32) {
    %c0_i32 = arith.constant 0 : i32
    %c0_i32_0 = arith.constant 0 : i32
    %c0_i32_1 = arith.constant 0 : i32
    return %arg0, %c0_i32, %c0_i32_0 : i32, i32, i32
  }
}

</mosaic_0001>

<bundles_post_ra>
// kernel: tpu_custom_call.1
= control target key start
LH: loop header
LB: loop body
LE: loop exit
PB: predicated region body
PF: predicated region fallthrough
CT: control target
= control target key end

     0   :  { %s4991_s0 = inlined_call_operand.hbm [shape: f32[2,16,128], index: 0, kind: input, shape index: {}]   ;;  %s4992_s1 = inlined_call_operand.hbm [shape: f32[3,3,128], index: 1, kind: input, shape index: {}]   ;;  %s4993_s2 = inlined_call_operand.hbm [shape: f32[3,3,256], index: 2, kind: input, shape index: {}]   ;;  %s4994_s3 = inlined_call_operand.hbm [shape: bf16[128,256], index: 3, kind: input, shape index: {}]   ;;  %s4995_s4 = inlined_call_operand.hbm [shape: bf16[256,256], index: 4, kind: input, shape index: {}]   ;;  %s4996_s5 = inlined_call_operand.hbm [shape: f32[128,128], index: 5, kind: input, shape index: {}]   ;;  %s4997_s6 = inlined_call_operand.hbm [shape: f32[256,256], index: 6, kind: input, shape index: {}]   ;;  %s4998_s7 = inlined_call_operand.vmem [shape: f32[3,128], index: 7, kind: input, shape index: {}]   ;;  %s4999_s8 = inlined_call_operand.hbm [shape: f32[3,3,256], index: 8, kind: input, shape index: {}]   ;;  %s5000_s9 = inlined_call_operand.vmem [shape: f32[8,16], index: 9, kind: input, shape index: {}]   ;;  %s5001_s10 = inlined_call_operand.hbm [shape: f32[256,128], index: 10, kind: input, shape index: {}]   ;;  %s5002_s11 = inlined_call_operand.hbm [shape: bf16[128,128], index: 11, kind: input, shape index: {}]   ;;  %s5003_s12 = inlined_call_operand.vmem [shape: f32[1,128], index: 12, kind: input, shape index: {}]   ;;  %s5004_s13 = inlined_call_operand.vmem [shape: f32[4], index: 13, kind: input, shape index: {}]   ;;  %s5005_s14 = inlined_call_operand.hbm [shape: f32[2,8,128], index: 14, kind: output, shape index: {}]  }
   0x1   :  { %5039 = sst [smem:[#allocation48_spill]] %s4992_s1 }
   0x2   :  { %5040 = sst [smem:[#allocation49_spill]] %s4993_s2 }
   0x3   :  { %5041 = sst [smem:[#allocation50_spill]] %s4994_s3 }
   0x4   :  { %5042 = sst [smem:[#allocation51_spill]] %s4995_s4 }
   0x5   :  { %5043 = sst [smem:[#allocation52_spill]] %s4996_s5 }
   0x6   :  { %5044 = sst [smem:[#allocation53_spill]] %s4997_s6 }
   0x7   :  { %5045 = sst [smem:[#allocation54_spill]] %s4999_s8 }
   0x8   :  { %5046 = sst [smem:[#allocation55_spill]] %s5001_s10 }
   0x9   :  { %5047 = sst [smem:[#allocation56_spill]] %s5003_s12 }
   0xa   :  { %5048 = sst [smem:[#allocation57_spill]] %s5005_s14 }
   0xb   :  { %19 = vsyncpa [#allocation3], 0 }
   0xc   :  { %21 = vsyncpa [#allocation3 + $0x1], 0 }
   0xd   :  { %22 = vsyncpa [#allocation7], 0 }
   0xe   :  { %23 = vsyncpa [#allocation10], 0 }
   0xf   :  { %24 = vsyncpa [#allocation13], 0 }
  0x10   :  { %25 = vsyncpa [#allocation16], 0 }
  0x11   :  { %26 = vsyncpa [#allocation19], 0 }
  0x12   :  { %27 = vsyncpa [#allocation5], 0 }
  0x13   :  { %28 = vsyncpa [#allocation4], 0 }
  0x14   :  { %30 = vsyncpa [#allocation4 + $0x1], 0  ;;  %s3816_s29 = smov 0   ;;  %s3818_s30 = smov 0  }
  0x15   :  { %s3820_s15 = smov 0   ;;  %s3822_s16 = smov 0  }
  0x16 LB: > { %s3716_s17 = smov [#allocation6]   ;;  %s3837_s19 = sadd.s32 4294967295, %s3714_s16   ;;  %s3714_s16 = sphi %s3822_s16, %s5129_s16   ;;  %s3710_s15 = sphi %s3820_s15, %s5128_s15   ;;  %s3706_s30 = sphi %s3818_s30, %s5127_s30   ;;  %s3702_s29 = sphi %s3816_s29, %s5126_s29  }
  0x17   : > { %s378_s18 = sshll.u32 %s3716_s17, 4  ;;  %p2797_p0 = scmp.ge.s32.totalorder %s3714_s16, 1  ;;  %s379_s18 = int_to_ptr.vmem [resolvable:$true] %s378_s18 }
  0x18   : > { %p5013_p1 = scmp.eq.s32.totalorder %s3837_s19, 0  ;;  %p366_p2 = scmp.lt.s32.totalorder %s3714_s16, 3 }
  0x19   : > { %s3717_s22 = smov [#allocation9]   ;;  %s3718_s24 = smov [#allocation12]  }
  0x1a   : > { %p3842_p3 = pnand %p2797_p0, %p366_p2  ;;  %s404_s23 = sshll.u32 %s3717_s22, 4  ;;  %s3855_s23 = int_to_ptr.vmem [resolvable:$true] %s404_s23 }
  0x1b   : > { %s3857_s25 = sshll.u32 %s3718_s24, 4  ;;  %s3360_s27 = scalar_lea.vmem %s379_s18, 192  ;;  %s431_s25 = int_to_ptr.vmem [resolvable:$true] %s3857_s25 }
  0x1c   : > { %s5049_s20 = scalar_select %p3842_p3, 1, 0 }
  0x1d   : > { %p3078_p5 = pneg %p3842_p3  ;;  %p3361_p8 = scmp.ne.s32.totalorder %s379_s18, %s3360_s27 }
  0x1e   : > { %p3368_p11 = scmp.lt.s32.totalorder %s379_s18, %s379_s18  ;;  %p3369_p12 = scmp.lt.s32.totalorder %s3360_s27, %s3360_s27 }
  0x1f   : > { %p3851_p6 = pnand %p3078_p5, %p5013_p1 }
  0x20   : > { %p3370_p13 = por %p3369_p12, %p3368_p11 }
  0x21   : > { %p3861_p7 = pneg %p3851_p6 }
  0x23   : > { %p3363_p9 = pnand %p3361_p8, %p3861_p7 }
  0x25   : > { %p3364_p10 = pneg %p3363_p9 }
  0x27   : > { %p3371_p0 = pnand %p3370_p13, %p3364_p10 }
  0x29   : > { %3374 = shalt.err (!%p3371_p0)
}
  0x2a   : > { %s5007_s28 = smov 64   ;;  %s5008_s17 = smov 4  }
  0x2b   : > { %s5052_s1 = sld [smem:[#allocation48_spill]]  ;;  %s3386_s14 = scalar_lea.vmem %s3855_s23, 2048 }
  0x2c   : > { %p3387_p2 = scmp.ne.s32.totalorder %s3855_s23, %s3386_s14  ;;  %p3394_p9 = scmp.lt.s32.totalorder %s3855_s23, %s3855_s23 }
  0x2d   : > { %p3395_p10 = scmp.lt.s32.totalorder %s3386_s14, %s3386_s14 }
  0x2e   : > { %p3389_p5 = pnand %p3387_p2, %p3861_p7 }
  0x2f   : > { %p3396_p11 = por %p3395_p10, %p3394_p9 }
  0x30   : > { %p3390_p8 = pneg %p3389_p5 }
  0x31   : > { %3081 = dma.hbm_to_vmem [thread:$0]  (!%p3851_p6), %s5052_s1, 192, %s379_s18, [#allocation7], %s5007_s28, %s5007_s28, %s5008_s17  }
  0x32   : > { %p3397_p12 = pnand %p3396_p11, %p3390_p8 }
  0x34   : > { %3400 = shalt.err (!%p3397_p12)
}
  0x35   : > { %s5009_s27 = smov 128   ;;  %s5011_s12 = smov 8  }
  0x36   : > { %s5053_s3 = sld [smem:[#allocation50_spill]]  ;;  %s3412_s24 = scalar_lea.vmem %s431_s25, 2048 }
  0x37   : > { %p3413_p13 = scmp.ne.s32.totalorder %s431_s25, %s3412_s24  ;;  %p3420_p5 = scmp.lt.s32.totalorder %s431_s25, %s431_s25 }
  0x38   : > { %p3421_p8 = scmp.lt.s32.totalorder %s3412_s24, %s3412_s24 }
  0x39   : > { %p3415_p0 = pnand %p3413_p13, %p3861_p7 }
  0x3a   : > { %p3422_p9 = por %p3421_p8, %p3420_p5 }
  0x3b   : > { %p3416_p2 = pneg %p3415_p0 }
  0x3c   : > { %3087 = dma.hbm_to_vmem [thread:$0]  (!%p3851_p6), %s5053_s3, 2048, %s3855_s23, [#allocation10], %s5009_s27, %s5009_s27, %s5011_s12  }
  0x3d   : > { %p3423_p10 = pnand %p3422_p9, %p3416_p2 }
  0x3f   : > { %3426 = shalt.err (!%p3423_p10)
}
  0x40   : > { %s5054_s5 = sld [smem:[#allocation52_spill]]  ;;  %s3723_s23 = smov [#allocation15]  }
  0x41   : > { %s459_s18 = sshll.u32 %s3723_s23, 4  ;;  %s3724_s22 = smov [#allocation8]   ;;  %s460_s18 = int_to_ptr.vmem [resolvable:$true] %s459_s18 }
  0x42   : > { %s391_s17 = sshll.u32 %s3724_s22, 4  ;;  %s3438_s1 = scalar_lea.vmem %s460_s18, 384  ;;  %s392_s17 = int_to_ptr.vmem [resolvable:$true] %s391_s17 }
  0x43   : > { %p3439_p11 = scmp.ne.s32.totalorder %s460_s18, %s3438_s1  ;;  %p3446_p0 = scmp.lt.s32.totalorder %s460_s18, %s460_s18 }
  0x44   : > { %p3447_p2 = scmp.lt.s32.totalorder %s3438_s1, %s3438_s1 }
  0x45   : > { %p3441_p12 = pnand %p3439_p11, %p3861_p7 }
  0x46   : > { %3093 = dma.hbm_to_vmem [thread:$0]  (!%p3851_p6), %s5054_s5, 2048, %s431_s25, [#allocation13], %s5009_s27, %s5009_s27, %s5011_s12  }
  0x47   : > { %p3442_p13 = pneg %p3441_p12  ;;  %p3448_p5 = por %p3447_p2, %p3446_p0 }
  0x49   : > { %p3449_p8 = pnand %p3448_p5, %p3442_p13 }
  0x4b   : > { %3452 = shalt.err (!%p3449_p8)
}
  0x4c   : > { %s5055_s8 = sld [smem:[#allocation54_spill]]  ;;  %s3464_s24 = scalar_lea.vmem %s392_s17, 384 }
  0x4d   : > { %p3465_p9 = scmp.ne.s32.totalorder %s392_s17, %s3464_s24  ;;  %p3472_p12 = scmp.lt.s32.totalorder %s392_s17, %s392_s17 }
  0x4e   : > { %p3473_p0 = scmp.lt.s32.totalorder %s3464_s24, %s3464_s24 }
  0x4f   : > { %p3467_p10 = pnand %p3465_p9, %p3861_p7 }
  0x50   : > { %p3474_p13 = por %p3473_p0, %p3472_p12 }
  0x51   : > { %p3468_p11 = pneg %p3467_p10 }
  0x52   : > { %3099 = dma.hbm_to_vmem [thread:$0]  (!%p3851_p6), %s5055_s8, 384, %s460_s18, [#allocation16], %s5009_s27, %s5009_s27, %s5011_s12  }
  0x53   : > { %p3475_p2 = pnand %p3474_p13, %p3468_p11 }
  0x55   : > { %3478 = shalt.err (!%p3475_p2)
}
  0x56   : > { %s5056_s2 = sld [smem:[#allocation49_spill]]  ;;  %s3725_s23 = smov [#allocation11]  }
  0x57   : > { %s417_s18 = sshll.u32 %s3725_s23, 4  ;;  %s3726_s22 = smov [#allocation14]   ;;  %s418_s18 = int_to_ptr.vmem [resolvable:$true] %s417_s18 }
  0x58   : > { %s443_s25 = sshll.u32 %s3726_s22, 4  ;;  %s3490_s28 = scalar_lea.vmem %s418_s18, 4096  ;;  %s444_s25 = int_to_ptr.vmem [resolvable:$true] %s443_s25 }
  0x59   : > { %p3491_p5 = scmp.ne.s32.totalorder %s418_s18, %s3490_s28  ;;  %p3498_p10 = scmp.lt.s32.totalorder %s418_s18, %s418_s18 }
  0x5a   : > { %p3499_p11 = scmp.lt.s32.totalorder %s3490_s28, %s3490_s28 }
  0x5b   : > { %p3493_p8 = pnand %p3491_p5, %p3861_p7 }
  0x5c   : > { %3084 = dma.hbm_to_vmem [thread:$0]  (!%p3851_p6), %s5056_s2, 384, %s392_s17, [#allocation7], %s5009_s27, %s5009_s27, %s5011_s12  }
  0x5d   : > { %p3494_p9 = pneg %p3493_p8  ;;  %p3500_p12 = por %p3499_p11, %p3498_p10 }
  0x5f   : > { %p3501_p0 = pnand %p3500_p12, %p3494_p9 }
  0x61   : > { %3504 = shalt.err (!%p3501_p0)
}
  0x62   : > { %s5057_s4 = sld [smem:[#allocation51_spill]]  ;;  %s3516_s1 = scalar_lea.vmem %s444_s25, 8192 }
  0x63   : > { %p3517_p13 = scmp.ne.s32.totalorder %s444_s25, %s3516_s1  ;;  %p3524_p8 = scmp.lt.s32.totalorder %s444_s25, %s444_s25 }
  0x64   : > { %p3525_p10 = scmp.lt.s32.totalorder %s3516_s1, %s3516_s1 }
  0x65   : > { %p3519_p2 = pnand %p3517_p13, %p3861_p7 }
  0x66   : > { %p3526_p9 = por %p3525_p10, %p3524_p8 }
  0x67   : > { %p3520_p5 = pneg %p3519_p2 }
  0x68   : > { %3090 = dma.hbm_to_vmem [thread:$0]  (!%p3851_p6), %s5057_s4, 4096, %s418_s18, [#allocation10], %s5009_s27, %s5009_s27, %s5011_s12  }
  0x69   : > { %p3527_p11 = pnand %p3526_p9, %p3520_p5 }
  0x6b   : > { %3530 = shalt.err (!%p3527_p11)
}
  0x6c   : > { %s3727_s14 = smov 256   ;;  %s3728_s23 = smov 16  }
  0x6d   : > { %s5058_s6 = sld [smem:[#allocation53_spill]]  ;;  %s3729_s18 = smov [#allocation17]  }
  0x6e   : > { %s475_s17 = sshll.u32 %s3729_s18, 4  ;;  %s3730_s24 = smov [#allocation18]   ;;  %s476_s17 = int_to_ptr.vmem [resolvable:$true] %s475_s17 }
  0x6f   : > { %s488_s27 = sshll.u32 %s3730_s24, 4  ;;  %s3542_s12 = scalar_lea.vmem %s476_s17, 4096  ;;  %s489_s27 = int_to_ptr.vmem [resolvable:$true] %s488_s27 }
  0x70   : > { %p3543_p12 = scmp.ne.s32.totalorder %s476_s17, %s3542_s12  ;;  %p3550_p2 = scmp.lt.s32.totalorder %s476_s17, %s476_s17 }
  0x71   : > { %p3551_p5 = scmp.lt.s32.totalorder %s3542_s12, %s3542_s12 }
  0x72   : > { %p3545_p0 = pnand %p3543_p12, %p3861_p7 }
  0x73   : > { %3096 = dma.hbm_to_vmem [thread:$0]  (!%p3851_p6), %s5058_s6, 8192, %s444_s25, [#allocation13], %s3727_s14, %s3727_s14, %s3728_s23  }
  0x74   : > { %p3546_p13 = pneg %p3545_p0  ;;  %p3552_p8 = por %p3551_p5, %p3550_p2 }
  0x76   : > { %p3553_p10 = pnand %p3552_p8, %p3546_p13 }
  0x78   : > { %3556 = shalt.err (!%p3553_p10)
}
  0x79   : > { %s5059_s1 = smov 8   ;;  %s5060_s22 = smov 128  }
  0x7a   : > { %s5061_s10 = sld [smem:[#allocation55_spill]]  ;;  %s505_s18 = sshll.u32 %s5004_s13, 4  ;;  %s506_s18 = int_to_ptr.vmem [resolvable:$true] %s505_s18 }
  0x7b   : > { %s3568_s24 = scalar_lea.vmem %s489_s27, 1024  ;;  %p3576_p0 = scmp.lt.s32.totalorder %s489_s27, %s489_s27 }
  0x7c   : > { %p3569_p9 = scmp.ne.s32.totalorder %s489_s27, %s3568_s24  ;;  %p3577_p13 = scmp.lt.s32.totalorder %s3568_s24, %s3568_s24 }
  0x7e   : > { %p3571_p11 = pnand %p3569_p9, %p3861_p7  ;;  %p3578_p2 = por %p3577_p13, %p3576_p0 }
  0x80   : > { %3102 = dma.hbm_to_vmem [thread:$0]  (!%p3851_p6), %s5061_s10, 4096, %s476_s17, [#allocation16], %s5060_s22, %s5060_s22, %s5059_s1  }
  0x81   : > { %p3572_p12 = pneg %p3571_p11 }
  0x83   : > { %p3579_p5 = pnand %p3578_p2, %p3572_p12 }
  0x85   : > { %3582 = shalt.err (!%p3579_p5)
}
  0x86   : > { %s5062_s12 = smov 4   ;;  %s5063_s25 = smov 64  }
  0x87   : > { %3105 = dma.hbm_to_vmem [thread:$0]  (!%p3851_p6), %s5002_s11, 1024, %s489_s27, [#allocation19], %s5063_s25, %s5063_s25, %s5062_s12  }
  0x88   : > { %s3583_s23 = scalar_lea.vmem %s506_s18, 16  ;;  %p3591_p11 = scmp.lt.s32.totalorder %s506_s18, %s506_s18 }
  0x89   : > { %p3584_p8 = scmp.ne.s32.totalorder %s506_s18, %s3583_s23  ;;  %p3592_p0 = scmp.lt.s32.totalorder %s3583_s23, %s3583_s23 }
  0x8b   : > { %p3586_p10 = pnand %p3584_p8, %p3861_p7  ;;  %p3593_p12 = por %p3592_p0, %p3591_p11 }
  0x8d   : > { %p3587_p9 = pneg %p3586_p10 }
  0x8f   : > { %p3594_p13 = pnand %p3593_p12, %p3587_p9 }
  0x91   : > { %3597 = shalt.err (!%p3594_p13)
}
  0x92   : > { %s3731_s28 = smov [#allocation20]   ;;  %s2796_s26 = sadd.s32 4294967294, %s3714_s16  }
  0x93   : > { %3108 = dma.vmem_to_smem (!%p3851_p6), %s506_s18, 16, %s3731_s28, [#allocation5]  }
  0x94   : > { %s3967_s27 = sadd.s32 1, %s3714_s16   ;;  %s43_s24 = sadd.s32 1, %s3710_s15 }
  0x95   : > { %s40_s21 = ssub.s32 %s3714_s16, %s3967_s27  ;;  %p50_p2 = scmp.ne.s32.totalorder %s3710_s15, %s3706_s30 }
  0x96   : > { %p41_p7 = scmp.eq.s32.totalorder %s40_s21, 0  ;;  %p51_p5 = scmp.eq.s32.totalorder %s3714_s16, 0 }
  0x97   : > { %p56_p8 = scmp.ne.s32.totalorder %s3706_s30, %s3702_s29  ;;  %p353_p9 = scmp.eq.s32.totalorder %s3837_s19, 1 }
  0x98   : > { %s3978_s12 = scalar_select %p41_p7, %s3710_s15, %s43_s24  }
  0x99   : > { %p3980_p10 = por %p51_p5, %p50_p2  ;;  %p3986_p6 = por %p5013_p1, %p56_p8 }
  0x9a   : > { %p359_p11 = scmp.eq.s32.totalorder %s2796_s26, 1  ;;  %p3127_p0 = scmp.lt.s32.totalorder %s3714_s16, 2 }
  0x9b   : > { %s5065_s18 = scalar_select %p3986_p6, 1, 0 }
  0x9c   : > { %s516_s17 = sand.u32 1, %s3710_s15   ;;  %p3993_p12 = por %p353_p9, %p50_p2 }
  0x9d   : > { %p3997_p13 = por %p359_p11, %p56_p8  ;;  %s2809_s28 = sshll.u32 %s516_s17, 4 }
  0x9e   : > { %s5066_s14 = scalar_select %p3993_p12, 1, 0 }
  0x9f   : > { %s5067_s23 = scalar_select %p3997_p13, 1, 0 }
  0xa0   : > { %s2894_s21 = sshll.u32 %s3714_s16, 8  ;;  %s520_s26 = scalar_lea.vmem [#allocation2], %s2809_s28 }
  0xa1   : > { %s4005_s3 = scalar_lea.hbm %s4991_s0, %s2894_s21  ;;  %s527_s4 = sshll.u32 %s520_s26, 4  ;;  %s4007_s4 = int_to_ptr.vmem [resolvable:$true] %s527_s4 }
  0xa2   : > { %p4011_p7 = pnand %p3127_p0, %p3980_p10  ;;  %s4015_s6 = scalar_lea.sflag [#allocation3], %s516_s17 }
  0xa3   : > { %s3598_s8 = scalar_lea.hbm %s4005_s3, 256  ;;  %s3603_s28 = scalar_lea.hbm %s4991_s0, 512 }
  0xa4   : > { %p3599_p2 = scmp.ne.s32.totalorder %s4005_s3, %s3598_s8  ;;  %p3600_p5 = pneg %p4011_p7 }
  0xa5   : > { %p3604_p10 = scmp.lt.s32.totalorder %s4005_s3, %s4991_s0  ;;  %p3605_p11 = scmp.lt.s32.totalorder %s3603_s28, %s3598_s8 }
  0xa6   : > { %p3601_p8 = pnand %p3600_p5, %p3599_p2 }
  0xa7   : > { %p3606_p0 = por %p3605_p11, %p3604_p10 }
  0xa8   : > { %p3602_p9 = pneg %p3601_p8 }
  0xaa   : > { %p3607_p4 = pnand %p3606_p0, %p3602_p9 }
  0xac   : > { %3610 = shalt.err (!%p3607_p4)
}
  0xad   : > { %s3611_s25 = scalar_lea.vmem %s4007_s4, 256  ;;  %s3732_s17 = smov [#allocation2]  }
  0xae   : > { %p3612_p1 = scmp.ne.s32.totalorder %s4007_s4, %s3611_s25  ;;  %s3616_s10 = sshll.u32 %s3732_s17, 4  ;;  %s3617_s10 = int_to_ptr.vmem [resolvable:$false] %s3616_s10 }
  0xaf   : > { %s3618_s2 = scalar_lea.vmem %s3617_s10, 512  ;;  %p3619_p8 = scmp.lt.s32.totalorder %s4007_s4, %s3617_s10 }
  0xb0   : > { %p3614_p13 = pnand %p3612_p1, %p3600_p5  ;;  %p3620_p12 = scmp.lt.s32.totalorder %s3618_s2, %s3611_s25 }
  0xb2   : > { %p3615_p2 = pneg %p3614_p13  ;;  %p3621_p6 = por %p3620_p12, %p3619_p8 }
  0xb4   : > { %p3622_p3 = pnand %p3621_p6, %p3615_p2 }
  0xb6   : > { %3625 = shalt.err (!%p3622_p3)
}
  0xb7   : > { %3112 = dma.hbm_to_vmem [thread:$0]  (!%p4011_p7), %s4005_s3, 256, %s4007_s4, %s4015_s6, %s5060_s22, %s5060_s22, %s5059_s1  }
  0xb8   : > { %p5069_p1 = scmp.ne.s32.totalorder %s5049_s20, 0 }
  0xba   : > { %539 = sbr.rel (%p5069_p1) target bundleno = 2436 (0x984), region = 76 }
  0xbf   : > { %s4042_s8 = sand.u32 1, %s3706_s30   ;;  %p5070_p3 = scmp.ne.s32.totalorder %s5065_s18, 0 }
  0xc0   : > { %s2813_s10 = sshll.u32 %s4042_s8, 4  ;;  %s542_s21 = scalar_lea.sflag [#allocation3], %s4042_s8 }
  0xc1   : > { %s4046_s28 = scalar_lea.vmem [#allocation2], %s2813_s10 }
  0xc2   : > { %3669 = dma.done.wait (%p5070_p3), %s542_s21, 256  }
  0xc3   : > { %3671 = vsyncadd (%p5070_p3), %s542_s21, 4294967040  ;;  %p5071_p4 = scmp.eq.s32.totalorder %s3837_s19, 0 }
  0xc5   : > { %3673 = dma.done.wait (%p5071_p4), [#allocation7], 576   ;;  %p5072_p6 = pmov %p5071_p4 }
  0xc6   : > { %p5073_p12 = pmov %p5071_p4 }
  0xc7   : > { %3675 = vsyncadd (%p5072_p6), [#allocation7], 4294966720 }
  0xc8   : > { %3677 = dma.done.wait (%p5073_p12), [#allocation10], 6144   ;;  %p5074_p13 = pmov %p5071_p4 }
  0xc9   : > { %p5075_p7 = pmov %p5071_p4 }
  0xca   : > { %3679 = vsyncadd (%p5074_p13), [#allocation10], 4294961152 }
  0xcb   : > { %3681 = dma.done.wait (%p5075_p7), [#allocation13], 10240   ;;  %p5076_p5 = pmov %p5071_p4 }
  0xcc   : > { %p5077_p9 = pmov %p5071_p4 }
  0xcd   : > { %3683 = vsyncadd (%p5076_p5), [#allocation13], 4294957056 }
  0xce   : > { %3685 = dma.done.wait (%p5077_p9), [#allocation16], 4480   ;;  %p5078_p10 = pmov %p5071_p4 }
  0xcf   : > { %p5079_p11 = pmov %p5071_p4 }
  0xd0   : > { %3687 = vsyncadd (%p5078_p10), [#allocation16], 4294962816 }
  0xd1   : > { %3689 = dma.done.wait (%p5079_p11), [#allocation19], 1024   ;;  %p5080_p0 = pmov %p5071_p4 }
  0xd3   : > { %3691 = vsyncadd (%p5080_p0), [#allocation19], 4294966272  ;;  %p5081_p2 = pmov %p5080_p0 }
  0xd4   : > { %p5082_p8 = pmov %p5080_p0 }
  0xd5   : > { %3693 = dma.done.wait (%p5081_p2), [#allocation5], 16  }
  0xd6   : > { %3695 = vsyncadd (%p5082_p8), [#allocation5], 4294967280 }
  0xd7   : > { %590 = sfence }
  0xd8   : > { %v632_v0 = vld [vmem:[%s4046_s28] sm:$0xff]  ;;  %v633_v2 = vld [vmem:[%s4046_s28 + $0x8] sm:$0xff]  ;;  %vm641_vm0 = vcmask 1040384   ;;  %v5017_v4 = vmov 0.0   ;;  %s3734_s3 = smov 120   ;;  %s3735_s4 = smov 8   ;;  %v652_v30 = vlaneseq }
  0xd9   : > { %v4077_v1 = vmax.f32 %v632_v0, 0.0  ;;  %v4080_v3 = vmax.f32 %v633_v2, 0.0  ;;  %2965 = vmatprep.subr.mxu0 %v5017_v4  ;;  %v780_v5 = vld [vmem:[#allocation12 + $0x78] sm:$0xff]  ;;  %v779_v8 = vld [vmem:[#allocation12 + $0x70] sm:$0xff]  ;;  %v778_v10 = vld [vmem:[#allocation12 + $0x68] sm:$0xff]  ;;  %vm722_vm1 = vcmask 1046528  }
  0xda   : > { %2966 = vmatpush3.msra.mxu0 %v780_v5  ;;  %v777_v12 = vld [vmem:[#allocation12 + $0x60] sm:$0xff]  ;;  %v776_v13 = vld [vmem:[#allocation12 + $0x58] sm:$0xff]  ;;  %v775_v14 = vld [vmem:[#allocation12 + $0x50] sm:$0xff]  ;;  %vm3736_vm2 = vmmov 0   ;;  %v4140_v31 = vshrl.u32 %v652_v30, 7  ;;  %v4145_v33 = vand.u32 127, %v652_v30 }
  0xdb   : > { %v642_v6 = vrot.slane %v4077_v1, 7  ;;  %v643_v7 = vrot.slane %v4080_v3, 7  ;;  %2967 = vmatprep.subr.mxu0 %v5017_v4  ;;  %v724_v15 = vrot.slane %v4080_v3, 1  ;;  %v723_v16 = vrot.slane %v4077_v1, 1  ;;  %v774_v17 = vld [vmem:[#allocation12 + $0x48] sm:$0xff]  ;;  %v773_v18 = vld [vmem:[#allocation12 + $0x40] sm:$0xff]  ;;  %2997 = vmatprep.mubr.msk.f32.mxu0 %vm3736_vm2, %v5017_v4 }
  0xdc   : > { %2968 = vmatpush3.msra.mxu0 %v779_v8  ;;  %v772_v21 = vld [vmem:[#allocation12 + $0x38] sm:$0xff]  ;;  %v771_v22 = vld [vmem:[#allocation12 + $0x30] sm:$0xff]  ;;  %v770_v23 = vld [vmem:[#allocation12 + $0x28] sm:$0xff]  ;;  %v4143_v32 = vsub.s32 1, %v4140_v31  ;;  %v4148_v34 = vsub.s32 0, %v4140_v31  ;;  %vm654_vm3 = vcmp.ge.s32.totalorder %v4145_v33, 8 }
  0xdd   : > { %v4087_v9 = vsel %vm641_vm0, 0.0, %v642_v6  ;;  %v4094_v11 = vsel %vm641_vm0, %v642_v6, %v643_v7  ;;  %2969 = vmatprep.subr.mxu0 %v5017_v4  ;;  %v4116_v19 = vsel %vm722_vm1, %v724_v15, 0.0  ;;  %v4119_v20 = vsel %vm722_vm1, %v723_v16, %v724_v15  ;;  %v769_v24 = vld [vmem:[#allocation12 + $0x20] sm:$0xff]  ;;  %v768_v25 = vld [vmem:[#allocation12 + $0x18] sm:$0xff]  ;;  %v767_v26 = vld [vmem:[#allocation12 + $0x10] sm:$0xff]  ;;  %s784_s5 = sld [smem:[#allocation20]] }
  0xde   : > { %671 = vrot.lane.b32.xlu1 %v4087_v9, %s3734_s3  ;;  %648 = vrot.lane.b32.xlu0 %v4087_v9, %s3735_s4  ;;  %v766_v27 = vld [vmem:[#allocation12 + $0x8] sm:$0xff]  ;;  %v3214_v28 = vld [vmem:[#allocation9 + $0x74] ss:$8 sps:$4 sm:$0xff]   ;;  %v765_v29 = vld [vmem:[#allocation12] sm:$0xff]  ;;  %5083 = vst [vmem:[#allocation30_spill] sm:$0xff] %v4143_v32  ;;  %v4154_v38 = vsub.s32 2, %v4140_v31 }
  0xdf   : > { %2970 = vmatpush3.msra.mxu0 %v778_v10  ;;  %990 = vmatprep.subr.bf16.mxu1 %v3214_v28  ;;  %5084 = vst [vmem:[#allocation31_spill] sm:$0xff] %v4148_v34  ;;  %v636_v35 = vld [vmem:[#allocation6] sm:$0x7]  ;;  %vm675_vm4 = vcmp.lt.s32.totalorder %v4145_v33, 120  ;;  %v637_v44 = vld [vmem:[#allocation6 + $0x4] sm:$0x7] }
  0xe0   : > { %2971 = vmatprep.subr.mxu0 %v5017_v4  ;;  %v666_v36 = vrot.slane %v636_v35, %v4143_v32  ;;  %v660_v37 = vrot.slane %v636_v35, %v4148_v34  ;;  %v681_v46 = vrot.slane %v636_v35, %v4154_v38  ;;  %v703_v52 = vrot.slane %v637_v44, %v4143_v32  ;;  %v638_v5 = vld [vmem:[#allocation6 + $0x8] sm:$0x7]  ;;  %s2844_s25 = sld [smem:[#allocation20 + $0x1]]  ;;  %s3738_s2 = smov 16  }
  0xe1   : > { %2972 = vmatpush3.msra.mxu0 %v777_v12  ;;  %v695_v55 = vrot.slane %v637_v44, %v4148_v34  ;;  %v717_v61 = vrot.slane %v637_v44, %v4154_v38  ;;  %v746_v10 = vrot.slane %v638_v5, %v4143_v32  ;;  %v760_v28 = vrot.slane %v638_v5, %v4154_v38  ;;  %s3739_s10 = smov 112   ;;  %s2845_s21 = sld [smem:[#allocation20 + $0x2]] }
  0xe2   : > { %673 = vrot.lane.b32.xlu1 %v4094_v11, %s3734_s3  ;;  %650 = vrot.lane.b32.xlu0 %v4094_v11, %s3735_s4  ;;  %v667_v42 = vmul.f32 %v666_v36, %v4087_v9  ;;  %v668_v45 = vmul.f32 %v666_v36, %v4094_v11  ;;  %v705_v0 = vmul.f32 %v703_v52, %v4080_v3  ;;  %vm1288_vm5 = vcmp.lt.s32.totalorder %v4145_v33, 16  ;;  %s2824_s20 = sshll.u32 %s4042_s8, 3  ;;  %s5121_s18 = sld [smem:[#allocation56_spill]] }
  0xe3   : > { %2973 = vmatprep.subr.mxu0 %v5017_v4  ;;  %v704_v2 = vmul.f32 %v703_v52, %v4077_v1  ;;  %s865_s6 = sand.u32 2147483647, %s784_s5  ;;  %vm1294_vm6 = vcmp.ge.s32.totalorder %v4145_v33, 16  ;;  %vm1357_vm7 = vcmp.lt.s32.totalorder %v4145_v33, 112  ;;  %vm2353_vm9 = vcmask 130048   ;;  %s2891_s24 = sshll.u32 %s3837_s19, 7 }
  0xe4   : > { %2974 = vmatpush3.msra.mxu0 %v776_v13  ;;  %s630_s26 = scalar_lea.vmem [#allocation21], %s2824_s20  ;;  %p5123_p3 = scmp.ne.s32.totalorder %s5066_s14, 0 }
  0xe5   : > { %2975 = vmatprep.subr.mxu0 %v5017_v4 }
  0xe6   : > { %688 = vrot.lane.b32.xlu1 %v4080_v3, %s3735_s4  ;;  %686 = vrot.lane.b32.xlu0 %v4077_v1, %s3735_s4  ;;  %s1194_s17 = sand.u32 2147483647, %s2844_s25  ;;  %s2624_s25 = sshll.u32 %s630_s26, 4  ;;  %s2625_s25 = int_to_ptr.vmem [resolvable:$true] %s2624_s25 }
  0xe7   : > { %2976 = vmatpush3.msra.mxu0 %v775_v14 }
  0xe8   : > { %2977 = vmatprep.subr.mxu0 %v5017_v4 }
  0xe9   : > { %2978 = vmatpush3.msra.mxu0 %v774_v17 }
  0xea   : > { %710 = vrot.lane.b32.xlu1 %v4080_v3, %s3734_s3  ;;  %708 = vrot.lane.b32.xlu0 %v4077_v1, %s3734_s3  ;;  %v738_v3 = vrot.slane %v638_v5, %v4148_v34  ;;  %v3228_v5 = vld [vmem:[#allocation9 + $0x30] ss:$8 sps:$4 sm:$0xff]  }
  0xeb   : > { %2979 = vmatprep.subr.mxu0 %v5017_v4 }
  0xec   : > { %2980 = vmatpush3.msra.mxu0 %v773_v18 }
  0xed   : > { %2981 = vmatprep.subr.mxu0 %v5017_v4 }
  0xee   : > { %731 = vrot.lane.b32.xlu1 %v4116_v19, %s3735_s4  ;;  %729 = vrot.lane.b32.xlu0 %v4119_v20, %s3735_s4 }
  0xef   : > { %2982 = vmatpush3.msra.mxu0 %v772_v21 }
  0xf0   : > { %2983 = vmatprep.subr.mxu0 %v5017_v4 }
  0xf1   : > { %2984 = vmatpush3.msra.mxu0 %v771_v22  ;;  %v748_v22 = vmul.f32 %v746_v10, %v4116_v19 }
  0xf2   : > { %753 = vrot.lane.b32.xlu1 %v4116_v19, %s3734_s3  ;;  %751 = vrot.lane.b32.xlu0 %v4119_v20, %s3734_s3  ;;  %s1726_s3 = sand.u32 2147483647, %s2845_s21 }
  0xf3   : > { %2985 = vmatprep.subr.mxu0 %v5017_v4 }
  0xf4   : > { %2986 = vmatpush3.msra.mxu0 %v770_v23 }
  0xf5   : > { %2987 = vmatprep.subr.mxu0 %v5017_v4 }
  0xf6   : > { %2988 = vmatpush3.msra.mxu0 %v769_v24 }
  0xf7   : > { %2989 = vmatprep.subr.mxu0 %v5017_v4 }
  0xf8   : > { %2990 = vmatpush3.msra.mxu0 %v768_v25  ;;  %v747_v25 = vmul.f32 %v746_v10, %v4119_v20  ;;  %v3235_v10 = vld [vmem:[#allocation9 + $0x4] ss:$8 sps:$4 sm:$0xff]  }
  0xf9   : > { %2991 = vmatprep.subr.mxu0 %v5017_v4 }
  0xfa   : > { %2992 = vmatpush3.msra.mxu0 %v767_v26 }
  0xfb   : > { %2993 = vmatprep.subr.mxu0 %v5017_v4 }
  0xfc   : > { %2994 = vmatpush3.msra.mxu0 %v766_v27 }
  0xfd   : > { %2995 = vmatprep.subr.mxu0 %v5017_v4 }
  0xfe   : > { %2996 = vmatpush3.msra.mxu0 %v765_v29 }
 0x150   : > { %v672_v39 = vpop.permute.xlu1 %671  ;;  %v649_v40 = vpop.permute.xlu0 %648 }
 0x151   : > { %v655_v41 = vsel %vm654_vm3, %v649_v40, 0.0  ;;  %v676_v49 = vsel %vm675_vm4, %v672_v39, 0.0 }
 0x152   : > { %v661_v43 = vmul.f32 %v660_v37, %v655_v41  ;;  %v682_v56 = vmul.f32 %v681_v46, %v676_v49 }
 0x154   : > { %v674_v47 = vpop.permute.xlu1 %673  ;;  %v651_v48 = vpop.permute.xlu0 %650  ;;  %v669_v53 = vadd.f32 %v667_v42, %v661_v43 }
 0x155   : > { %v677_v50 = vsel %vm675_vm4, %v674_v47, 0.0  ;;  %v656_v51 = vsel %vm654_vm3, %v651_v48, 0.0 }
 0x156   : > { %v662_v54 = vmul.f32 %v660_v37, %v656_v51  ;;  %v683_v57 = vmul.f32 %v681_v46, %v677_v50  ;;  %v684_v8 = vadd.f32 %v682_v56, %v669_v53 }
 0x158   : > { %v670_v58 = vadd.f32 %v668_v45, %v662_v54  ;;  %v689_v59 = vpop.permute.xlu1 %688  ;;  %v687_v60 = vpop.permute.xlu0 %686 }
 0x159   : > { %v691_v62 = vsel %vm654_vm3, %v689_v59, 0.0  ;;  %v690_v63 = vsel %vm654_vm3, %v687_v60, 0.0  ;;  %v3219_v59 = vld [vmem:[#allocation9 + $0x60] ss:$8 sps:$4 sm:$0xff]   ;;  %v3220_v60 = vld [vmem:[#allocation9 + $0x54] ss:$8 sps:$4 sm:$0xff]  }
 0x15a   : > { %v685_v6 = vadd.f32 %v683_v57, %v670_v58  ;;  %v697_v7 = vmul.f32 %v695_v55, %v691_v62  ;;  %v696_v9 = vmul.f32 %v695_v55, %v690_v63  ;;  %v3216_v57 = vld [vmem:[#allocation9 + $0x70] ss:$8 sps:$4 sm:$0xff]   ;;  %v3217_v58 = vld [vmem:[#allocation9 + $0x64] ss:$8 sps:$4 sm:$0xff]   ;;  %v3225_v63 = vld [vmem:[#allocation9 + $0x40] ss:$8 sps:$4 sm:$0xff]  }
 0x15b   : > { %991 = vmatpush1.bf16.msra.mxu1 %v3216_v57  ;;  %v3223_v62 = vld [vmem:[#allocation9 + $0x44] ss:$8 sps:$4 sm:$0xff]  }
 0x15c   : > { %v699_v11 = vadd.f32 %v697_v7, %v685_v6  ;;  %v698_v12 = vadd.f32 %v696_v9, %v684_v8  ;;  %v711_v13 = vpop.permute.xlu1 %710  ;;  %v709_v14 = vpop.permute.xlu0 %708  ;;  %992 = vmatprep.subr.bf16.mxu1 %v3217_v58  ;;  %v3229_v6 = vld [vmem:[#allocation9 + $0x24] ss:$8 sps:$4 sm:$0xff]   ;;  %v3231_v7 = vld [vmem:[#allocation9 + $0x20] ss:$8 sps:$4 sm:$0xff]   ;;  %v3232_v8 = vld [vmem:[#allocation9 + $0x14] ss:$8 sps:$4 sm:$0xff]   ;;  %v866_v58 = vstv %s865_s6 }
 0x15d   : > { %v713_v15 = vsel %vm675_vm4, %v711_v13, 0.0  ;;  %v712_v16 = vsel %vm675_vm4, %v709_v14, 0.0  ;;  %v3234_v9 = vld [vmem:[#allocation9 + $0x10] ss:$8 sps:$4 sm:$0xff]   ;;  %v4206_v14 = vld [vmem:[#allocation14 + $0xe8] sm:$0xff] }
 0x15e   : > { %v707_v1 = vadd.f32 %v705_v0, %v699_v11  ;;  %v719_v17 = vmul.f32 %v717_v61, %v713_v15  ;;  %v706_v18 = vadd.f32 %v704_v2, %v698_v12  ;;  %v718_v21 = vmul.f32 %v717_v61, %v712_v16  ;;  %v3222_v61 = vld [vmem:[#allocation9 + $0x50] ss:$8 sps:$4 sm:$0xff]   ;;  %v3226_v0 = vld [vmem:[#allocation9 + $0x34] ss:$8 sps:$4 sm:$0xff]   ;;  %v3237_v11 = vld [vmem:[#allocation9] ss:$8 sps:$4 sm:$0xff]  }
 0x15f   : > { %993 = vmatpush1.bf16.msra.mxu1 %v3219_v59  ;;  %v3737_v2 = vmov 0   ;;  %v4202_v12 = vld [vmem:[#allocation14 + $0xf8] sm:$0xff]  ;;  %v4204_v13 = vld [vmem:[#allocation14 + $0xf0] sm:$0xff]  ;;  %v4209_v15 = vld [vmem:[#allocation14 + $0xe0] sm:$0xff] }
 0x160   : > { %v732_v23 = vpop.permute.xlu1 %731  ;;  %v730_v24 = vpop.permute.xlu0 %729  ;;  %v721_v29 = vadd.f32 %v719_v17, %v707_v1  ;;  %v720_v30 = vadd.f32 %v718_v21, %v706_v18  ;;  %994 = vmatprep.subr.bf16.mxu1 %v3220_v60  ;;  %1022 = vmatprep.mubr.bf16.mxu1 %v3737_v2  ;;  %v4213_v16 = vld [vmem:[#allocation14 + $0xd8] sm:$0xff]  ;;  %v4219_v1 = vld [vmem:[#allocation14 + $0xc8] sm:$0xff]  ;;  %v4222_v17 = vld [vmem:[#allocation14 + $0xc0] sm:$0xff] }
 0x161   : > { %v734_v26 = vsel %vm654_vm3, %v732_v23, 0.0  ;;  %v733_v27 = vsel %vm654_vm3, %v730_v24, 0.0  ;;  %1121 = vmatprep.subr.mxu0 %v4202_v12  ;;  %v4225_v18 = vld [vmem:[#allocation14 + $0xb8] sm:$0xff]  ;;  %v4228_v21 = vld [vmem:[#allocation14 + $0xb0] sm:$0xff]  ;;  %v4234_v23 = vld [vmem:[#allocation14 + $0xa0] sm:$0xff] }
 0x162   : > { %v740_v35 = vmul.f32 %v738_v3, %v734_v26  ;;  %v739_v36 = vmul.f32 %v738_v3, %v733_v27  ;;  %v4216_v3 = vld [vmem:[#allocation14 + $0xd0] sm:$0xff]  ;;  %v4237_v24 = vld [vmem:[#allocation14 + $0x98] sm:$0xff]  ;;  %v4243_v26 = vld [vmem:[#allocation14 + $0x88] sm:$0xff] }
 0x163   : > { %995 = vmatpush1.bf16.msra.mxu1 %v3222_v61  ;;  %v4246_v27 = vld [vmem:[#allocation14 + $0x80] sm:$0xff] }
 0x164   : > { %v742_v37 = vadd.f32 %v740_v35, %v721_v29  ;;  %v741_v39 = vadd.f32 %v739_v36, %v720_v30  ;;  %v754_v40 = vpop.permute.xlu1 %753  ;;  %v752_v19 = vpop.permute.xlu0 %751  ;;  %996 = vmatprep.subr.bf16.mxu1 %v3223_v62  ;;  %v4252_v29 = vld [vmem:[#allocation14 + $0x70] sm:$0xff]  ;;  %v4255_v30 = vld [vmem:[#allocation14 + $0x68] sm:$0xff]  ;;  %v4258_v35 = vld [vmem:[#allocation14 + $0x60] sm:$0xff] }
 0x165   : > { %v756_v41 = vsel %vm675_vm4, %v754_v40, 0.0  ;;  %v755_v20 = vsel %vm675_vm4, %v752_v19, 0.0  ;;  %v4261_v36 = vld [vmem:[#allocation14 + $0x58] sm:$0xff]  ;;  %v4270_v40 = vld [vmem:[#allocation14 + $0x40] sm:$0xff] }
 0x166   : > { %v750_v42 = vadd.f32 %v748_v22, %v742_v37  ;;  %v762_v43 = vmul.f32 %v760_v28, %v756_v41  ;;  %v749_v44 = vadd.f32 %v747_v25, %v741_v39  ;;  %v761_v45 = vmul.f32 %v760_v28, %v755_v20  ;;  %v4231_v22 = vld [vmem:[#allocation14 + $0xa8] sm:$0xff]  ;;  %v4240_v25 = vld [vmem:[#allocation14 + $0x90] sm:$0xff]  ;;  %v4249_v28 = vld [vmem:[#allocation14 + $0x78] sm:$0xff] }
 0x167   : > { %997 = vmatpush1.bf16.msra.mxu1 %v3225_v63  ;;  %v4264_v37 = vld [vmem:[#allocation14 + $0x50] sm:$0xff]  ;;  %v4267_v39 = vld [vmem:[#allocation14 + $0x48] sm:$0xff]  ;;  %v4273_v19 = vld [vmem:[#allocation14 + $0x38] sm:$0xff] }
 0x168   : > { %v4194_v46 = vadd.f32 %v762_v43, %v750_v42  ;;  %v4196_v47 = vadd.f32 %v761_v45, %v749_v44  ;;  %998 = vmatprep.subr.bf16.mxu1 %v3226_v0  ;;  %v4276_v41 = vld [vmem:[#allocation14 + $0x30] sm:$0xff]  ;;  %v4279_v20 = vld [vmem:[#allocation14 + $0x28] sm:$0xff]  ;;  %v4282_v42 = vld [vmem:[#allocation14 + $0x20] sm:$0xff] }
 0x169   : > { %v4285_v43 = vld [vmem:[#allocation14 + $0x18] sm:$0xff]  ;;  %v4288_v44 = vld [vmem:[#allocation14 + $0x10] sm:$0xff]  ;;  %v4291_v45 = vld [vmem:[#allocation14 + $0x8] sm:$0xff] }
 0x16a   : > { %v786_v48 = vmul.f32 %v4194_v46, %v4194_v46  ;;  %v785_v49 = vmul.f32 %v4196_v47, %v4196_v47  ;;  %v2825_v0 = vld [vmem:[%s4998_s7] ss:$0 sm:$0xff] }
 0x16b   : > { %999 = vmatpush1.bf16.msra.mxu1 %v3228_v5 }
 0x16c   : > { %v787_v50 = vadd.f32 %v786_v48, %v785_v49  ;;  %1000 = vmatprep.subr.bf16.mxu1 %v3229_v6  ;;  %v4294_v48 = vld [vmem:[#allocation14] sm:$0xff]  ;;  %v4297_v49 = vld [vmem:[#allocation14 + $0x1f8] sm:$0xff] }
 0x16d   : > { %v2826_v6 = vld [vmem:[%s4998_s7 + $0x1] ss:$0 sm:$0xff] }
 0x16e   : > { %v788_v51 = vrot.slane %v787_v50, 4 }
 0x16f   : > { %1001 = vmatpush1.bf16.msra.mxu1 %v3231_v7 }
 0x170   : > { %v789_v52 = vadd.f32 %v788_v51, %v787_v50  ;;  %1002 = vmatprep.subr.bf16.mxu1 %v3232_v8  ;;  %v4300_v50 = vld [vmem:[#allocation14 + $0x1f0] sm:$0xff]  ;;  %v4303_v51 = vld [vmem:[#allocation14 + $0x1e8] sm:$0xff] }
 0x172   : > { %v790_v53 = vrot.slane %v789_v52, 2 }
 0x173   : > { %1003 = vmatpush1.bf16.msra.mxu1 %v3234_v9  ;;  %v2827_v9 = vld [vmem:[%s4998_s7 + $0x2] ss:$0 sm:$0xff] }
 0x174   : > { %v791_v54 = vadd.f32 %v790_v53, %v789_v52  ;;  %1004 = vmatprep.subr.bf16.mxu1 %v3235_v10  ;;  %v4306_v52 = vld [vmem:[#allocation14 + $0x1e0] sm:$0xff]  ;;  %v4309_v53 = vld [vmem:[#allocation14 + $0x1d8] sm:$0xff] }
 0x176   : > { %v792_v55 = vrot.slane %v791_v54, 1 }
 0x177   : > { %1005 = vmatpush1.bf16.msra.mxu1 %v3237_v11 }
 0x178   : > { %v793_v56 = vadd.f32 %v792_v55, %v791_v54  ;;  %1653 = vmatprep.subr.mxu1 %v4202_v12  ;;  %v4312_v54 = vld [vmem:[#allocation14 + $0x1d0] sm:$0xff]  ;;  %v4315_v55 = vld [vmem:[#allocation14 + $0x1c8] sm:$0xff] }
 0x17a   : > { %2998 = vmatmul.mubr.f32.vlgmr.msra.gmra.mxu0 %v793_v56  ;;  %v4318_v56 = vld [vmem:[#allocation14 + $0x1c0] sm:$0xff] }
 0x17b   : > { %1122 = vmatpush1.msra.mxu0 %v4204_v13 }
 0x17c   : > { %1123 = vmatprep.subr.mxu0 %v4206_v14 }
 0x17d   : > { %1124 = vmatpush1.msra.mxu0 %v4209_v15 }
 0x17e   : > { %1125 = vmatprep.subr.mxu0 %v4213_v16 }
 0x17f   : > { %1126 = vmatpush1.msra.mxu0 %v4216_v3 }
 0x180   : > { %1127 = vmatprep.subr.mxu0 %v4219_v1 }
 0x181   : > { %1128 = vmatpush1.msra.mxu0 %v4222_v17 }
 0x182   : > { %1129 = vmatprep.subr.mxu0 %v4225_v18 }
 0x183   : > { %1130 = vmatpush1.msra.mxu0 %v4228_v21 }
 0x184   : > { %1131 = vmatprep.subr.mxu0 %v4231_v22 }
 0x185   : > { %1132 = vmatpush1.msra.mxu0 %v4234_v23 }
 0x186   : > { %1133 = vmatprep.subr.mxu0 %v4237_v24 }
 0x187   : > { %1134 = vmatpush1.msra.mxu0 %v4240_v25 }
 0x188   : > { %1135 = vmatprep.subr.mxu0 %v4243_v26 }
 0x189   : > { %1136 = vmatpush1.msra.mxu0 %v4246_v27 }
 0x18a   : > { %1137 = vmatprep.subr.mxu0 %v4249_v28 }
 0x18b   : > { %1138 = vmatpush1.msra.mxu0 %v4252_v29 }
 0x18c   : > { %1139 = vmatprep.subr.mxu0 %v4255_v30 }
 0x18d   : > { %1140 = vmatpush1.msra.mxu0 %v4258_v35 }
 0x18e   : > { %1141 = vmatprep.subr.mxu0 %v4261_v36 }
 0x18f   : > { %1142 = vmatpush1.msra.mxu0 %v4264_v37 }
 0x190   : > { %1143 = vmatprep.subr.mxu0 %v4267_v39 }
 0x191   : > { %1144 = vmatpush1.msra.mxu0 %v4270_v40 }
 0x192   : > { %1145 = vmatprep.subr.mxu0 %v4273_v19 }
 0x193   : > { %1146 = vmatpush1.msra.mxu0 %v4276_v41 }
 0x194   : > { %1147 = vmatprep.subr.mxu0 %v4279_v20 }
 0x195   : > { %1148 = vmatpush1.msra.mxu0 %v4282_v42 }
 0x196   : > { %1149 = vmatprep.subr.mxu0 %v4285_v43 }
 0x197   : > { %1150 = vmatpush1.msra.mxu0 %v4288_v44 }
 0x198   : > { %1151 = vmatprep.subr.mxu0 %v4291_v45 }
 0x199   : > { %1152 = vmatpush1.msra.mxu0 %v4294_v48 }
 0x19a   : > { %1153 = vmatprep.subr.mxu0 %v4297_v49 }
 0x19b   : > { %1154 = vmatpush2.msra.mxu0 %v4300_v50 }
 0x19c   : > { %1155 = vmatprep.subr.mxu0 %v4303_v51 }
 0x19d   : > { %1156 = vmatpush2.msra.mxu0 %v4306_v52 }
 0x19e   : > { %1157 = vmatprep.subr.mxu0 %v4309_v53 }
 0x19f   : > { %1158 = vmatpush2.msra.mxu0 %v4312_v54 }
 0x1a0   : > { %1159 = vmatprep.subr.mxu0 %v4315_v55 }
 0x1a1   : > { %1160 = vmatpush2.msra.mxu0 %v4318_v56 }
 0x23a   : > { %v860_v57 = vpop.f32.mrf.mxu0 }
 0x23b   : > { %v864_v59 = vmul.f32 0.00390625, %v860_v57 }
 0x23c   : > { %v2999_v60 = vpop.f32.mrf.mxu0 }
 0x23d   : > { %v867_v61 = vadd.f32 %v866_v58, %v864_v59 }
 0x23f   : > { %3294 = vrsqrt.f32 %v867_v61 }
 0x24c   : > { %v3295_v62 = vpop.eup %3294 }
 0x24d   : > { %v872_v63 = vrot.slane %v3295_v62, %v4148_v34 }
 0x24f   : > { %v873_v2 = vmul.f32 %v872_v63, %v4196_v47  ;;  %v874_v5 = vmul.f32 %v872_v63, %v4194_v46  ;;  %v4374_v46 = vld [vmem:[#allocation14 + $0x1b8] sm:$0xff]  ;;  %v4377_v47 = vld [vmem:[#allocation14 + $0x1b0] sm:$0xff] }
 0x250   : > { %1161 = vmatprep.subr.mxu0 %v4374_v46 }
 0x251   : > { %v879_v7 = vmul.f32 %v2825_v0, %v873_v2  ;;  %v880_v8 = vmul.f32 %v2825_v0, %v874_v5  ;;  %1162 = vmatpush2.msra.mxu0 %v4377_v47  ;;  %v1195_v2 = vstv %s1194_s17 }
 0x253   : > { %v885_v10 = vadd.f32 %v2826_v6, %v879_v7  ;;  %v886_v11 = vadd.f32 %v2826_v6, %v880_v8 }
 0x255   : > { %v891_v57 = vmax.f32 %v885_v10, %v2827_v9  ;;  %v892_v58 = vmax.f32 %v886_v11, %v2827_v9  ;;  %v1097_v10 = vld [vmem:[#allocation15] ss:$4 sm:$0x3]  ;;  %v1099_v11 = vld [vmem:[#allocation15 + $0x1] ss:$4 sm:$0x3] }
 0x257   : > { %v893_v59 = vpack.c.bf16 %v892_v58, %v891_v57 }
 0x259   : > { %1023 = vmatmul.mubr.bf16.vlgmr.msra.gmra.mxu1 %v893_v59  ;;  %v1101_v59 = vld [vmem:[#allocation15 + $0x2] ss:$4 sm:$0x3] }
 0x25a   : > { %1654 = vmatpush1.msra.mxu1 %v4204_v13  ;;  %v4381_v13 = vld [vmem:[#allocation14 + $0x1a8] sm:$0xff] }
 0x25b   : > { %1655 = vmatprep.subr.mxu1 %v4206_v14  ;;  %1163 = vmatprep.subr.mxu0 %v4381_v13  ;;  %v4385_v14 = vld [vmem:[#allocation14 + $0x1a0] sm:$0xff] }
 0x25c   : > { %1656 = vmatpush1.msra.mxu1 %v4209_v15  ;;  %1164 = vmatpush2.msra.mxu0 %v4385_v14  ;;  %v4389_v15 = vld [vmem:[#allocation14 + $0x198] sm:$0xff] }
 0x25d   : > { %1657 = vmatprep.subr.mxu1 %v4213_v16  ;;  %1165 = vmatprep.subr.mxu0 %v4389_v15  ;;  %v4393_v16 = vld [vmem:[#allocation14 + $0x190] sm:$0xff] }
 0x25e   : > { %1658 = vmatpush1.msra.mxu1 %v4216_v3  ;;  %1166 = vmatpush2.msra.mxu0 %v4393_v16  ;;  %v4397_v3 = vld [vmem:[#allocation14 + $0x188] sm:$0xff] }
 0x25f   : > { %1659 = vmatprep.subr.mxu1 %v4219_v1  ;;  %1167 = vmatprep.subr.mxu0 %v4397_v3  ;;  %v4401_v1 = vld [vmem:[#allocation14 + $0x180] sm:$0xff] }
 0x260   : > { %1660 = vmatpush1.msra.mxu1 %v4222_v17  ;;  %1168 = vmatpush2.msra.mxu0 %v4401_v1  ;;  %v4405_v17 = vld [vmem:[#allocation14 + $0x178] sm:$0xff] }
 0x261   : > { %1661 = vmatprep.subr.mxu1 %v4225_v18  ;;  %5085 = vst [vmem:[#allocation32_spill] sm:$0xff] %v4405_v17  ;;  %1169 = vmatprep.subr.mxu0 %v4405_v17  ;;  %v4409_v18 = vld [vmem:[#allocation14 + $0x170] sm:$0xff] }
 0x262   : > { %1662 = vmatpush1.msra.mxu1 %v4228_v21  ;;  %5086 = vst [vmem:[#allocation33_spill] sm:$0xff] %v4409_v18  ;;  %1170 = vmatpush2.msra.mxu0 %v4409_v18  ;;  %v4413_v21 = vld [vmem:[#allocation14 + $0x168] sm:$0xff] }
 0x263   : > { %1663 = vmatprep.subr.mxu1 %v4231_v22  ;;  %5087 = vst [vmem:[#allocation34_spill] sm:$0xff] %v4413_v21  ;;  %1171 = vmatprep.subr.mxu0 %v4413_v21  ;;  %v4417_v22 = vld [vmem:[#allocation14 + $0x160] sm:$0xff] }
 0x264   : > { %1664 = vmatpush1.msra.mxu1 %v4234_v23  ;;  %5088 = vst [vmem:[#allocation35_spill] sm:$0xff] %v4417_v22  ;;  %1172 = vmatpush2.msra.mxu0 %v4417_v22  ;;  %v4421_v23 = vld [vmem:[#allocation14 + $0x158] sm:$0xff] }
 0x265   : > { %1665 = vmatprep.subr.mxu1 %v4237_v24  ;;  %5089 = vst [vmem:[#allocation36_spill] sm:$0xff] %v4421_v23  ;;  %1173 = vmatprep.subr.mxu0 %v4421_v23  ;;  %v4425_v24 = vld [vmem:[#allocation14 + $0x150] sm:$0xff] }
 0x266   : > { %1666 = vmatpush1.msra.mxu1 %v4240_v25  ;;  %5090 = vst [vmem:[#allocation37_spill] sm:$0xff] %v4425_v24  ;;  %1174 = vmatpush2.msra.mxu0 %v4425_v24  ;;  %v4429_v25 = vld [vmem:[#allocation14 + $0x148] sm:$0xff] }
 0x267   : > { %1667 = vmatprep.subr.mxu1 %v4243_v26  ;;  %5091 = vst [vmem:[#allocation38_spill] sm:$0xff] %v4429_v25  ;;  %1175 = vmatprep.subr.mxu0 %v4429_v25  ;;  %v4433_v26 = vld [vmem:[#allocation14 + $0x140] sm:$0xff] }
 0x268   : > { %1668 = vmatpush1.msra.mxu1 %v4246_v27  ;;  %5092 = vst [vmem:[#allocation39_spill] sm:$0xff] %v4433_v26  ;;  %1176 = vmatpush2.msra.mxu0 %v4433_v26  ;;  %v4437_v27 = vld [vmem:[#allocation14 + $0x138] sm:$0xff] }
 0x269   : > { %1669 = vmatprep.subr.mxu1 %v4249_v28  ;;  %5093 = vst [vmem:[#allocation40_spill] sm:$0xff] %v4437_v27  ;;  %v4439_v28 = vld [vmem:[#allocation14 + $0x130] sm:$0xff]  ;;  %1177 = vmatprep.subr.mxu0 %v4437_v27 }
 0x26a   : > { %1670 = vmatpush1.msra.mxu1 %v4252_v29  ;;  %5094 = vst [vmem:[#allocation41_spill] sm:$0xff] %v4439_v28  ;;  %v4441_v29 = vld [vmem:[#allocation14 + $0x128] sm:$0xff]  ;;  %1178 = vmatpush2.msra.mxu0 %v4439_v28 }
 0x26b   : > { %1671 = vmatprep.subr.mxu1 %v4255_v30  ;;  %5095 = vst [vmem:[#allocation42_spill] sm:$0xff] %v4441_v29  ;;  %v4445_v30 = vld [vmem:[#allocation14 + $0x120] sm:$0xff]  ;;  %1179 = vmatprep.subr.mxu0 %v4441_v29 }
 0x26c   : > { %1672 = vmatpush1.msra.mxu1 %v4258_v35  ;;  %5096 = vst [vmem:[#allocation43_spill] sm:$0xff] %v4445_v30  ;;  %v4449_v35 = vld [vmem:[#allocation14 + $0x118] sm:$0xff]  ;;  %1180 = vmatpush2.msra.mxu0 %v4445_v30 }
 0x26d   : > { %1673 = vmatprep.subr.mxu1 %v4261_v36  ;;  %5097 = vst [vmem:[#allocation44_spill] sm:$0xff] %v4449_v35  ;;  %v4453_v36 = vld [vmem:[#allocation14 + $0x110] sm:$0xff]  ;;  %1181 = vmatprep.subr.mxu0 %v4449_v35 }
 0x26e   : > { %1674 = vmatpush1.msra.mxu1 %v4264_v37  ;;  %5098 = vst [vmem:[#allocation45_spill] sm:$0xff] %v4453_v36  ;;  %v4457_v37 = vld [vmem:[#allocation14 + $0x108] sm:$0xff]  ;;  %1182 = vmatpush2.msra.mxu0 %v4453_v36 }
 0x26f   : > { %1675 = vmatprep.subr.mxu1 %v4267_v39  ;;  %5099 = vst [vmem:[#allocation46_spill] sm:$0xff] %v4457_v37  ;;  %v4461_v39 = vld [vmem:[#allocation14 + $0x100] sm:$0xff]  ;;  %1183 = vmatprep.subr.mxu0 %v4457_v37 }
 0x270   : > { %1676 = vmatpush1.msra.mxu1 %v4270_v40  ;;  %5100 = vst [vmem:[#allocation47_spill] sm:$0xff] %v4461_v39  ;;  %1184 = vmatpush2.msra.mxu0 %v4461_v39 }
 0x271   : > { %1677 = vmatprep.subr.mxu1 %v4273_v19 }
 0x272   : > { %1678 = vmatpush1.msra.mxu1 %v4276_v41 }
 0x273   : > { %1679 = vmatprep.subr.mxu1 %v4279_v20 }
 0x274   : > { %1680 = vmatpush1.msra.mxu1 %v4282_v42 }
 0x275   : > { %1681 = vmatprep.subr.mxu1 %v4285_v43 }
 0x276   : > { %1682 = vmatpush1.msra.mxu1 %v4288_v44 }
 0x277   : > { %1683 = vmatprep.subr.mxu1 %v4291_v45 }
 0x278   : > { %1684 = vmatpush1.msra.mxu1 %v4294_v48 }
 0x279   : > { %1685 = vmatprep.subr.mxu1 %v4297_v49 }
 0x27a   : > { %1686 = vmatpush2.msra.mxu1 %v4300_v50 }
 0x27b   : > { %1687 = vmatprep.subr.mxu1 %v4303_v51 }
 0x27c   : > { %1688 = vmatpush2.msra.mxu1 %v4306_v52 }
 0x27d   : > { %1689 = vmatprep.subr.mxu1 %v4309_v53 }
 0x27e   : > { %1690 = vmatpush2.msra.mxu1 %v4312_v54 }
 0x27f   : > { %1691 = vmatprep.subr.mxu1 %v4315_v55 }
 0x280   : > { %1692 = vmatpush2.msra.mxu1 %v4318_v56 }
 0x281   : > { %1693 = vmatprep.subr.mxu1 %v4374_v46 }
 0x282   : > { %1694 = vmatpush2.msra.mxu1 %v4377_v47 }
 0x283   : > { %1695 = vmatprep.subr.mxu1 %v4381_v13 }
 0x284   : > { %1696 = vmatpush2.msra.mxu1 %v4385_v14 }
 0x285   : > { %1697 = vmatprep.subr.mxu1 %v4389_v15 }
 0x286   : > { %1698 = vmatpush2.msra.mxu1 %v4393_v16 }
 0x287   : > { %1699 = vmatprep.subr.mxu1 %v4397_v3 }
 0x288   : > { %1700 = vmatpush2.msra.mxu1 %v4401_v1 }
 0x289   : > { %1701 = vmatprep.subr.mxu1 %v4405_v17 }
 0x28a   : > { %1702 = vmatpush2.msra.mxu1 %v4409_v18 }
 0x28b   : > { %1703 = vmatprep.subr.mxu1 %v4413_v21 }
 0x28c   : > { %1704 = vmatpush2.msra.mxu1 %v4417_v22 }
 0x28d   : > { %1705 = vmatprep.subr.mxu1 %v4421_v23 }
 0x28e   : > { %1706 = vmatpush2.msra.mxu1 %v4425_v24 }
 0x28f   : > { %1707 = vmatprep.subr.mxu1 %v4429_v25 }
 0x290   : > { %1708 = vmatpush2.msra.mxu1 %v4433_v26 }
 0x291   : > { %1709 = vmatprep.subr.mxu1 %v4437_v27 }
 0x292   : > { %1710 = vmatpush2.msra.mxu1 %v4439_v28 }
 0x293   : > { %1711 = vmatprep.subr.mxu1 %v4441_v29 }
 0x294   : > { %1712 = vmatpush2.msra.mxu1 %v4445_v30 }
 0x295   : > { %1713 = vmatprep.subr.mxu1 %v4449_v35 }
 0x296   : > { %1714 = vmatpush2.msra.mxu1 %v4453_v36 }
 0x297   : > { %1715 = vmatprep.subr.mxu1 %v4457_v37 }
 0x298   : > { %1716 = vmatpush2.msra.mxu1 %v4461_v39 }
 0x299   : > { %2051 = vmatprep.subr.mxu1 %v4202_v12 }
 0x319   : > { %v1024_v40 = vpop.f32.mrf.mxu1 }
 0x31a   : > { %v1103_v20 = vmul.f32 %v1024_v40, %v1024_v40 }
 0x31b   : > { %v1026_v19 = vpop.f32.mrf.mxu1 }
 0x31c   : > { %v1104_v44 = vmul.f32 %v1026_v19, %v1026_v19 }
 0x31d   : > { %v1028_v41 = vpop.f32.mrf.mxu1 }
 0x31e   : > { %v1105_v42 = vmul.f32 %v1028_v41, %v1028_v41 }
 0x31f   : > { %v1030_v43 = vpop.f32.mrf.mxu1 }
 0x320   : > { %v1107_v45 = vadd.f32 %v1105_v42, %v1103_v20  ;;  %v1106_v48 = vmul.f32 %v1030_v43, %v1030_v43  ;;  %v1216_v20 = vrot.slane %v1097_v10, %v4148_v34 }
 0x322   : > { %v1108_v49 = vrot.slane %v1107_v45, 4  ;;  %v1114_v50 = vadd.f32 %v1106_v48, %v1104_v44  ;;  %v1231_v44 = vrot.slane %v1099_v11, %v4148_v34 }
 0x324   : > { %v1109_v51 = vadd.f32 %v1108_v49, %v1107_v45  ;;  %v1115_v52 = vrot.slane %v1114_v50, 4 }
 0x326   : > { %v1110_v53 = vrot.slane %v1109_v51, 2  ;;  %v1116_v54 = vadd.f32 %v1115_v52, %v1114_v50  ;;  %v1220_v50 = vrot.slane %v1097_v10, %v4143_v32 }
 0x328   : > { %v1111_v55 = vadd.f32 %v1110_v53, %v1109_v51  ;;  %v1117_v56 = vrot.slane %v1116_v54, 2  ;;  %v1246_v51 = vrot.slane %v1101_v59, %v4148_v34 }
 0x32a   : > { %v1118_v60 = vadd.f32 %v1117_v56, %v1116_v54  ;;  %v1112_v61 = vrot.slane %v1111_v55, 1  ;;  %v1235_v56 = vrot.slane %v1099_v11, %v4143_v32 }
 0x32c   : > { %v1119_v12 = vrot.slane %v1118_v60, 1  ;;  %v1113_v63 = vadd.f32 %v1112_v61, %v1111_v55 }
 0x32e   : > { %v1120_v62 = vadd.f32 %v1119_v12, %v1118_v60 }
 0x330   : > { %1185 = vmatprep.mubr.f32.mxu0 %v1120_v62 }
 0x331   : > { %1186 = vmatmul.mubr.f32.vlgmr.msra.gmra.mxu0 %v1113_v63 }
 0x3f1   : > { %v1187_v0 = vpop.f32.mrf.mxu0 }
 0x3f2   : > { %v1192_v5 = vmul.f32 0.00390625, %v1187_v0 }
 0x3f3   : > { %v1189_v6 = vpop.f32.mrf.mxu0 }
 0x3f4   : > { %v1196_v7 = vadd.f32 %v1195_v2, %v1192_v5  ;;  %v1193_v8 = vmul.f32 0.00390625, %v1189_v6 }
 0x3f6   : > { %3296 = vrsqrt.f32 %v1196_v7  ;;  %v1197_v9 = vadd.f32 %v1195_v2, %v1193_v8  ;;  %v1250_v2 = vrot.slane %v1101_v59, %v4143_v32 }
 0x3f8   : > { %3298 = vrsqrt.f32 %v1197_v9 }
 0x403   : > { %v3297_v57 = vpop.eup %3296 }
 0x404   : > { %v1203_v58 = vrot.slane %v3297_v57, %v4148_v34 }
 0x405   : > { %v3299_v42 = vpop.eup %3298 }
 0x406   : > { %v1207_v45 = vrot.slane %v3299_v42, %v4148_v34  ;;  %v1210_v48 = vmul.f32 %v1203_v58, %v1028_v41  ;;  %v1208_v49 = vmul.f32 %v1203_v58, %v1024_v40 }
 0x408   : > { %v1225_v52 = vmul.f32 %v1216_v20, %v1210_v48  ;;  %v1223_v53 = vmul.f32 %v1216_v20, %v1208_v49  ;;  %v1211_v54 = vmul.f32 %v1207_v45, %v1030_v43  ;;  %v1209_v55 = vmul.f32 %v1207_v45, %v1026_v19 }
 0x40a   : > { %v1240_v60 = vadd.f32 %v1231_v44, %v1225_v52  ;;  %v1238_v61 = vadd.f32 %v1231_v44, %v1223_v53  ;;  %v1226_v12 = vmul.f32 %v1220_v50, %v1211_v54  ;;  %v1224_v62 = vmul.f32 %v1220_v50, %v1209_v55  ;;  %v3238_v54 = vld [vmem:[#allocation11 + $0x70] ss:$8 sps:$4 sm:$0xff]   ;;  %v3240_v55 = vld [vmem:[#allocation11 + $0x74] ss:$8 sps:$4 sm:$0xff]  }
 0x40b   : > { %1983 = vmatprep.subr.bf16.mxu0 %v3240_v55  ;;  %v4581_v55 = vld [vmem:[#allocation8 + $0x10] sm:$0x77] }
 0x40c   : > { %v1255_v63 = vmax.f32 %v1240_v60, %v1246_v51  ;;  %v1253_v0 = vmax.f32 %v1238_v61, %v1246_v51  ;;  %v1241_v5 = vadd.f32 %v1235_v56, %v1226_v12  ;;  %v1239_v6 = vadd.f32 %v1235_v56, %v1224_v62  ;;  %v3243_v56 = vld [vmem:[#allocation11 + $0x64] ss:$8 sps:$4 sm:$0xff]   ;;  %1984 = vmatpush1.bf16.msra.mxu0 %v3238_v54  ;;  %v3241_v60 = vld [vmem:[#allocation11 + $0x60] ss:$8 sps:$4 sm:$0xff]   ;;  %v3246_v61 = vld [vmem:[#allocation11 + $0x54] ss:$8 sps:$4 sm:$0xff]  }
 0x40d   : > { %1985 = vmatprep.subr.bf16.mxu0 %v3243_v56  ;;  %v3244_v12 = vld [vmem:[#allocation11 + $0x50] ss:$8 sps:$4 sm:$0xff]   ;;  %v3249_v62 = vld [vmem:[#allocation11 + $0x44] ss:$8 sps:$4 sm:$0xff]  }
 0x40e   : > { %v4479_v41 = vmax.f32 %v1255_v63, 0.0  ;;  %v4481_v40 = vmax.f32 %v1253_v0, 0.0  ;;  %v1256_v19 = vmax.f32 %v1241_v5, %v1250_v2  ;;  %v1254_v43 = vmax.f32 %v1239_v6, %v1250_v2  ;;  %v3247_v63 = vld [vmem:[#allocation11 + $0x40] ss:$8 sps:$4 sm:$0xff]   ;;  %v3252_v0 = vld [vmem:[#allocation11 + $0x34] ss:$8 sps:$4 sm:$0xff]  }
 0x40f   : > { %v3250_v2 = vld [vmem:[#allocation11 + $0x30] ss:$8 sps:$4 sm:$0xff]   ;;  %v3255_v5 = vld [vmem:[#allocation11 + $0x24] ss:$8 sps:$4 sm:$0xff]   ;;  %v3253_v6 = vld [vmem:[#allocation11 + $0x20] ss:$8 sps:$4 sm:$0xff]  }
 0x410   : > { %1396 = vrot.lane.b32.xlu1 %v4479_v41, %s3738_s2  ;;  %1394 = vrot.lane.b32.xlu0 %v4481_v40, %s3738_s2  ;;  %v4491_v7 = vmax.f32 %v1256_v19, 0.0  ;;  %v4493_v8 = vmax.f32 %v1254_v43, 0.0  ;;  %v1268_v9 = vrot.slane %v4481_v40, 7  ;;  %v1270_v10 = vrot.slane %v4479_v41, 7  ;;  %v3258_v19 = vld [vmem:[#allocation11 + $0x14] ss:$8 sps:$4 sm:$0xff]  }
 0x411   : > { %v1506_v58 = vrot.slane %v4479_v41, 1  ;;  %v1505_v59 = vrot.slane %v4481_v40, 1  ;;  %1986 = vmatpush1.bf16.msra.mxu0 %v3241_v60  ;;  %v3256_v43 = vld [vmem:[#allocation11 + $0x10] ss:$8 sps:$4 sm:$0xff]   ;;  %v4579_v54 = vld [vmem:[#allocation8] sm:$0x77] }
 0x412   : > { %v4506_v11 = vsel %vm641_vm0, %v1268_v9, %v1270_v10  ;;  %v4509_v57 = vsel %vm641_vm0, 0.0, %v1268_v9  ;;  %v1269_v44 = vrot.slane %v4493_v8, 7  ;;  %v1272_v45 = vrot.slane %v4491_v7, 7  ;;  %1987 = vmatprep.subr.bf16.mxu0 %v3246_v61  ;;  %v3261_v9 = vld [vmem:[#allocation11 + $0x4] ss:$8 sps:$4 sm:$0xff]  }
 0x413   : > { %v4522_v20 = vsel %vm722_vm1, %v1506_v58, 0.0  ;;  %v4525_v42 = vsel %vm722_vm1, %v1505_v59, %v1506_v58  ;;  %v1508_v50 = vrot.slane %v4493_v8, 1  ;;  %v1509_v51 = vrot.slane %v4491_v7, 1  ;;  %v3259_v10 = vld [vmem:[#allocation11] ss:$8 sps:$4 sm:$0xff]  }
 0x414   : > { %1465 = vrot.lane.b32.xlu1 %v4479_v41, %s3739_s10  ;;  %1463 = vrot.lane.b32.xlu0 %v4481_v40, %s3739_s10  ;;  %v4534_v48 = vsel %vm641_vm0, 0.0, %v1269_v44  ;;  %v4537_v49 = vsel %vm641_vm0, %v1269_v44, %v1272_v45  ;;  %v1262_v56 = vld [vmem:[#allocation8 + $0x8] sm:$0x77]  ;;  %v1329_v60 = vsub.s32 5, %v4140_v31  ;;  %v4585_v61 = vsub.s32 4, %v4140_v31 }
 0x415   : > { %v4554_v52 = vsel %vm722_vm1, %v1508_v50, %v1509_v51  ;;  %v4557_v53 = vsel %vm722_vm1, %v1509_v51, 0.0  ;;  %1988 = vmatpush1.bf16.msra.mxu0 %v3244_v12  ;;  %v4588_v12 = vsub.s32 6, %v4140_v31  ;;  %v1371_v26 = vrot.slane %v4579_v54, %v4154_v38 }
 0x416   : > { %1989 = vmatprep.subr.bf16.mxu0 %v3249_v62  ;;  %v1444_v31 = vrot.slane %v1262_v56, %v1329_v60 }
 0x417   : > { %v1486_v4 = vrot.slane %v1262_v56, %v4588_v12 }
 0x418   : > { %1400 = vrot.lane.b32.xlu1 %v4491_v7, %s3738_s2  ;;  %1398 = vrot.lane.b32.xlu0 %v4493_v8, %s3738_s2 }
 0x419   : > { %1990 = vmatpush1.bf16.msra.mxu0 %v3247_v63 }
 0x41a   : > { %1991 = vmatprep.subr.bf16.mxu0 %v3252_v0  ;;  %v1326_v0 = vrot.slane %v4579_v54, %v4143_v32 }
 0x41c   : > { %1469 = vrot.lane.b32.xlu1 %v4491_v7, %s3739_s10  ;;  %1467 = vrot.lane.b32.xlu0 %v4493_v8, %s3739_s10  ;;  %v1336_v36 = vrot.slane %v1326_v0, %v4143_v32  ;;  %v4618_v0 = vadd.s32 128, %v4145_v33  ;;  %v3293_v33 = vld [vmem:[#allocation18] sm:$0xff]  }
 0x41d   : > { %1992 = vmatpush1.bf16.msra.mxu0 %v3250_v2  ;;  %v1563_v2 = vrot.slane %v4581_v55, %v4143_v32 }
 0x41e   : > { %1993 = vmatprep.subr.bf16.mxu0 %v3255_v5  ;;  %v1440_v5 = vrot.slane %v1262_v56, %v4143_v32  ;;  %vm1363_vm8 = vcmp.lt.s32.totalorder %v4618_v0, 240  ;;  %v3291_v0 = vld [vmem:[#allocation18 + $0x10] sm:$0xff]  }
 0x41f   : > { %v1573_v35 = vrot.slane %v1563_v2, %v4143_v32 }
 0x420   : > { %1282 = vrot.lane.b32.xlu1 %v4506_v11, %s3738_s2  ;;  %1280 = vrot.lane.b32.xlu0 %v4509_v57, %s3738_s2  ;;  %v1450_v30 = vrot.slane %v1440_v5, %v4143_v32  ;;  %v4624_v5 = vrot.slane %v1486_v4, %v4154_v38  ;;  %v1308_v4 = vrot.slane %v4579_v54, %v4585_v61 }
 0x421   : > { %1994 = vmatpush1.bf16.msra.mxu0 %v3253_v6  ;;  %v1330_v6 = vrot.slane %v4579_v54, %v1329_v60 }
 0x422   : > { %1995 = vmatprep.subr.bf16.mxu0 %v3258_v19  ;;  %v1567_v19 = vrot.slane %v4581_v55, %v1329_v60 }
 0x423   : > { %v1340_v29 = vrot.slane %v1330_v6, %v4143_v32 }
 0x424   : > { %1351 = vrot.lane.b32.xlu1 %v4506_v11, %s3739_s10  ;;  %1349 = vrot.lane.b32.xlu0 %v4509_v57, %s3739_s10  ;;  %v1577_v60 = vrot.slane %v1567_v19, %v4143_v32 }
 0x425   : > { %1996 = vmatpush1.bf16.msra.mxu0 %v3256_v43  ;;  %v1414_v43 = vrot.slane %v1262_v56, %v4148_v34  ;;  %v1344_v25 = vmul.f32 %v1340_v29, %v4537_v49 }
 0x426   : > { %1997 = vmatprep.subr.bf16.mxu0 %v3261_v9  ;;  %v1418_v9 = vrot.slane %v1262_v56, %v4585_v61 }
 0x427   : > { %v1424_v28 = vrot.slane %v1414_v43, %v4148_v34  ;;  %v1343_v43 = vmul.f32 %v1336_v36, %v4506_v11  ;;  %v1375_v11 = vrot.slane %v4579_v54, %v4588_v12 }
 0x428   : > { %1519 = vrot.lane.b32.xlu1 %v4522_v20, %s3738_s2  ;;  %1517 = vrot.lane.b32.xlu0 %v4525_v42, %s3738_s2  ;;  %v4615_v27 = vrot.slane %v1418_v9, %v4148_v34  ;;  %v4632_v9 = vmul.f32 %v1573_v35, %v4522_v20 }
 0x429   : > { %1998 = vmatpush1.bf16.msra.mxu0 %v3259_v10  ;;  %v1482_v10 = vrot.slane %v1262_v56, %v4154_v38  ;;  %v1454_v56 = vrot.slane %v1444_v31, %v4143_v32  ;;  %v1341_v31 = vmul.f32 %v1336_v36, %v4509_v57  ;;  %v4635_v32 = vmul.f32 %v1450_v30, %v4481_v40 }
 0x42a   : > { %v4646_v36 = vmul.f32 %v1573_v35, %v4525_v42  ;;  %v1342_v57 = vmul.f32 %v1340_v29, %v4534_v48  ;;  %v1537_v40 = vrot.slane %v4581_v55, %v4148_v34  ;;  %v4663_v35 = vmul.f32 %v1450_v30, %v4479_v41 }
 0x42b   : > { %v4621_v2 = vrot.slane %v1482_v10, %v4154_v38  ;;  %v1304_v10 = vrot.slane %v4579_v54, %v4148_v34  ;;  %v4672_v29 = vmul.f32 %v1577_v60, %v4557_v53  ;;  %v1318_v41 = vrot.slane %v1308_v4, %v4148_v34 }
 0x42c   : > { %1284 = vrot.lane.b32.xlu0 %v4534_v48, %s3738_s2  ;;  %1286 = vrot.lane.b32.xlu1 %v4537_v49, %s3738_s2  ;;  %v4693_v22 = vrot.slane %v1537_v40, %v4148_v34  ;;  %v1605_v4 = vrot.slane %v4581_v55, %v4154_v38 }
 0x42d   : > { %v1314_v30 = vrot.slane %v1304_v10, %v4148_v34 }
 0x430   : > { %1353 = vrot.lane.b32.xlu0 %v4534_v48, %s3739_s10  ;;  %1355 = vrot.lane.b32.xlu1 %v4537_v49, %s3739_s10  ;;  %v4669_v48 = vmul.f32 %v1577_v60, %v4554_v52 }
 0x434   : > { %1586 = vrot.lane.b32.xlu0 %v4525_v42, %s3739_s10  ;;  %1588 = vrot.lane.b32.xlu1 %v4522_v20, %s3739_s10  ;;  %v1541_v20 = vrot.slane %v4581_v55, %v4585_v61  ;;  %v4666_v42 = vmul.f32 %v1454_v56, %v4493_v8  ;;  %v4680_v61 = vmul.f32 %v1454_v56, %v4491_v7 }
 0x435   : > { %v1381_v8 = vrot.slane %v1371_v26, %v4154_v38 }
 0x436   : > { %v4696_v7 = vrot.slane %v1541_v20, %v4148_v34 }
 0x438   : > { %1521 = vrot.lane.b32.xlu0 %v4554_v52, %s3738_s2  ;;  %1523 = vrot.lane.b32.xlu1 %v4557_v53, %s3738_s2 }
 0x43c   : > { %1590 = vrot.lane.b32.xlu0 %v4554_v52, %s3739_s10  ;;  %1592 = vrot.lane.b32.xlu1 %v4557_v53, %s3739_s10  ;;  %v1385_v52 = vrot.slane %v1375_v11, %v4154_v38 }
 0x482   : > { %v4567_v58 = vpop.permute.xlu1 %1396  ;;  %v4569_v59 = vpop.permute.xlu0 %1394 }
 0x486   : > { %v4571_v44 = vpop.permute.xlu1 %1465  ;;  %v4573_v45 = vpop.permute.xlu0 %1463 }
 0x48a   : > { %v4575_v50 = vpop.permute.xlu1 %1400  ;;  %v4577_v51 = vpop.permute.xlu0 %1398 }
 0x48b   : > { %v1405_v24 = vsel %vm1288_vm5, %v4575_v50, %v4567_v58  ;;  %v1404_v49 = vsel %vm1288_vm5, %v4577_v51, %v4569_v59  ;;  %v1402_v60 = vsel %vm1288_vm5, %v4569_v59, %v4577_v51  ;;  %v1403_v26 = vsel %vm1288_vm5, %v4567_v58, %v4575_v50 }
 0x48c   : > { %v1408_v53 = vsel %vm1294_vm6, %v1405_v24, 0.0  ;;  %v1406_v56 = vsel %vm1294_vm6, %v1404_v49, 0.0  ;;  %v1430_v20 = vmul.f32 %v4615_v27, %v1402_v60 }
 0x48d   : > { %v1431_v40 = vmul.f32 %v1424_v28, %v1408_v53  ;;  %v1429_v34 = vmul.f32 %v1424_v28, %v1406_v56 }
 0x48e   : > { %v4590_v62 = vpop.permute.xlu1 %1469  ;;  %v4592_v63 = vpop.permute.xlu0 %1467 }
 0x48f   : > { %v1473_v53 = vsel %vm1357_vm7, %v4592_v63, %v4573_v45 }
 0x492   : > { %v1283_v39 = vpop.permute.xlu1 %1282  ;;  %v1281_v37 = vpop.permute.xlu0 %1280 }
 0x496   : > { %v4626_v6 = vpop.permute.xlu1 %1351  ;;  %v1350_v19 = vpop.permute.xlu0 %1349 }
 0x49a   : > { %v4658_v23 = vpop.permute.xlu1 %1519  ;;  %v4660_v54 = vpop.permute.xlu0 %1517 }
 0x49e   : > { %v1285_v24 = vpop.permute.xlu0 %1284  ;;  %v1287_v10 = vpop.permute.xlu1 %1286 }
 0x49f   : > { %v1289_v51 = vsel %vm1288_vm5, %v1281_v37, %v1285_v24  ;;  %v1291_v11 = vsel %vm1288_vm5, %v1285_v24, %v1281_v37  ;;  %v1290_v58 = vsel %vm1288_vm5, %v1283_v39, %v1287_v10  ;;  %v1292_v50 = vsel %vm1288_vm5, %v1287_v10, %v1283_v39 }
 0x4a0   : > { %v1296_v49 = vsel %vm1294_vm6, %v1291_v11, 0.0  ;;  %v1298_v59 = vsel %vm1294_vm6, %v1292_v50, 0.0  ;;  %v1320_v18 = vmul.f32 %v1318_v41, %v1289_v51  ;;  %v1472_v37 = vsel %vm1357_vm7, %v4571_v44, %v4590_v62 }
 0x4a1   : > { %v1319_v21 = vmul.f32 %v1314_v30, %v1296_v49  ;;  %v1321_v17 = vmul.f32 %v1314_v30, %v1298_v59  ;;  %v1474_v39 = vsel %vm1357_vm7, %v4590_v62, %v4571_v44  ;;  %v1322_v60 = vmul.f32 %v1318_v41, %v1290_v58 }
 0x4a2   : > { %v1354_v28 = vpop.permute.xlu0 %1353  ;;  %v1356_v56 = vpop.permute.xlu1 %1355 }
 0x4a3   : > { %v1345_v24 = vadd.f32 %v1341_v31, %v1319_v21  ;;  %v1347_v30 = vadd.f32 %v1343_v43, %v1321_v17  ;;  %v1358_v10 = vsel %vm1357_vm7, %v1350_v19, %v1354_v28  ;;  %v1360_v59 = vsel %vm1357_vm7, %v1354_v28, %v1350_v19 }
 0x4a4   : > { %v1365_v51 = vsel %vm1363_vm8, %v1360_v59, 0.0  ;;  %v1386_v44 = vmul.f32 %v1381_v8, %v1358_v10  ;;  %v1359_v62 = vsel %vm1357_vm7, %v4626_v6, %v1356_v56  ;;  %v1361_v41 = vsel %vm1357_vm7, %v1356_v56, %v4626_v6 }
 0x4a5   : > { %v1346_v21 = vadd.f32 %v1342_v57, %v1320_v18  ;;  %v1387_v17 = vmul.f32 %v1385_v52, %v1365_v51  ;;  %v1367_v43 = vsel %vm1363_vm8, %v1361_v41, 0.0  ;;  %v1388_v31 = vmul.f32 %v1381_v8, %v1359_v62 }
 0x4a6   : > { %v1471_v19 = vsel %vm1357_vm7, %v4573_v45, %v4592_v63  ;;  %v1348_v11 = vadd.f32 %v1344_v25, %v1322_v60  ;;  %v1390_v58 = vadd.f32 %v1386_v44, %v1345_v24  ;;  %v1389_v50 = vmul.f32 %v1385_v52, %v1367_v43  ;;  %v1587_v49 = vpop.permute.xlu0 %1586  ;;  %v1589_v28 = vpop.permute.xlu1 %1588 }
 0x4a7   : > { %v1478_v10 = vsel %vm1363_vm8, %v1474_v39, 0.0  ;;  %v1476_v18 = vsel %vm1363_vm8, %v1473_v53, 0.0  ;;  %v1391_v6 = vadd.f32 %v1387_v17, %v1346_v21  ;;  %v1392_v57 = vadd.f32 %v1388_v31, %v1347_v30 }
 0x4a8   : > { %v1432_v8 = vmul.f32 %v4615_v27, %v1403_v26  ;;  %v1433_v56 = vadd.f32 %v1429_v34, %v1390_v58  ;;  %v1393_v59 = vadd.f32 %v1389_v50, %v1348_v11  ;;  %v1615_v51 = vrot.slane %v1605_v4, %v4154_v38 }
 0x4a9   : > { %v1499_v25 = vmul.f32 %v4621_v2, %v1472_v37  ;;  %v1497_v45 = vmul.f32 %v4621_v2, %v1471_v19  ;;  %v1434_v63 = vadd.f32 %v1430_v20, %v1391_v6  ;;  %v1435_v52 = vadd.f32 %v1431_v40, %v1392_v57 }
 0x4aa   : > { %v1500_v60 = vmul.f32 %v4624_v5, %v1478_v10  ;;  %v1498_v39 = vmul.f32 %v4624_v5, %v1476_v18  ;;  %v1459_v53 = vadd.f32 %v4635_v32, %v1433_v56  ;;  %v1436_v24 = vadd.f32 %v1432_v8, %v1393_v59  ;;  %v1522_v30 = vpop.permute.xlu0 %1521  ;;  %v1524_v44 = vpop.permute.xlu1 %1523 }
 0x4ab   : > { %v1461_v34 = vadd.f32 %v4663_v35, %v1435_v52  ;;  %v1460_v27 = vadd.f32 %v4666_v42, %v1434_v63  ;;  %v1525_v26 = vsel %vm1288_vm5, %v4660_v54, %v1522_v30  ;;  %v1527_v2 = vsel %vm1288_vm5, %v1522_v30, %v4660_v54 }
 0x4ac   : > { %v1501_v4 = vadd.f32 %v1497_v45, %v1459_v53  ;;  %v1529_v5 = vsel %vm1294_vm6, %v1527_v2, 0.0  ;;  %v1553_v32 = vmul.f32 %v4696_v7, %v1525_v26  ;;  %v1462_v40 = vadd.f32 %v4680_v61, %v1436_v24 }
 0x4ad   : > { %v1502_v20 = vadd.f32 %v1498_v39, %v1460_v27  ;;  %v1552_v35 = vmul.f32 %v4693_v22, %v1529_v5  ;;  %v1526_v42 = vsel %vm1288_vm5, %v4658_v23, %v1524_v44  ;;  %v5101_v37 = vrot.slane %v4581_v55, %v4588_v12 }
 0x4ae   : > { %v1503_v62 = vadd.f32 %v1499_v25, %v1461_v34  ;;  %v1504_v41 = vadd.f32 %v1500_v60, %v1462_v40  ;;  %v1528_v21 = vsel %vm1288_vm5, %v1524_v44, %v4658_v23  ;;  %v1555_v61 = vmul.f32 %v4696_v7, %v1526_v42  ;;  %v1591_v17 = vpop.permute.xlu0 %1590  ;;  %v1593_v43 = vpop.permute.xlu1 %1592  ;;  %v3308_v40 = vld [vmem:[#allocation14 + $0xf0] sm:$0xff]  ;;  %v3311_v42 = vld [vmem:[#allocation14 + $0xd8] sm:$0xff] }
 0x4af   : > { %v1619_v54 = vrot.slane %v5101_v37, %v4154_v38  ;;  %v1556_v31 = vadd.f32 %v1552_v35, %v1501_v4  ;;  %v1557_v19 = vadd.f32 %v1553_v32, %v1502_v20  ;;  %v1531_v11 = vsel %vm1294_vm6, %v1528_v21, 0.0  ;;  %v3309_v20 = vld [vmem:[#allocation14 + $0xe8] sm:$0xff]  ;;  %v3310_v35 = vld [vmem:[#allocation14 + $0xe0] sm:$0xff]  ;;  %v3312_v37 = vld [vmem:[#allocation14 + $0xd0] sm:$0xff] }
 0x4b0   : > { %v1594_v58 = vsel %vm1357_vm7, %v1587_v49, %v1591_v17  ;;  %v1554_v38 = vmul.f32 %v4693_v22, %v1531_v11  ;;  %v1559_v55 = vadd.f32 %v1555_v61, %v1504_v41  ;;  %v1596_v12 = vsel %vm1357_vm7, %v1591_v17, %v1587_v49  ;;  %v3315_v41 = vld [vmem:[#allocation14 + $0xb8] sm:$0xff]  ;;  %v3316_v21 = vld [vmem:[#allocation14 + $0xb0] sm:$0xff]  ;;  %v3317_v61 = vld [vmem:[#allocation14 + $0xa8] sm:$0xff] }
 0x4b1   : > { %v1620_v50 = vmul.f32 %v1615_v51, %v1594_v58  ;;  %v1583_v23 = vadd.f32 %v4669_v48, %v1557_v19  ;;  %v1582_v7 = vadd.f32 %v4646_v36, %v1556_v31  ;;  %v1599_v10 = vsel %vm1363_vm8, %v1596_v12, 0.0  ;;  %v3318_v17 = vld [vmem:[#allocation14 + $0xa0] sm:$0xff]  ;;  %v3320_v31 = vld [vmem:[#allocation14 + $0x90] sm:$0xff]  ;;  %v3321_v19 = vld [vmem:[#allocation14 + $0x88] sm:$0xff] }
 0x4b2   : > { %v1595_v18 = vsel %vm1357_vm7, %v1589_v28, %v1593_v43  ;;  %v1558_v6 = vadd.f32 %v1554_v38, %v1503_v62  ;;  %v1585_v57 = vadd.f32 %v4672_v29, %v1559_v55  ;;  %v1621_v8 = vmul.f32 %v1619_v54, %v1599_v10  ;;  %v3314_v62 = vld [vmem:[#allocation14 + $0xc0] sm:$0xff]  ;;  %v3323_v58 = vld [vmem:[#allocation14 + $0x78] sm:$0xff]  ;;  %v3324_v38 = vld [vmem:[#allocation14 + $0x70] sm:$0xff] }
 0x4b3   : > { %v1597_v22 = vsel %vm1357_vm7, %v1593_v43, %v1589_v28  ;;  %v4802_v56 = vadd.f32 %v1620_v50, %v1582_v7  ;;  %v1622_v49 = vmul.f32 %v1615_v51, %v1595_v18  ;;  %v3319_v43 = vld [vmem:[#allocation14 + $0x98] sm:$0xff]  ;;  %v3322_v11 = vld [vmem:[#allocation14 + $0x80] sm:$0xff]  ;;  %v3325_v55 = vld [vmem:[#allocation14 + $0x68] sm:$0xff] }
 0x4b4   : > { %v1601_v48 = vsel %vm1363_vm8, %v1597_v22, 0.0  ;;  %v4806_v36 = vadd.f32 %v1621_v8, %v1583_v23  ;;  %v1584_v59 = vadd.f32 %v4632_v9, %v1558_v6  ;;  %v3326_v12 = vld [vmem:[#allocation14 + $0x60] sm:$0xff]  ;;  %v3327_v50 = vld [vmem:[#allocation14 + $0x58] sm:$0xff]  ;;  %v3328_v23 = vld [vmem:[#allocation14 + $0x50] sm:$0xff] }
 0x4b5   : > { %v1623_v25 = vmul.f32 %v1619_v54, %v1601_v48  ;;  %v1635_v45 = vmul.f32 %v4802_v56, %v4802_v56  ;;  %v3313_v54 = vld [vmem:[#allocation14 + $0xc8] sm:$0xff]  ;;  %v3330_v10 = vld [vmem:[#allocation14 + $0x40] sm:$0xff]  ;;  %v3331_v18 = vld [vmem:[#allocation14 + $0x38] sm:$0xff] }
 0x4b6   : > { %v1636_v29 = vmul.f32 %v4806_v36, %v4806_v36  ;;  %v4813_v63 = vadd.f32 %v1622_v49, %v1584_v59  ;;  %v3329_v7 = vld [vmem:[#allocation14 + $0x48] sm:$0xff]  ;;  %v3332_v6 = vld [vmem:[#allocation14 + $0x30] sm:$0xff]  ;;  %v3334_v8 = vld [vmem:[#allocation14 + $0x20] sm:$0xff] }
 0x4b7   : > { %v4815_v28 = vadd.f32 %v1623_v25, %v1585_v57  ;;  %v3333_v57 = vld [vmem:[#allocation14 + $0x28] sm:$0xff]  ;;  %v3335_v22 = vld [vmem:[#allocation14 + $0x18] sm:$0xff]  ;;  %v3336_v48 = vld [vmem:[#allocation14 + $0x10] sm:$0xff] }
 0x4b8   : > { %v1637_v52 = vmul.f32 %v4813_v63, %v4813_v63  ;;  %v3337_v49 = vld [vmem:[#allocation14 + $0x8] sm:$0xff]  ;;  %v3338_v59 = vld [vmem:[#allocation14] sm:$0xff]  ;;  %v3339_v25 = vld [vmem:[#allocation14 + $0x1f8] sm:$0xff] }
 0x4b9   : > { %v1638_v51 = vmul.f32 %v4815_v28, %v4815_v28 }
 0x4ba   : > { %v1639_v60 = vadd.f32 %v1637_v52, %v1635_v45  ;;  %v3340_v45 = vld [vmem:[#allocation14 + $0x1f0] sm:$0xff]  ;;  %v3342_v52 = vld [vmem:[#allocation14 + $0x1e0] sm:$0xff] }
 0x4bb   : > { %v1646_v39 = vadd.f32 %v1638_v51, %v1636_v29  ;;  %v3341_v29 = vld [vmem:[#allocation14 + $0x1e8] sm:$0xff]  ;;  %v3343_v51 = vld [vmem:[#allocation14 + $0x1d8] sm:$0xff] }
 0x4bc   : > { %v1640_v9 = vrot.slane %v1639_v60, 4 }
 0x4bd   : > { %v1647_v53 = vrot.slane %v1646_v39, 4 }
 0x4be   : > { %v1641_v24 = vadd.f32 %v1640_v9, %v1639_v60  ;;  %v3344_v60 = vld [vmem:[#allocation14 + $0x1d0] sm:$0xff]  ;;  %v3346_v9 = vld [vmem:[#allocation14 + $0x1c0] sm:$0xff] }
 0x4bf   : > { %v1648_v30 = vadd.f32 %v1647_v53, %v1646_v39  ;;  %v3345_v39 = vld [vmem:[#allocation14 + $0x1c8] sm:$0xff]  ;;  %v5102_v53 = vld [vmem:[#allocation32_spill] sm:$0xff] }
 0x4c0   : > { %v1642_v34 = vrot.slane %v1641_v24, 2 }
 0x4c1   : > { %v1649_v44 = vrot.slane %v1648_v30, 2 }
 0x4c2   : > { %v1643_v26 = vadd.f32 %v1642_v34, %v1641_v24  ;;  %v5103_v24 = vld [vmem:[#allocation33_spill] sm:$0xff]  ;;  %v5114_v34 = vld [vmem:[#allocation44_spill] sm:$0xff] }
 0x4c3   : > { %v1650_v27 = vadd.f32 %v1649_v44, %v1648_v30  ;;  %v5104_v30 = vld [vmem:[#allocation34_spill] sm:$0xff]  ;;  %v5113_v44 = vld [vmem:[#allocation43_spill] sm:$0xff] }
 0x4c4   : > { %v1644_v4 = vrot.slane %v1643_v26, 1 }
 0x4c5   : > { %v1651_v2 = vrot.slane %v1650_v27, 1 }
 0x4c6   : > { %v1645_v32 = vadd.f32 %v1644_v4, %v1643_v26  ;;  %v5116_v26 = vld [vmem:[#allocation46_spill] sm:$0xff]  ;;  %v5118_v4 = vmov 0.0  }
 0x4c7   : > { %v1652_v5 = vadd.f32 %v1651_v2, %v1650_v27  ;;  %v5115_v27 = vld [vmem:[#allocation45_spill] sm:$0xff]  ;;  %v5117_v2 = vld [vmem:[#allocation47_spill] sm:$0xff] }
 0x4c9   : > { %1717 = vmatprep.mubr.f32.mxu1 %v1652_v5  ;;  %v3264_v5 = vld [vmem:[#allocation11 + $0xf4] ss:$8 sps:$4 sm:$0xff]  }
 0x4ca   : > { %1718 = vmatmul.mubr.f32.vlgmr.msra.gmra.mxu1 %v1645_v32  ;;  %v3262_v32 = vld [vmem:[#allocation11 + $0xf0] ss:$8 sps:$4 sm:$0xff]   ;;  %1999 = vmatprep.subr.bf16.mxu0 %v3264_v5 }
 0x4cb   : > { %2052 = vmatpush1.msra.mxu1 %v3308_v40  ;;  %2000 = vmatpush2.bf16.msra.mxu0 %v3262_v32  ;;  %v3267_v40 = vld [vmem:[#allocation11 + $0xe4] ss:$8 sps:$4 sm:$0xff]  }
 0x4cc   : > { %2053 = vmatprep.subr.mxu1 %v3309_v20  ;;  %v3265_v20 = vld [vmem:[#allocation11 + $0xe0] ss:$8 sps:$4 sm:$0xff]   ;;  %2001 = vmatprep.subr.bf16.mxu0 %v3267_v40 }
 0x4cd   : > { %2054 = vmatpush1.msra.mxu1 %v3310_v35  ;;  %v3270_v35 = vld [vmem:[#allocation11 + $0xd4] ss:$8 sps:$4 sm:$0xff]  }
 0x4ce   : > { %2055 = vmatprep.subr.mxu1 %v3311_v42  ;;  %v3268_v42 = vld [vmem:[#allocation11 + $0xd0] ss:$8 sps:$4 sm:$0xff]  }
 0x4cf   : > { %2056 = vmatpush1.msra.mxu1 %v3312_v37  ;;  %2002 = vmatpush2.bf16.msra.mxu0 %v3265_v20  ;;  %v3273_v37 = vld [vmem:[#allocation11 + $0xc4] ss:$8 sps:$4 sm:$0xff]  }
 0x4d0   : > { %2057 = vmatprep.subr.mxu1 %v3313_v54  ;;  %2003 = vmatprep.subr.bf16.mxu0 %v3270_v35  ;;  %v3271_v54 = vld [vmem:[#allocation11 + $0xc0] ss:$8 sps:$4 sm:$0xff]  }
 0x4d1   : > { %2058 = vmatpush1.msra.mxu1 %v3314_v62  ;;  %v3274_v62 = vld [vmem:[#allocation11 + $0xb0] ss:$8 sps:$4 sm:$0xff]  }
 0x4d2   : > { %2059 = vmatprep.subr.mxu1 %v3315_v41  ;;  %v3276_v41 = vld [vmem:[#allocation11 + $0xb4] ss:$8 sps:$4 sm:$0xff]  }
 0x4d3   : > { %2060 = vmatpush1.msra.mxu1 %v3316_v21  ;;  %2004 = vmatpush2.bf16.msra.mxu0 %v3268_v42  ;;  %v3279_v21 = vld [vmem:[#allocation11 + $0xa4] ss:$8 sps:$4 sm:$0xff]  }
 0x4d4   : > { %2061 = vmatprep.subr.mxu1 %v3317_v61  ;;  %2005 = vmatprep.subr.bf16.mxu0 %v3273_v37  ;;  %v3277_v61 = vld [vmem:[#allocation11 + $0xa0] ss:$8 sps:$4 sm:$0xff]  }
 0x4d5   : > { %2062 = vmatpush1.msra.mxu1 %v3318_v17  ;;  %v3282_v17 = vld [vmem:[#allocation11 + $0x94] ss:$8 sps:$4 sm:$0xff]  }
 0x4d6   : > { %2063 = vmatprep.subr.mxu1 %v3319_v43  ;;  %v3280_v43 = vld [vmem:[#allocation11 + $0x90] ss:$8 sps:$4 sm:$0xff]  }
 0x4d7   : > { %2064 = vmatpush1.msra.mxu1 %v3320_v31  ;;  %2006 = vmatpush2.bf16.msra.mxu0 %v3271_v54  ;;  %v3285_v31 = vld [vmem:[#allocation11 + $0x84] ss:$8 sps:$4 sm:$0xff]  }
 0x4d8   : > { %2065 = vmatprep.subr.mxu1 %v3321_v19  ;;  %2007 = vmatprep.subr.bf16.mxu0 %v3276_v41  ;;  %v3283_v19 = vld [vmem:[#allocation11 + $0x80] ss:$8 sps:$4 sm:$0xff]  }
 0x4d9   : > { %2066 = vmatpush1.msra.mxu1 %v3322_v11 }
 0x4da   : > { %2067 = vmatprep.subr.mxu1 %v3323_v58  ;;  %v1727_v58 = vstv %s1726_s3  ;;  %s2611_s3 = scalar_lea.sflag [#allocation4], %s4042_s8 }
 0x4db   : > { %2068 = vmatpush1.msra.mxu1 %v3324_v38  ;;  %2008 = vmatpush2.bf16.msra.mxu0 %v3274_v62 }
 0x4dc   : > { %2069 = vmatprep.subr.mxu1 %v3325_v55  ;;  %2009 = vmatprep.subr.bf16.mxu0 %v3279_v21 }
 0x4dd   : > { %2070 = vmatpush1.msra.mxu1 %v3326_v12 }
 0x4de   : > { %2071 = vmatprep.subr.mxu1 %v3327_v50 }
 0x4df   : > { %2072 = vmatpush1.msra.mxu1 %v3328_v23  ;;  %2010 = vmatpush2.bf16.msra.mxu0 %v3277_v61 }
 0x4e0   : > { %2073 = vmatprep.subr.mxu1 %v3329_v7  ;;  %2011 = vmatprep.subr.bf16.mxu0 %v3282_v17  ;;  %v1629_v7 = vld [vmem:[#allocation15 + $0x8] ss:$4 sm:$0x3] }
 0x4e1   : > { %2074 = vmatpush1.msra.mxu1 %v3330_v10 }
 0x4e2   : > { %2075 = vmatprep.subr.mxu1 %v3331_v18  ;;  %v1631_v18 = vld [vmem:[#allocation15 + $0x9] ss:$4 sm:$0x3] }
 0x4e3   : > { %2076 = vmatpush1.msra.mxu1 %v3332_v6  ;;  %2012 = vmatpush2.bf16.msra.mxu0 %v3280_v43  ;;  %v5119_v6 = vld [vmem:[#allocation31_spill] sm:$0xff] }
 0x4e4   : > { %2077 = vmatprep.subr.mxu1 %v3333_v57  ;;  %2013 = vmatprep.subr.bf16.mxu0 %v3285_v31 }
 0x4e5   : > { %2078 = vmatpush1.msra.mxu1 %v3334_v8  ;;  %v1748_v8 = vrot.slane %v1629_v7, %v5119_v6 }
 0x4e6   : > { %2079 = vmatprep.subr.mxu1 %v3335_v22 }
 0x4e7   : > { %2080 = vmatpush1.msra.mxu1 %v3336_v48  ;;  %2014 = vmatpush2.bf16.msra.mxu0 %v3283_v19  ;;  %v5120_v48 = vld [vmem:[#allocation30_spill] sm:$0xff] }
 0x4e8   : > { %2081 = vmatprep.subr.mxu1 %v3337_v49  ;;  %v1752_v49 = vrot.slane %v1629_v7, %v5120_v48  ;;  %v2256_v7 = vld [vmem:[#allocation17 + $0xe8] sm:$0xff] }
 0x4e9   : > { %2082 = vmatpush1.msra.mxu1 %v3338_v59  ;;  %v1633_v59 = vld [vmem:[#allocation15 + $0xa] ss:$4 sm:$0x3] }
 0x4ea   : > { %2083 = vmatprep.subr.mxu1 %v3339_v25 }
 0x4eb   : > { %2084 = vmatpush2.msra.mxu1 %v3340_v45  ;;  %v1763_v45 = vrot.slane %v1631_v18, %v5119_v6 }
 0x4ec   : > { %2085 = vmatprep.subr.mxu1 %v3341_v29 }
 0x4ed   : > { %2086 = vmatpush2.msra.mxu1 %v3342_v52 }
 0x4ee   : > { %2087 = vmatprep.subr.mxu1 %v3343_v51  ;;  %v1767_v51 = vrot.slane %v1631_v18, %v5120_v48  ;;  %v2255_v18 = vld [vmem:[#allocation17 + $0xe0] sm:$0xff] }
 0x4ef   : > { %2088 = vmatpush2.msra.mxu1 %v3344_v60 }
 0x4f0   : > { %2089 = vmatprep.subr.mxu1 %v3345_v39 }
 0x4f1   : > { %2090 = vmatpush2.msra.mxu1 %v3346_v9 }
 0x4f2   : > { %2091 = vmatprep.subr.mxu1 %v4374_v46  ;;  %v5105_v46 = vld [vmem:[#allocation35_spill] sm:$0xff] }
 0x4f3   : > { %2092 = vmatpush2.msra.mxu1 %v4377_v47  ;;  %v5106_v47 = vld [vmem:[#allocation36_spill] sm:$0xff] }
 0x4f4   : > { %2093 = vmatprep.subr.mxu1 %v4381_v13  ;;  %v5107_v13 = vld [vmem:[#allocation37_spill] sm:$0xff] }
 0x4f5   : > { %2094 = vmatpush2.msra.mxu1 %v4385_v14  ;;  %v5108_v14 = vld [vmem:[#allocation38_spill] sm:$0xff] }
 0x4f6   : > { %2095 = vmatprep.subr.mxu1 %v4389_v15  ;;  %v5109_v15 = vld [vmem:[#allocation39_spill] sm:$0xff] }
 0x4f7   : > { %2096 = vmatpush2.msra.mxu1 %v4393_v16  ;;  %v5110_v16 = vld [vmem:[#allocation40_spill] sm:$0xff] }
 0x4f8   : > { %2097 = vmatprep.subr.mxu1 %v4397_v3  ;;  %v5111_v3 = vld [vmem:[#allocation41_spill] sm:$0xff] }
 0x4f9   : > { %2098 = vmatpush2.msra.mxu1 %v4401_v1  ;;  %v5112_v1 = vld [vmem:[#allocation42_spill] sm:$0xff] }
 0x4fa   : > { %2099 = vmatprep.subr.mxu1 %v5102_v53 }
 0x4fb   : > { %2100 = vmatpush2.msra.mxu1 %v5103_v24  ;;  %v1778_v24 = vrot.slane %v1633_v59, %v5119_v6 }
 0x4fc   : > { %2101 = vmatprep.subr.mxu1 %v5104_v30  ;;  %v1782_v30 = vrot.slane %v1633_v59, %v5120_v48  ;;  %v2237_v59 = vld [vmem:[#allocation17 + $0x50] sm:$0xff] }
 0x4fd   : > { %2102 = vmatpush2.msra.mxu1 %v5105_v46 }
 0x4fe   : > { %2103 = vmatprep.subr.mxu1 %v5106_v47 }
 0x4ff   : > { %2104 = vmatpush2.msra.mxu1 %v5107_v13 }
 0x500   : > { %2105 = vmatprep.subr.mxu1 %v5108_v14 }
 0x501   : > { %2106 = vmatpush2.msra.mxu1 %v5109_v15 }
 0x502   : > { %2107 = vmatprep.subr.mxu1 %v5110_v16 }
 0x503   : > { %2108 = vmatpush2.msra.mxu1 %v5111_v3 }
 0x504   : > { %2109 = vmatprep.subr.mxu1 %v5112_v1 }
 0x505   : > { %2110 = vmatpush2.msra.mxu1 %v5113_v44 }
 0x506   : > { %2111 = vmatprep.subr.mxu1 %v5114_v34 }
 0x507   : > { %2112 = vmatpush2.msra.mxu1 %v5115_v27 }
 0x508   : > { %2113 = vmatprep.subr.mxu1 %v5116_v26 }
 0x509   : > { %2114 = vmatpush2.msra.mxu1 %v5117_v2 }
 0x50a   : > { %3000 = vmatprep.subr.mxu1 %v5118_v4 }
 0x58a   : > { %v1719_v11 = vpop.f32.mrf.mxu1 }
 0x58b   : > { %v1724_v38 = vmul.f32 0.00390625, %v1719_v11 }
 0x58c   : > { %v1721_v55 = vpop.f32.mrf.mxu1 }
 0x58d   : > { %v1728_v12 = vadd.f32 %v1727_v58, %v1724_v38  ;;  %v1725_v50 = vmul.f32 0.00390625, %v1721_v55  ;;  %v3348_v38 = vld [vmem:[%s4046_s28] sm:$0xff] }
 0x58e   : > { %v2258_v55 = vld [vmem:[#allocation17 + $0xf8] sm:$0xff] }
 0x58f   : > { %3300 = vrsqrt.f32 %v1728_v12  ;;  %v1729_v23 = vadd.f32 %v1727_v58, %v1725_v50  ;;  %v3347_v58 = vld [vmem:[%s4046_s28 + $0x8] sm:$0xff]  ;;  %2912 = vmatprep.subr.mxu0 %v2258_v55  ;;  %s2878_s28 = sld [smem:[#allocation20 + $0x3]] }
 0x590   : > { %v2242_v12 = vld [vmem:[#allocation17 + $0x78] sm:$0xff]  ;;  %v2257_v50 = vld [vmem:[#allocation17 + $0xf0] sm:$0xff] }
 0x591   : > { %3302 = vrsqrt.f32 %v1729_v23  ;;  %v2241_v23 = vld [vmem:[#allocation17 + $0x70] sm:$0xff] }
 0x595   : > { %s2124_s4 = sand.u32 2147483647, %s2878_s28  ;;  %s3626_s28 = scalar_lea.vmem %s2625_s25, 128 }
 0x596   : > { %p3627_p1 = scmp.ne.s32.totalorder %s2625_s25, %s3626_s28 }
 0x598   : > { %p3628_p4 = pnand %p3627_p1, %p5123_p3 }
 0x59a   : > { %p3629_p6 = pneg %p3628_p4 }
 0x59c   : > { %v3301_v10 = vpop.eup %3300 }
 0x59d   : > { %v1735_v57 = vrot.slane %v3301_v10, %v5119_v6  ;;  %v2240_v10 = vld [vmem:[#allocation17 + $0x68] sm:$0xff] }
 0x59e   : > { %v3303_v22 = vpop.eup %3302 }
 0x59f   : > { %v1739_v25 = vrot.slane %v3303_v22, %v5119_v6  ;;  %v1740_v29 = vmul.f32 %v1735_v57, %v4802_v56  ;;  %v1742_v52 = vmul.f32 %v1735_v57, %v4813_v63  ;;  %v2239_v57 = vld [vmem:[#allocation17 + $0x60] sm:$0xff]  ;;  %v2238_v22 = vld [vmem:[#allocation17 + $0x58] sm:$0xff] }
 0x5a1   : > { %v1741_v60 = vmul.f32 %v1739_v25, %v4806_v36  ;;  %v1743_v39 = vmul.f32 %v1739_v25, %v4815_v28  ;;  %v1755_v9 = vmul.f32 %v1748_v8, %v1740_v29  ;;  %v1757_v53 = vmul.f32 %v1748_v8, %v1742_v52  ;;  %v2254_v8 = vld [vmem:[#allocation17 + $0xd8] sm:$0xff]  ;;  %v2252_v25 = vld [vmem:[#allocation17 + $0xc8] sm:$0xff]  ;;  %v2251_v29 = vld [vmem:[#allocation17 + $0xc0] sm:$0xff] }
 0x5a2   : > { %v2235_v52 = vld [vmem:[#allocation17 + $0x40] sm:$0xff] }
 0x5a3   : > { %v1756_v46 = vmul.f32 %v1752_v49, %v1741_v60  ;;  %v1758_v47 = vmul.f32 %v1752_v49, %v1743_v39  ;;  %v1770_v13 = vadd.f32 %v1763_v45, %v1755_v9  ;;  %v1772_v14 = vadd.f32 %v1763_v45, %v1757_v53  ;;  %v2253_v49 = vld [vmem:[#allocation17 + $0xd0] sm:$0xff]  ;;  %v2236_v45 = vld [vmem:[#allocation17 + $0x48] sm:$0xff]  ;;  %v2234_v60 = vld [vmem:[#allocation17 + $0x38] sm:$0xff] }
 0x5a4   : > { %v2249_v39 = vld [vmem:[#allocation17 + $0xb0] sm:$0xff]  ;;  %v2248_v53 = vld [vmem:[#allocation17 + $0xa8] sm:$0xff] }
 0x5a5   : > { %v1771_v15 = vadd.f32 %v1767_v51, %v1756_v46  ;;  %v1773_v56 = vadd.f32 %v1767_v51, %v1758_v47  ;;  %v1785_v16 = vmax.f32 %v1770_v13, %v1778_v24  ;;  %v1787_v63 = vmax.f32 %v1772_v14, %v1778_v24  ;;  %v2250_v51 = vld [vmem:[#allocation17 + $0xb8] sm:$0xff]  ;;  %v2233_v9 = vld [vmem:[#allocation17 + $0x30] sm:$0xff]  ;;  %v2232_v24 = vld [vmem:[#allocation17 + $0x28] sm:$0xff] }
 0x5a6   : > { %v2231_v46 = vld [vmem:[#allocation17 + $0x20] sm:$0xff]  ;;  %v2125_v13 = vstv %s2124_s4  ;;  %s3740_s4 = smov [#allocation21]  }
 0x5a7   : > { %v1786_v3 = vmax.f32 %v1771_v15, %v1782_v30  ;;  %v1788_v1 = vmax.f32 %v1773_v56, %v1782_v30  ;;  %v1789_v36 = vpack.c.bf16 %v1787_v63, %v1785_v16  ;;  %v2247_v30 = vld [vmem:[#allocation17 + $0xa0] sm:$0xff]  ;;  %s3630_s19 = sshll.u32 %s3740_s4, 4  ;;  %s3631_s19 = int_to_ptr.vmem [resolvable:$false] %s3630_s19 }
 0x5a8   : > { %s3632_s5 = scalar_lea.vmem %s3631_s19, 256  ;;  %p3633_p12 = scmp.lt.s32.totalorder %s2625_s25, %s3631_s19 }
 0x5a9   : > { %v1790_v44 = vpack.c.bf16 %v1788_v1, %v1786_v3  ;;  %v2027_v3 = vld [vmem:[#allocation15 + $0x10] ss:$4 sm:$0x3]  ;;  %p3634_p13 = scmp.lt.s32.totalorder %s3632_s5, %s3626_s28 }
 0x5ab   : > { %2015 = vmatprep.mubr.bf16.mxu0 %v1790_v44  ;;  %v2029_v44 = vld [vmem:[#allocation15 + $0x11] ss:$4 sm:$0x3]  ;;  %p3635_p7 = por %p3634_p13, %p3633_p12 }
 0x5ac   : > { %2016 = vmatmul.mubr.bf16.vlgmr.msra.gmra.mxu0 %v1789_v36 }
 0x5ad   : > { %2913 = vmatpush3.msra.mxu0 %v2242_v12  ;;  %p3636_p5 = pnand %p3635_p7, %p3629_p6 }
 0x5ae   : > { %2914 = vmatprep.subr.mxu0 %v2257_v50  ;;  %v2243_v50 = vld [vmem:[#allocation17 + $0x80] sm:$0xff] }
 0x5af   : > { %2915 = vmatpush3.msra.mxu0 %v2241_v23  ;;  %v2227_v23 = vld [vmem:[#allocation17] sm:$0xff] }
 0x5b0   : > { %2916 = vmatprep.subr.mxu0 %v2256_v7 }
 0x5b1   : > { %2917 = vmatpush3.msra.mxu0 %v2240_v10 }
 0x5b2   : > { %2918 = vmatprep.subr.mxu0 %v2255_v18 }
 0x5b3   : > { %2919 = vmatpush3.msra.mxu0 %v2239_v57 }
 0x5b4   : > { %2920 = vmatprep.subr.mxu0 %v2254_v8  ;;  %v4898_v8 = vld [vmem:[%s5000_s9] sm:$0xff] }
 0x5b5   : > { %2921 = vmatpush3.msra.mxu0 %v2238_v22  ;;  %v3286_v22 = vld [vmem:[#allocation18 + $0x38] sm:$0xff]  }
 0x5b6   : > { %2922 = vmatprep.subr.mxu0 %v2253_v49 }
 0x5b7   : > { %2923 = vmatpush3.msra.mxu0 %v2237_v59  ;;  %v3287_v59 = vld [vmem:[#allocation18 + $0x30] sm:$0xff]  }
 0x5b8   : > { %2924 = vmatprep.subr.mxu0 %v2252_v25  ;;  %v3288_v25 = vld [vmem:[#allocation18 + $0x28] sm:$0xff]  }
 0x5b9   : > { %2925 = vmatpush3.msra.mxu0 %v2236_v45  ;;  %v3289_v45 = vld [vmem:[#allocation18 + $0x20] sm:$0xff]  }
 0x5ba   : > { %2926 = vmatprep.subr.mxu0 %v2251_v29 }
 0x5bb   : > { %2927 = vmatpush3.msra.mxu0 %v2235_v52 }
 0x5bc   : > { %2928 = vmatprep.subr.mxu0 %v2250_v51 }
 0x5bd   : > { %2929 = vmatpush3.msra.mxu0 %v2234_v60 }
 0x5be   : > { %2930 = vmatprep.subr.mxu0 %v2249_v39 }
 0x5bf   : > { %2931 = vmatpush3.msra.mxu0 %v2233_v9 }
 0x5c0   : > { %2932 = vmatprep.subr.mxu0 %v2248_v53 }
 0x5c1   : > { %2933 = vmatpush3.msra.mxu0 %v2232_v24 }
 0x5c2   : > { %2934 = vmatprep.subr.mxu0 %v2247_v30 }
 0x5c3   : > { %2935 = vmatpush3.msra.mxu0 %v2231_v46 }
 0x66c   : > { %v4858_v28 = vpop.f32.mrf.mxu0 }
 0x66d   : > { %v2033_v26 = vmul.f32 %v4858_v28, %v4858_v28 }
 0x66e   : > { %v4860_v34 = vpop.f32.mrf.mxu0 }
 0x66f   : > { %v2034_v32 = vmul.f32 %v4860_v34, %v4860_v34 }
 0x670   : > { %v4862_v27 = vpop.f32.mrf.mxu0 }
 0x671   : > { %v2035_v2 = vmul.f32 %v4862_v27, %v4862_v27 }
 0x672   : > { %v4868_v5 = vpop.f32.mrf.mxu0 }
 0x673   : > { %v2037_v40 = vadd.f32 %v2035_v2, %v2033_v26  ;;  %v2036_v20 = vmul.f32 %v4868_v5, %v4868_v5  ;;  %v2146_v26 = vrot.slane %v2027_v3, %v5119_v6 }
 0x675   : > { %v2038_v35 = vrot.slane %v2037_v40, 4  ;;  %v2044_v42 = vadd.f32 %v2036_v20, %v2034_v32  ;;  %v2150_v32 = vrot.slane %v2027_v3, %v5120_v48 }
 0x677   : > { %v2039_v37 = vadd.f32 %v2038_v35, %v2037_v40  ;;  %v2045_v54 = vrot.slane %v2044_v42, 4  ;;  %v2031_v40 = vld [vmem:[#allocation15 + $0x12] ss:$4 sm:$0x3] }
 0x679   : > { %v2040_v62 = vrot.slane %v2039_v37, 2  ;;  %v2046_v41 = vadd.f32 %v2045_v54, %v2044_v42  ;;  %v2161_v42 = vrot.slane %v2029_v44, %v5119_v6  ;;  %v2246_v54 = vld [vmem:[#allocation17 + $0x98] sm:$0xff] }
 0x67a   : > { %2936 = vmatprep.subr.mxu0 %v2246_v54 }
 0x67b   : > { %v2041_v21 = vadd.f32 %v2040_v62, %v2039_v37  ;;  %v2047_v61 = vrot.slane %v2046_v41, 2 }
 0x67d   : > { %v2048_v17 = vadd.f32 %v2047_v61, %v2046_v41  ;;  %v2042_v43 = vrot.slane %v2041_v21, 1 }
 0x67f   : > { %v2049_v31 = vrot.slane %v2048_v17, 1  ;;  %v2043_v11 = vadd.f32 %v2042_v43, %v2041_v21  ;;  %v2165_v21 = vrot.slane %v2029_v44, %v5120_v48  ;;  %v2176_v43 = vrot.slane %v2031_v40, %v5119_v6 }
 0x681   : > { %v2050_v19 = vadd.f32 %v2049_v31, %v2048_v17  ;;  %v2230_v17 = vld [vmem:[#allocation17 + $0x18] sm:$0xff]  ;;  %v2180_v31 = vrot.slane %v2031_v40, %v5120_v48 }
 0x682   : > { %2937 = vmatpush3.msra.mxu0 %v2230_v17 }
 0x683   : > { %2115 = vmatprep.mubr.f32.mxu1 %v2050_v19  ;;  %v2229_v19 = vld [vmem:[#allocation17 + $0x10] sm:$0xff] }
 0x684   : > { %2116 = vmatmul.mubr.f32.vlgmr.msra.gmra.mxu1 %v2043_v11 }
 0x685   : > { %3001 = vmatpush3.msra.mxu1 %v3347_v58  ;;  %3004 = vmatprep.mubr.msk.f32.mxu1 %vm3736_vm2, %v5118_v4 }
 0x686   : > { %3002 = vmatprep.subr.mxu1 %v5118_v4 }
 0x687   : > { %3003 = vmatpush3.msra.mxu1 %v3348_v38 }
 0x688   : > { %3007 = vmatprep.subr.bf16.mxu1 %v5118_v4  ;;  %3005 = vmatmul.mubr.msk.f32.vlgmr.msra.gmra.mxu1 %vm2353_vm9, %v4898_v8 }
 0x689   : > { %3008 = vmatpush3.bf16.msra.mxu1 %v3286_v22  ;;  %3023 = vmatprep.mubr.msk.bf16.mxu1 %vm3736_vm2, %v5118_v4 }
 0x68a   : > { %3009 = vmatprep.subr.bf16.mxu1 %v5118_v4 }
 0x68d   : > { %3010 = vmatpush3.bf16.msra.mxu1 %v3287_v59 }
 0x68e   : > { %3011 = vmatprep.subr.bf16.mxu1 %v5118_v4 }
 0x691   : > { %3012 = vmatpush3.bf16.msra.mxu1 %v3288_v25 }
 0x692   : > { %3013 = vmatprep.subr.bf16.mxu1 %v5118_v4 }
 0x695   : > { %3014 = vmatpush3.bf16.msra.mxu1 %v3289_v45  ;;  %v2880_v45 = vld [vmem:[%s5121_s18] ss:$0 sm:$0xff] }
 0x696   : > { %3015 = vmatprep.subr.bf16.mxu1 %v5118_v4 }
 0x744   : > { %v2117_v47 = vpop.f32.mrf.mxu1 }
 0x745   : > { %v2122_v14 = vmul.f32 0.00390625, %v2117_v47 }
 0x746   : > { %v2119_v15 = vpop.f32.mrf.mxu1 }
 0x747   : > { %v2126_v56 = vadd.f32 %v2125_v13, %v2122_v14  ;;  %v2123_v16 = vmul.f32 0.00390625, %v2119_v15 }
 0x748   : > { %v2423_v17 = vpop.f32.mrf.mxu1 }
 0x749   : > { %3304 = vrsqrt.f32 %v2126_v56  ;;  %v2127_v63 = vadd.f32 %v2125_v13, %v2123_v16 }
 0x74b   : > { %3306 = vrsqrt.f32 %v2127_v63 }
 0x756   : > { %v3305_v1 = vpop.eup %3304 }
 0x757   : > { %v2133_v36 = vrot.slane %v3305_v1, %v5119_v6 }
 0x758   : > { %v3307_v2 = vpop.eup %3306 }
 0x759   : > { %v2137_v20 = vrot.slane %v3307_v2, %v5119_v6  ;;  %v2138_v35 = vmul.f32 %v2133_v36, %v4858_v28  ;;  %v2140_v37 = vmul.f32 %v2133_v36, %v4862_v27  ;;  %v2245_v28 = vld [vmem:[#allocation17 + $0x90] sm:$0xff] }
 0x75a   : > { %2938 = vmatprep.subr.mxu0 %v2245_v28 }
 0x75b   : > { %v2139_v62 = vmul.f32 %v2137_v20, %v4860_v34  ;;  %v2153_v41 = vmul.f32 %v2146_v26, %v2138_v35  ;;  %v2141_v61 = vmul.f32 %v2137_v20, %v4868_v5  ;;  %v2155_v27 = vmul.f32 %v2146_v26, %v2140_v37  ;;  %2939 = vmatpush3.msra.mxu0 %v2229_v19  ;;  %v2244_v34 = vld [vmem:[#allocation17 + $0x88] sm:$0xff] }
 0x75c   : > { %2940 = vmatprep.subr.mxu0 %v2244_v34  ;;  %v2228_v5 = vld [vmem:[#allocation17 + $0x8] sm:$0xff] }
 0x75d   : > { %v2154_v11 = vmul.f32 %v2150_v32, %v2139_v62  ;;  %v2168_v58 = vadd.f32 %v2161_v42, %v2153_v41  ;;  %v2156_v38 = vmul.f32 %v2150_v32, %v2141_v61  ;;  %2941 = vmatpush3.msra.mxu0 %v2228_v5  ;;  %v2170_v48 = vadd.f32 %v2161_v42, %v2155_v27  ;;  %v3292_v61 = vld [vmem:[#allocation18 + $0x8] sm:$0xff]  }
 0x75e   : > { %2942 = vmatprep.subr.mxu0 %v2243_v50 }
 0x75f   : > { %v2169_v55 = vadd.f32 %v2165_v21, %v2154_v11  ;;  %v2171_v12 = vadd.f32 %v2165_v21, %v2156_v38  ;;  %v2183_v6 = vmax.f32 %v2168_v58, %v2176_v43  ;;  %2943 = vmatpush3.msra.mxu0 %v2227_v23  ;;  %v2185_v57 = vmax.f32 %v2170_v48, %v2176_v43  ;;  %v3290_v21 = vld [vmem:[#allocation18 + $0x18] sm:$0xff]  }
 0x760   : > { %3027 = vmatprep.subr.mxu0 %v5118_v4  ;;  %3016 = vmatpush3.bf16.msra.mxu1 %v3290_v21  ;;  %v2427_v43 = vpack.c.bf16 %v2423_v17, %v2423_v17 }
 0x761   : > { %v2184_v7 = vmax.f32 %v2169_v55, %v2180_v31  ;;  %v2186_v18 = vmax.f32 %v2171_v12, %v2180_v31  ;;  %3017 = vmatprep.subr.bf16.mxu1 %v5118_v4  ;;  %v3006_v31 = vpop.f32.mrf.mxu1 }
 0x763   : > { %v3199_v10 = vpack.i.bf16 %v2184_v7, %v2183_v6  ;;  %v3209_v49 = vpack.i.bf16 %v2186_v18, %v2185_v57 }
 0x764   : > { %3018 = vmatpush3.bf16.msra.mxu1 %v3291_v0 }
 0x765   : > { %3200 = vrot.lane.b32.xlu1 %v3199_v10, %s3739_s10  ;;  %3195 = vrot.lane.b32.xlu0 %v3199_v10, %s3738_s2 }
 0x766   : > { %3019 = vmatprep.subr.bf16.mxu1 %v5118_v4 }
 0x768   : > { %3020 = vmatpush3.bf16.msra.mxu1 %v3292_v61 }
 0x769   : > { %3210 = vrot.lane.b32.xlu1 %v3209_v49, %s3739_s10  ;;  %3205 = vrot.lane.b32.xlu0 %v3209_v49, %s3738_s2  ;;  %s5122_s10 = sld [smem:[#allocation57_spill]] }
 0x76a   : > { %3021 = vmatprep.subr.bf16.mxu1 %v5118_v4 }
 0x76c   : > { %3022 = vmatpush3.bf16.msra.mxu1 %v3293_v33 }
 0x76f   : > { %3024 = vmatmul.mubr.bf16.vlgmr.msra.gmra.mxu1 %v2427_v43  ;;  %s4954_s21 = scalar_lea.hbm %s5122_s10, %s2891_s24 }
 0x7d7   : > { %v3201_v29 = vpop.permute.xlu1 %3200  ;;  %v3196_v52 = vpop.permute.xlu0 %3195 }
 0x7d8   : > { %v3203_v51 = vunpack.i.h.bf16 %v3201_v29  ;;  %v3202_v60 = vunpack.i.l.bf16 %v3201_v29  ;;  %v3198_v39 = vunpack.i.h.bf16 %v3196_v52  ;;  %v3197_v9 = vunpack.i.l.bf16 %v3196_v52 }
 0x7da   : > { %v2195_v53 = vsel %vm1288_vm5, %v3197_v9, %v3198_v39  ;;  %v2197_v24 = vsel %vm1288_vm5, %v3198_v39, %v3197_v9  ;;  %v2217_v30 = vsel %vm1357_vm7, %v3203_v51, %v3202_v60  ;;  %v2215_v1 = vsel %vm1357_vm7, %v3202_v60, %v3203_v51 }
 0x7db   : > { %v2199_v46 = vsel %vm1294_vm6, %v2197_v24, -1e+30  ;;  %v3211_v47 = vpop.permute.xlu1 %3210  ;;  %v3206_v13 = vpop.permute.xlu0 %3205  ;;  %v2204_v14 = vmax.f32 %v2195_v53, %v2184_v7  ;;  %v2220_v15 = vsel %vm1363_vm8, %v2217_v30, -1e+30 }
 0x7dc   : > { %v2203_v56 = vmax.f32 %v2199_v46, %v2183_v6  ;;  %v3213_v16 = vunpack.i.h.bf16 %v3211_v47  ;;  %v3212_v63 = vunpack.i.l.bf16 %v3211_v47  ;;  %v3208_v3 = vunpack.i.h.bf16 %v3206_v13 }
 0x7dd   : > { %v3207_v44 = vunpack.i.l.bf16 %v3206_v13  ;;  %v2224_v36 = vmax.f32 %v2204_v14, %v2220_v15 }
 0x7de   : > { %v2218_v26 = vsel %vm1357_vm7, %v3213_v16, %v3212_v63  ;;  %v2223_v2 = vmax.f32 %v2203_v56, %v2215_v1  ;;  %v2216_v62 = vsel %vm1357_vm7, %v3212_v63, %v3213_v16 }
 0x7df   : > { %v2196_v32 = vsel %vm1288_vm5, %v3207_v44, %v3208_v3  ;;  %v2198_v40 = vsel %vm1288_vm5, %v3208_v3, %v3207_v44  ;;  %2323 = vmatprep.mubr.f32.mxu0 %v2224_v36  ;;  %v2222_v20 = vsel %vm1363_vm8, %v2218_v26, -1e+30 }
 0x7e0   : > { %v2201_v35 = vsel %vm1294_vm6, %v2198_v40, -1e+30  ;;  %2324 = vmatmul.mubr.f32.vlgmr.msra.gmra.mxu0 %v2223_v2  ;;  %v2206_v42 = vmax.f32 %v2196_v32, %v2186_v18 }
 0x7e1   : > { %v2205_v37 = vmax.f32 %v2201_v35, %v2185_v57 }
 0x7e2   : > { %v2226_v54 = vmax.f32 %v2206_v42, %v2222_v20 }
 0x7e3   : > { %v2225_v41 = vmax.f32 %v2205_v37, %v2216_v62 }
 0x7e4   : > { %2328 = vmatprep.mubr.f32.mxu0 %v2226_v54 }
 0x7e5   : > { %2329 = vmatmul.mubr.f32.gmra.mxu0 %v2225_v41 }
 0x7e6   : > { %3031 = vmatprep.mubr.msk.f32.mxu0 %vm3736_vm2, %v5118_v4 }
 0x82f   : > { %v2533_v22 = vpop.f32.mrf.mxu1 }
 0x830   : > { %v2534_v29 = vadd.f32 %v2880_v45, %v2533_v22 }
 0x831   : > { %v3025_v49 = vpop.f32.mrf.mxu1 }
 0x833   : > { %v2536_v59 = vpop.f32.mrf.mxu1 }
 0x835   : > { %v3026_v25 = vpop.f32.mrf.mxu1 }
 0x8a0   : > { %v2944_v28 = vpop.f32.mrf.mxu0 }
 0x8a2   : > { %v2945_v19 = vpop.f32.mrf.mxu0 }
 0x8a3   : > { %v2946_v11 = vadd.f32 %v2945_v19, %v2944_v28 }
 0x8a5   : > { %v2947_v58 = vpop.f32.mrf.mxu0  ;;  %v2336_v38 = vrot.slane %v2946_v11, 7  ;;  %v2344_v50 = vrot.slane %v2946_v11, 1 }
 0x8a7   : > { %v2948_v27 = vpop.f32.mrf.mxu0  ;;  %v2341_v5 = vsel %vm641_vm0, -1e+30, %v2336_v38 }
 0x8a8   : > { %v2949_v34 = vadd.f32 %v2948_v27, %v2947_v58  ;;  %v2342_v10 = vmax.f32 %v2341_v5, %v2946_v11 }
 0x8aa   : > { %v2337_v55 = vrot.slane %v2949_v34, 7  ;;  %v2345_v12 = vrot.slane %v2949_v34, 1 }
 0x8ac   : > { %v2338_v23 = vsel %vm641_vm0, %v2336_v38, %v2337_v55  ;;  %v2349_v7 = vsel %vm722_vm1, %v2345_v12, -1e+30  ;;  %v2346_v48 = vsel %vm722_vm1, %v2344_v50, %v2345_v12 }
 0x8ad   : > { %v2343_v6 = vmax.f32 %v2338_v23, %v2949_v34  ;;  %v2350_v57 = vmax.f32 %v2342_v10, %v2346_v48 }
 0x8af   : > { %v2351_v18 = vmax.f32 %v2343_v6, %v2349_v7 }
 0x8b1   : > { %3028 = vmatpush3.msra.mxu0 %v2351_v18 }
 0x8b2   : > { %3029 = vmatprep.subr.mxu0 %v5118_v4 }
 0x8b3   : > { %3030 = vmatpush3.msra.mxu0 %v2350_v57 }
 0x8b4   : > { %3032 = vmatmul.mubr.msk.f32.vlgmr.msra.gmra.mxu0 %vm2353_vm9, %v4898_v8 }
 0x974   : > { %v2605_v4 = vpop.f32.mrf.mxu0 }
 0x975   : > { %v2606_v52 = vadd.f32 %v2605_v4, %v2534_v29 }
 0x976   : > { %v3033_v8 = vpop.f32.mrf.mxu0 }
 0x977   : > { %2609 = vst [vmem:[%s630_s26] sm:$0xff] %v2606_v52 }
 0x978   : > { %3639 = shalt.err (!%p3636_p5)
}
 0x979   : > { %s3640_s6 = scalar_lea.hbm %s4954_s21, 128  ;;  %s3644_s1 = scalar_lea.hbm %s5122_s10, 256 }
 0x97a   : > { %p3641_p9 = scmp.ne.s32.totalorder %s4954_s21, %s3640_s6  ;;  %p3645_p0 = scmp.lt.s32.totalorder %s4954_s21, %s5122_s10 }
 0x97b   : > { %p3646_p2 = scmp.lt.s32.totalorder %s3644_s1, %s3640_s6 }
 0x97c   : > { %p3642_p10 = pnand %p3641_p9, %p5123_p3 }
 0x97d   : > { %p3647_p8 = por %p3646_p2, %p3645_p0 }
 0x97e   : > { %p3643_p11 = pneg %p3642_p10 }
 0x980   : > { %p3648_p1 = pnand %p3647_p8, %p3643_p11 }
 0x982   : > { %3651 = shalt.err (!%p3648_p1)
}
 0x983   : > { %3076 = dma.vmem_to_hbm [thread:$0]  (%p5123_p3), %s2625_s25, 128, %s4954_s21, %s2611_s3  }
 0x984 PF: > { %s2636_s24 = sand.u32 1, %s3702_s29   ;;  %p5124_p4 = scmp.ne.s32.totalorder %s5067_s23, 0 }
 0x985   : > { %p5125_p6 = scmp.ge.s32.totalorder %s3714_s16, 2  ;;  %s2637_s26 = scalar_lea.sflag [#allocation4], %s2636_s24 }
 0x987   : > { %p3114_p12 = pnand %p5125_p6, %p5124_p4 }
 0x989   : > { %p3115_p13 = pneg %p3114_p12 }
 0x98b   : > { %3697 = dma.done.wait (%p3115_p13), %s2637_s26, 128  }
 0x98c   : > { %3699 = vsyncadd (%p3115_p13), %s2637_s26, 4294967168  ;;  %p33_p7 = scmp.ge.s32.totalorder %s3967_s27, 4   ;;  %s5126_s29 = smov %s3706_s30 }
 0x98d   : > { %s5127_s30 = smov %s3710_s15  ;;  %s5128_s15 = smov %s3978_s12 }
 0x98e   : > { %s5129_s16 = smov %s3967_s27  ;;  %35 = sbr.rel (!%p33_p7) target bundleno = 22 (0x16), region = 170 }
 0x993   :  { %2642 = vsyncpa [#allocation3], 1 }
 0x994   :  { %2644 = vsyncpa [#allocation3 + $0x1], 1 }
 0x995   :  { %2645 = vsyncpa [#allocation7], 1 }
 0x996   :  { %2646 = vsyncpa [#allocation10], 1 }
 0x997   :  { %2647 = vsyncpa [#allocation13], 1 }
 0x998   :  { %2648 = vsyncpa [#allocation16], 1 }
 0x999   :  { %2649 = vsyncpa [#allocation19], 1 }
 0x99a   :  { %2650 = vsyncpa [#allocation4], 1 }
 0x99b   :  { %2652 = vsyncpa [#allocation4 + $0x1], 1 }
 0x99c   :  { %2653 = vsyncpa [#allocation5], 1 }
 0x99d   :  { %2655 = vsyncpa [#allocation5 + $0x1], 1 }

</bundles_post_ra>
